<compile_context>
chip_gen: v5e
topology: v5e:2x2
jax: 0.10.0
libtpu: 0.0.40
codegen_flags: <defaults>
</compile_context>

<pallas_src>
import functools

import jax
import jax.numpy as jnp
from jax.experimental import pallas as pl
from jax.experimental.pallas import tpu as pltpu

TM = 128                       # row tile for the fused matmul kernel
TK_MAX = 2048                  # K is tiled only beyond this (scalability path)
VMEM_LIMIT = 32 * 1024 * 1024  # explicit per-call VMEM budget (v7x-safe)


# ----------------------------------------------------------------------------- #
# Pallas kernel: K-tiled matmul + bias + optional ReLU (bf16 in, f32 accumulate)  #
# ----------------------------------------------------------------------------- #
def _mm_bias_act_kernel(x_ref, w_ref, b_ref, o_ref, acc_ref, *, relu):
    k = pl.program_id(1)

    @pl.when(k == 0)
    def _():
        acc_ref[...] = jnp.zeros_like(acc_ref)

    acc_ref[...] += jnp.dot(x_ref[...], w_ref[...],
                            preferred_element_type=jnp.float32)

    @pl.when(k == pl.num_programs(1) - 1)
    def _():
        y = acc_ref[...] + b_ref[...]
        if relu:
            y = jnp.maximum(y, 0.0)
        o_ref[...] = y.astype(o_ref.dtype)


def matmul_bias_act(x, w, bias, *, relu, out_dtype=jnp.bfloat16):
    """y = act(x @ w + bias).  x:[M,K], w:[K,N], bias:[N].  bf16 MXU, f32 acc."""
    M, K = x.shape
    Kw, N = w.shape
    assert K == Kw
    x = x.astype(jnp.bfloat16)
    w = w.astype(jnp.bfloat16)
    bias = bias.astype(jnp.float32).reshape(1, N)

    if K <= TK_MAX:
        tk = K                               # single K step (all shapes in this net)
    else:                                    # scalability path: tile K, zero-pad tail
        tk = TK_MAX
        pad = (-K) % tk
        if pad:
            x = jnp.pad(x, ((0, 0), (0, pad)))
            w = jnp.pad(w, ((0, pad), (0, 0)))
            K = K + pad

    grid = (pl.cdiv(M, TM), K // tk)
    return pl.pallas_call(
        functools.partial(_mm_bias_act_kernel, relu=relu),
        out_shape=jax.ShapeDtypeStruct((M, N), out_dtype),
        grid=grid,
        in_specs=[
            pl.BlockSpec((TM, tk), lambda i, k: (i, k)),
            pl.BlockSpec((tk, N), lambda i, k: (k, 0)),
            pl.BlockSpec((1, N), lambda i, k: (0, 0)),
        ],
        out_specs=pl.BlockSpec((TM, N), lambda i, k: (i, 0)),
        scratch_shapes=[pltpu.VMEM((TM, N), jnp.float32)],
        compiler_params=pltpu.CompilerParams(
            dimension_semantics=("parallel", "arbitrary"),
            vmem_limit_bytes=VMEM_LIMIT),
    )(x, w, bias)


# ----------------------------------------------------------------------------- #
# Pallas kernel: fused decoder (3x3 conv -> ReLU -> 1x1 classifier, lane-dense)   #
# ----------------------------------------------------------------------------- #
def _decoder_fused_kernel(x_ref, w1_ref, b1_ref, w2_ref, b2_ref, o_ref):
    h = jnp.dot(x_ref[...], w1_ref[...], preferred_element_type=jnp.float32)
    h = jnp.maximum(h + b1_ref[...], 0.0)
    y = jnp.dot(h.astype(jnp.bfloat16), w2_ref[...],
                preferred_element_type=jnp.float32)
    o_ref[...] = (y + b2_ref[...]).astype(o_ref.dtype)


def decoder_fused(xcols, w1, b1, w2, b2, num_classes):
    """xcols:[M,K] -> relu(xcols@w1+b1) @ w2 + b2, classes padded to 128 lanes."""
    M, K = xcols.shape
    C1 = w1.shape[1]
    NP = 128                                  # lane-dense padded class dim
    w2p = jnp.pad(w2.astype(jnp.bfloat16), ((0, 0), (0, NP - num_classes)))
    b2p = jnp.pad(b2.astype(jnp.float32), (0, NP - num_classes)).reshape(1, NP)
    out = pl.pallas_call(
        _decoder_fused_kernel,
        out_shape=jax.ShapeDtypeStruct((M, NP), jnp.float32),
        grid=(pl.cdiv(M, TM),),
        in_specs=[
            pl.BlockSpec((TM, K), lambda i: (i, 0)),
            pl.BlockSpec((K, C1), lambda i: (0, 0)),
            pl.BlockSpec((1, C1), lambda i: (0, 0)),
            pl.BlockSpec((C1, NP), lambda i: (0, 0)),
            pl.BlockSpec((1, NP), lambda i: (0, 0)),
        ],
        out_specs=pl.BlockSpec((TM, NP), lambda i: (i, 0)),
        compiler_params=pltpu.CompilerParams(
            dimension_semantics=("parallel",),
            vmem_limit_bytes=VMEM_LIMIT),
    )(xcols.astype(jnp.bfloat16), w1.astype(jnp.bfloat16),
      b1.astype(jnp.float32).reshape(1, C1), w2p, b2p)
    return out[:, :num_classes]


# ----------------------------------------------------------------------------- #
# Plain-JAX glue: im2col (bf16), bilinear upsample (align_corners=True)           #
# ----------------------------------------------------------------------------- #
def im2col(x, kh, kw, stride, dilation, padding):
    # x: [N, H, W, C]  ->  [N, Ho, Wo, kh*kw*C]  (ordering: (ki, kj, c))
    N, H, W, C = x.shape
    xp = jnp.pad(x, ((0, 0), (padding, padding), (padding, padding), (0, 0)))
    Ho = (H + 2 * padding - dilation * (kh - 1) - 1) // stride + 1
    Wo = (W + 2 * padding - dilation * (kw - 1) - 1) // stride + 1
    cols = []
    for i in range(kh):
        for j in range(kw):
            r0 = i * dilation
            c0 = j * dilation
            patch = xp[:, r0:r0 + (Ho - 1) * stride + 1:stride,
                          c0:c0 + (Wo - 1) * stride + 1:stride, :]
            cols.append(patch)
    return jnp.concatenate(cols, axis=-1), Ho, Wo


def conv2d_bias_act(x, w, bias=None, *, stride=1, dilation=1, padding=0,
                    relu=True, out_dtype=jnp.bfloat16):
    """x: NHWC (bf16), w: [kh, kw, Cin, Cout] (BN pre-folded); Pallas matmul core."""
    kh, kw, Cin, Cout = w.shape
    Nb = x.shape[0]
    if kh == 1 and kw == 1 and stride == 1 and padding == 0:
        Ho, Wo = x.shape[1], x.shape[2]
        xm = x.reshape(Nb * Ho * Wo, Cin)
    else:
        cols, Ho, Wo = im2col(x, kh, kw, stride, dilation, padding)
        xm = cols.reshape(Nb * Ho * Wo, kh * kw * Cin)
    wm = w.reshape(kh * kw * Cin, Cout)
    if bias is None:
        bias = jnp.zeros((Cout,), jnp.float32)
    y = matmul_bias_act(xm, wm, bias, relu=relu, out_dtype=out_dtype)
    return y.reshape(Nb, Ho, Wo, Cout)


def bilinear_upsample_ac(x, out_h, out_w):
    # align_corners=True bilinear, NHWC
    N, H, W, C = x.shape
    ys = jnp.linspace(0.0, H - 1.0, out_h) if H > 1 else jnp.zeros((out_h,))
    xs = jnp.linspace(0.0, W - 1.0, out_w) if W > 1 else jnp.zeros((out_w,))
    y0 = jnp.clip(jnp.floor(ys).astype(jnp.int32), 0, H - 1)
    y1 = jnp.clip(y0 + 1, 0, H - 1)
    x0 = jnp.clip(jnp.floor(xs).astype(jnp.int32), 0, W - 1)
    x1 = jnp.clip(x0 + 1, 0, W - 1)
    wy = (ys - y0.astype(jnp.float32))[None, :, None, None]
    wx = (xs - x0.astype(jnp.float32))[None, None, :, None]
    g = lambda yi, xi: x[:, yi][:, :, xi]
    top = g(y0, x0) * (1 - wx) + g(y0, x1) * wx
    bot = g(y1, x0) * (1 - wx) + g(y1, x1) * wx
    return top * (1 - wy) + bot * wy


# ----------------------------------------------------------------------------- #
# Parameter initialization (deterministic); BN (eval, fresh stats) folded into W  #
# ----------------------------------------------------------------------------- #
BN_EPS = 1e-5
BN_SCALE = (1.0 + BN_EPS) ** -0.5   # fresh BN: gamma=1, beta=0, mean=0, var=1


def _winit(key, shape, std=0.05):
    return std * jax.random.normal(key, shape, dtype=jnp.float32)


def _bn_fold(w):
    return (w * BN_SCALE).astype(jnp.bfloat16)


def init_params(key):
    ks = jax.random.split(key, 24)
    p = {}
    # backbone (resnet-like, simplified): 3 strided conv+BN+ReLU stages
    p["bb1_w"] = _bn_fold(_winit(ks[0], (3, 3, 3, 32)))
    p["bb2_w"] = _bn_fold(_winit(ks[1], (3, 3, 32, 64)))     # -> x2
    p["bb3_w"] = _bn_fold(_winit(ks[2], (3, 3, 64, 128)))    # -> x3
    # multi_graph_conv: node-feature projection
    p["gc_w"] = _winit(ks[3], (128, 128)).astype(jnp.bfloat16)
    p["gc_b"] = jnp.zeros((128,), jnp.float32)
    # ASPP: 1x1 + three dilated 3x3 + global-pool branch, each 128 -> 64
    p["aspp1_w"] = _bn_fold(_winit(ks[4], (1, 1, 128, 64)))
    p["aspp2_w"] = _bn_fold(_winit(ks[5], (3, 3, 128, 64)))
    p["aspp3_w"] = _bn_fold(_winit(ks[6], (3, 3, 128, 64)))
    p["aspp4_w"] = _bn_fold(_winit(ks[7], (3, 3, 128, 64)))
    p["aspp_gp_w"] = _bn_fold(_winit(ks[8], (1, 1, 128, 64)))
    p["aspp_proj_w"] = _bn_fold(_winit(ks[9], (1, 1, 320, 64)))
    # decoder: 3x3 conv + BN + ReLU, then 1x1 -> num_classes(=2)
    p["dec1_w"] = _bn_fold(_winit(ks[10], (3, 3, 64, 64)))
    p["dec1_b"] = jnp.zeros((64,), jnp.float32)
    p["dec2_w"] = _winit(ks[11], (1, 1, 64, 2)).astype(jnp.bfloat16)
    p["dec2_b"] = jnp.zeros((2,), jnp.float32)
    return p


# ----------------------------------------------------------------------------- #
# Model blocks                                                                   #
# ----------------------------------------------------------------------------- #
def backbone(p, x):
    h = conv2d_bias_act(x, p["bb1_w"], stride=2, padding=1, relu=True)
    x2 = conv2d_bias_act(h, p["bb2_w"], stride=2, padding=1, relu=True)
    x3 = conv2d_bias_act(x2, p["bb3_w"], stride=2, padding=1, relu=True)
    return x2, x3


def multi_graph_conv(p, x, mask):
    # x: [N, h, w, C]; mask: [N, H, W] (full-resolution).  Simplified graph conv:
    # adjacency from downsampled-mask affinity, then node propagation + projection.
    N, h, w, C = x.shape
    H, W = mask.shape[1], mask.shape[2]
    fh, fw = H // h, W // w
    m = mask.reshape(N, h, fh, w, fw).mean(axis=(2, 4))          # avg-pool to (h, w)
    L = h * w
    Xn = x.reshape(N, L, C).astype(jnp.float32)
    mflat = m.reshape(N, L)
    A = mflat[:, :, None] * mflat[:, None, :] + jnp.eye(L, dtype=jnp.float32)[None]
    A = A / (jnp.sum(A, axis=-1, keepdims=True) + 1e-6)
    # A@X is a tiny (L=16) batched matmul: keep it in XLA; batching all samples
    # into one Pallas call for the 128->128 projection removes N launches.
    AX = jnp.einsum("blk,bkc->blc", A, Xn).reshape(N * L, C)
    out = matmul_bias_act(AX, p["gc_w"], p["gc_b"], relu=True)
    return out.reshape(N, h, w, C)


def aspp(p, x):
    N, h, w, C = x.shape
    b1 = conv2d_bias_act(x, p["aspp1_w"], relu=True)
    b2 = conv2d_bias_act(x, p["aspp2_w"], dilation=6, padding=6, relu=True)
    b3 = conv2d_bias_act(x, p["aspp3_w"], dilation=12, padding=12, relu=True)
    b4 = conv2d_bias_act(x, p["aspp4_w"], dilation=18, padding=18, relu=True)
    # Global-pool branch: M == batch (=2) — pure jnp, no pallas_call launch.
    gp = jnp.mean(x.astype(jnp.float32), axis=(1, 2))                        # [N, C]
    gpw = p["aspp_gp_w"].reshape(C, 64).astype(jnp.float32)
    gp = jnp.maximum(gp @ gpw, 0.0)                                          # [N, 64]
    gp = jnp.broadcast_to(gp[:, None, None, :], (N, h, w, 64)).astype(jnp.bfloat16)
    cat = jnp.concatenate([b1, b2, b3, b4, gp], axis=-1)                     # [N,h,w,320]
    return conv2d_bias_act(cat, p["aspp_proj_w"], relu=True)


def decoder(p, x, out_h, out_w, num_classes=2):
    Nb, h, w, C = x.shape
    cols, Ho, Wo = im2col(x, 3, 3, 1, 1, 1)
    xm = cols.reshape(Nb * Ho * Wo, 9 * C)
    # One fused kernel: 3x3 conv (BN folded) + ReLU + 1x1 classifier, 128-lane output.
    logits = decoder_fused(xm, p["dec1_w"].reshape(9 * C, 64), p["dec1_b"],
                           p["dec2_w"].reshape(C, num_classes), p["dec2_b"],
                           num_classes)
    logits = logits.reshape(Nb, Ho, Wo, num_classes).astype(jnp.float32)
    return bilinear_upsample_ac(logits, out_h, out_w)


def deeplab_forward(p, input_nchw, mask):
    # Matches DeepLab.forward: x2, x3 = backbone(input); g = graph_conv(x3, mask);
    # y = decoder(aspp(g))
    x = jnp.transpose(input_nchw, (0, 2, 3, 1)).astype(jnp.bfloat16)   # NCHW -> NHWC
    H, W = x.shape[1], x.shape[2]
    x2, x3 = backbone(p, x)
    g = multi_graph_conv(p, x3, mask)
    a = aspp(p, g)
    y = decoder(p, a, H, W)
    return jnp.transpose(y, (0, 3, 1, 2))                              # NHWC -> NCHW


# ----------------------------------------------------------------------------- #
if __name__ == "__main__":
    key = jax.random.PRNGKey(0)
    pkey, xkey, mkey = jax.random.split(key, 3)
    params = init_params(pkey)

    N, C, H, W = 2, 3, 32, 32
    inp = jax.random.normal(xkey, (N, C, H, W), dtype=jnp.float32)
    mask = jax.random.bernoulli(mkey, 0.5, (N, H, W)).astype(jnp.float32)

    fwd = jax.jit(deeplab_forward)
    out = jax.block_until_ready(fwd(params, inp, mask))
    assert out.shape == (N, 2, H, W), out.shape
    assert jnp.all(jnp.isfinite(out))
    print("KERNEL_OK")
</pallas_src>

<mosaic_0001>
module attributes {stable_mosaic.version = 11 : i64} {
  func.func @_mm_bias_act_kernel(%arg0: i32, %arg1: i32, %arg2: memref<128x27xbf16, #tpu.memory_space<vmem>>, %arg3: memref<27x32xbf16, #tpu.memory_space<vmem>>, %arg4: memref<1x32xf32, #tpu.memory_space<vmem>>, %arg5: memref<128x32xbf16, #tpu.memory_space<vmem>>, %arg6: memref<128x32xf32, #tpu.memory_space<vmem>>) attributes {dimension_semantics = [#tpu.dimension_semantics<parallel>, #tpu.dimension_semantics<arbitrary>], iteration_bounds = array<i64: 4, 1>, scalar_prefetch = 0 : i64, scratch_operands = 1 : i64, tpu.core_type = #tpu.core_type<tc>, window_params = [{transform_indices = @transform_0, window_bounds = array<i64: 128, 27>}, {transform_indices = @transform_1, window_bounds = array<i64: 27, 32>}, {pipeline_mode = #tpu.pipeline_mode<synchronous>, transform_indices = @transform_2, window_bounds = array<i64: 1, 32>}, {transform_indices = @transform_3, window_bounds = array<i64: 128, 32>}]} {
    %c0_i32 = arith.constant 0 : i32
    %0 = arith.cmpi eq, %arg1, %c0_i32 : i32
    %1 = arith.extui %0 : i1 to i32
    %c0_i32_0 = arith.constant 0 : i32
    %2 = arith.cmpi ne, %1, %c0_i32_0 : i32
    scf.if %2 {
      %cst_10 = arith.constant 0.000000e+00 : f32
      %12 = vector.broadcast %cst_10 : f32 to vector<128x32xf32>
      %c0_11 = arith.constant 0 : index
      %c0_12 = arith.constant 0 : index
      %13 = vector.load %arg6[%c0_11, %c0_12] : memref<128x32xf32, #tpu.memory_space<vmem>>, vector<128x32xf32>
      tpu.vector_store %arg6[%c0_11, %c0_12], %12 {strides = array<i32>} : memref<128x32xf32, #tpu.memory_space<vmem>>, vector<128x32xf32>,
    } else {
    }
    %c0 = arith.constant 0 : index
    %c0_1 = arith.constant 0 : index
    %3 = vector.load %arg6[%c0, %c0_1] : memref<128x32xf32, #tpu.memory_space<vmem>>, vector<128x32xf32>
    %c0_2 = arith.constant 0 : index
    %c0_3 = arith.constant 0 : index
    %4 = vector.load %arg2[%c0_2, %c0_3] : memref<128x27xbf16, #tpu.memory_space<vmem>>, vector<128x27xbf16>
    %c0_4 = arith.constant 0 : index
    %c0_5 = arith.constant 0 : index
    %5 = vector.load %arg3[%c0_4, %c0_5] : memref<27x32xbf16, #tpu.memory_space<vmem>>, vector<27x32xbf16>
    %cst = arith.constant dense<0.000000e+00> : vector<128x32xf32>
    %6 = tpu.matmul %4, %5, %cst {dimension_numbers = #tpu.dot_dimension_numbers<[1], [0], [0], [1], [0, 0, 1, 1], [], []>} : vector<128x27xbf16>, vector<27x32xbf16>, vector<128x32xf32> -> vector<128x32xf32>
    %7 = arith.addf %3, %6 : vector<128x32xf32>
    %c0_6 = arith.constant 0 : index
    %c0_7 = arith.constant 0 : index
    %8 = vector.load %arg6[%c0_6, %c0_7] : memref<128x32xf32, #tpu.memory_space<vmem>>, vector<128x32xf32>
    tpu.vector_store %arg6[%c0_6, %c0_7], %7 {strides = array<i32>} : memref<128x32xf32, #tpu.memory_space<vmem>>, vector<128x32xf32>,
    %c0_i32_8 = arith.constant 0 : i32
    %9 = arith.cmpi eq, %arg1, %c0_i32_8 : i32
    %10 = arith.extui %9 : i1 to i32
    %c0_i32_9 = arith.constant 0 : i32
    %11 = arith.cmpi ne, %10, %c0_i32_9 : i32
    scf.if %11 {
      %c0_10 = arith.constant 0 : index
      %c0_11 = arith.constant 0 : index
      %12 = vector.load %arg6[%c0_10, %c0_11] : memref<128x32xf32, #tpu.memory_space<vmem>>, vector<128x32xf32>
      %c0_12 = arith.constant 0 : index
      %c0_13 = arith.constant 0 : index
      %13 = vector.load %arg4[%c0_12, %c0_13] : memref<1x32xf32, #tpu.memory_space<vmem>>, vector<1x32xf32>
      %14 = vector.broadcast %13 : vector<1x32xf32> to vector<128x32xf32>
      %15 = arith.addf %12, %14 : vector<128x32xf32>
      %cst_14 = arith.constant 0.000000e+00 : f32
      %16 = vector.broadcast %cst_14 : f32 to vector<128x32xf32>
      %17 = arith.maximumf %15, %16 : vector<128x32xf32>
      %18 = arith.truncf %17 : vector<128x32xf32> to vector<128x32xbf16>
      %c0_15 = arith.constant 0 : index
      %c0_16 = arith.constant 0 : index
      %19 = vector.load %arg5[%c0_15, %c0_16] : memref<128x32xbf16, #tpu.memory_space<vmem>>, vector<128x32xbf16>
      tpu.vector_store %arg5[%c0_15, %c0_16], %18 {strides = array<i32>} : memref<128x32xbf16, #tpu.memory_space<vmem>>, vector<128x32xbf16>,
    } else {
    }
    return
  }
  func.func @transform_0(%arg0: i32, %arg1: i32) -> (i32, i32) {
    %c0_i32 = arith.constant 0 : i32
    return %arg0, %arg1 : i32, i32
  }
  func.func @transform_1(%arg0: i32, %arg1: i32) -> (i32, i32) {
    %c0_i32 = arith.constant 0 : i32
    %c0_i32_0 = arith.constant 0 : i32
    return %arg1, %c0_i32 : i32, i32
  }
  func.func @transform_2(%arg0: i32, %arg1: i32) -> (i32, i32) {
    %c0_i32 = arith.constant 0 : i32
    %c0_i32_0 = arith.constant 0 : i32
    %c0_i32_1 = arith.constant 0 : i32
    return %c0_i32, %c0_i32_0 : i32, i32
  }
  func.func @transform_3(%arg0: i32, %arg1: i32) -> (i32, i32) {
    %c0_i32 = arith.constant 0 : i32
    %c0_i32_0 = arith.constant 0 : i32
    return %arg0, %c0_i32 : i32, i32
  }
}

module attributes {stable_mosaic.version = 11 : i64} {
  func.func @_mm_bias_act_kernel(%arg0: i32, %arg1: i32, %arg2: memref<128x288xbf16, #tpu.memory_space<vmem>>, %arg3: memref<288x64xbf16, #tpu.memory_space<vmem>>, %arg4: memref<1x64xf32, #tpu.memory_space<vmem>>, %arg5: memref<128x64xbf16, #tpu.memory_space<vmem>>, %arg6: memref<128x64xf32, #tpu.memory_space<vmem>>) attributes {dimension_semantics = [#tpu.dimension_semantics<parallel>, #tpu.dimension_semantics<arbitrary>], iteration_bounds = array<i64: 1, 1>, scalar_prefetch = 0 : i64, scratch_operands = 1 : i64, tpu.core_type = #tpu.core_type<tc>, window_params = [{transform_indices = @transform_0, window_bounds = array<i64: 128, 288>}, {transform_indices = @transform_1, window_bounds = array<i64: 288, 64>}, {pipeline_mode = #tpu.pipeline_mode<synchronous>, transform_indices = @transform_2, window_bounds = array<i64: 1, 64>}, {transform_indices = @transform_3, window_bounds = array<i64: 128, 64>}]} {
    %c0_i32 = arith.constant 0 : i32
    %0 = arith.cmpi eq, %arg1, %c0_i32 : i32
    %1 = arith.extui %0 : i1 to i32
    %c0_i32_0 = arith.constant 0 : i32
    %2 = arith.cmpi ne, %1, %c0_i32_0 : i32
    scf.if %2 {
      %cst_10 = arith.constant 0.000000e+00 : f32
      %12 = vector.broadcast %cst_10 : f32 to vector<128x64xf32>
      %c0_11 = arith.constant 0 : index
      %c0_12 = arith.constant 0 : index
      %13 = vector.load %arg6[%c0_11, %c0_12] : memref<128x64xf32, #tpu.memory_space<vmem>>, vector<128x64xf32>
      tpu.vector_store %arg6[%c0_11, %c0_12], %12 {strides = array<i32>} : memref<128x64xf32, #tpu.memory_space<vmem>>, vector<128x64xf32>,
    } else {
    }
    %c0 = arith.constant 0 : index
    %c0_1 = arith.constant 0 : index
    %3 = vector.load %arg6[%c0, %c0_1] : memref<128x64xf32, #tpu.memory_space<vmem>>, vector<128x64xf32>
    %c0_2 = arith.constant 0 : index
    %c0_3 = arith.constant 0 : index
    %4 = vector.load %arg2[%c0_2, %c0_3] : memref<128x288xbf16, #tpu.memory_space<vmem>>, vector<128x288xbf16>
    %c0_4 = arith.constant 0 : index
    %c0_5 = arith.constant 0 : index
    %5 = vector.load %arg3[%c0_4, %c0_5] : memref<288x64xbf16, #tpu.memory_space<vmem>>, vector<288x64xbf16>
    %cst = arith.constant dense<0.000000e+00> : vector<128x64xf32>
    %6 = tpu.matmul %4, %5, %cst {dimension_numbers = #tpu.dot_dimension_numbers<[1], [0], [0], [1], [0, 0, 1, 1], [], []>} : vector<128x288xbf16>, vector<288x64xbf16>, vector<128x64xf32> -> vector<128x64xf32>
    %7 = arith.addf %3, %6 : vector<128x64xf32>
    %c0_6 = arith.constant 0 : index
    %c0_7 = arith.constant 0 : index
    %8 = vector.load %arg6[%c0_6, %c0_7] : memref<128x64xf32, #tpu.memory_space<vmem>>, vector<128x64xf32>
    tpu.vector_store %arg6[%c0_6, %c0_7], %7 {strides = array<i32>} : memref<128x64xf32, #tpu.memory_space<vmem>>, vector<128x64xf32>,
    %c0_i32_8 = arith.constant 0 : i32
    %9 = arith.cmpi eq, %arg1, %c0_i32_8 : i32
    %10 = arith.extui %9 : i1 to i32
    %c0_i32_9 = arith.constant 0 : i32
    %11 = arith.cmpi ne, %10, %c0_i32_9 : i32
    scf.if %11 {
      %c0_10 = arith.constant 0 : index
      %c0_11 = arith.constant 0 : index
      %12 = vector.load %arg6[%c0_10, %c0_11] : memref<128x64xf32, #tpu.memory_space<vmem>>, vector<128x64xf32>
      %c0_12 = arith.constant 0 : index
      %c0_13 = arith.constant 0 : index
      %13 = vector.load %arg4[%c0_12, %c0_13] : memref<1x64xf32, #tpu.memory_space<vmem>>, vector<1x64xf32>
      %14 = vector.broadcast %13 : vector<1x64xf32> to vector<128x64xf32>
      %15 = arith.addf %12, %14 : vector<128x64xf32>
      %cst_14 = arith.constant 0.000000e+00 : f32
      %16 = vector.broadcast %cst_14 : f32 to vector<128x64xf32>
      %17 = arith.maximumf %15, %16 : vector<128x64xf32>
      %18 = arith.truncf %17 : vector<128x64xf32> to vector<128x64xbf16>
      %c0_15 = arith.constant 0 : index
      %c0_16 = arith.constant 0 : index
      %19 = vector.load %arg5[%c0_15, %c0_16] : memref<128x64xbf16, #tpu.memory_space<vmem>>, vector<128x64xbf16>
      tpu.vector_store %arg5[%c0_15, %c0_16], %18 {strides = array<i32>} : memref<128x64xbf16, #tpu.memory_space<vmem>>, vector<128x64xbf16>,
    } else {
    }
    return
  }
  func.func @transform_0(%arg0: i32, %arg1: i32) -> (i32, i32) {
    %c0_i32 = arith.constant 0 : i32
    return %arg0, %arg1 : i32, i32
  }
  func.func @transform_1(%arg0: i32, %arg1: i32) -> (i32, i32) {
    %c0_i32 = arith.constant 0 : i32
    %c0_i32_0 = arith.constant 0 : i32
    return %arg1, %c0_i32 : i32, i32
  }
  func.func @transform_2(%arg0: i32, %arg1: i32) -> (i32, i32) {
    %c0_i32 = arith.constant 0 : i32
    %c0_i32_0 = arith.constant 0 : i32
    %c0_i32_1 = arith.constant 0 : i32
    return %c0_i32, %c0_i32_0 : i32, i32
  }
  func.func @transform_3(%arg0: i32, %arg1: i32) -> (i32, i32) {
    %c0_i32 = arith.constant 0 : i32
    %c0_i32_0 = arith.constant 0 : i32
    return %arg0, %c0_i32 : i32, i32
  }
}

module attributes {stable_mosaic.version = 11 : i64} {
  func.func @_mm_bias_act_kernel(%arg0: i32, %arg1: i32, %arg2: memref<128x576xbf16, #tpu.memory_space<vmem>>, %arg3: memref<576x128xbf16, #tpu.memory_space<vmem>>, %arg4: memref<1x128xf32, #tpu.memory_space<vmem>>, %arg5: memref<128x128xbf16, #tpu.memory_space<vmem>>, %arg6: memref<128x128xf32, #tpu.memory_space<vmem>>) attributes {dimension_semantics = [#tpu.dimension_semantics<parallel>, #tpu.dimension_semantics<arbitrary>], iteration_bounds = array<i64: 1, 1>, scalar_prefetch = 0 : i64, scratch_operands = 1 : i64, tpu.core_type = #tpu.core_type<tc>, window_params = [{transform_indices = @transform_0, window_bounds = array<i64: 128, 576>}, {transform_indices = @transform_1, window_bounds = array<i64: 576, 128>}, {pipeline_mode = #tpu.pipeline_mode<synchronous>, transform_indices = @transform_2, window_bounds = array<i64: 1, 128>}, {transform_indices = @transform_3, window_bounds = array<i64: 128, 128>}]} {
    %c0_i32 = arith.constant 0 : i32
    %0 = arith.cmpi eq, %arg1, %c0_i32 : i32
    %1 = arith.extui %0 : i1 to i32
    %c0_i32_0 = arith.constant 0 : i32
    %2 = arith.cmpi ne, %1, %c0_i32_0 : i32
    scf.if %2 {
      %cst_10 = arith.constant 0.000000e+00 : f32
      %12 = vector.broadcast %cst_10 : f32 to vector<128x128xf32>
      %c0_11 = arith.constant 0 : index
      %c0_12 = arith.constant 0 : index
      %13 = vector.load %arg6[%c0_11, %c0_12] : memref<128x128xf32, #tpu.memory_space<vmem>>, vector<128x128xf32>
      tpu.vector_store %arg6[%c0_11, %c0_12], %12 {strides = array<i32>} : memref<128x128xf32, #tpu.memory_space<vmem>>, vector<128x128xf32>,
    } else {
    }
    %c0 = arith.constant 0 : index
    %c0_1 = arith.constant 0 : index
    %3 = vector.load %arg6[%c0, %c0_1] : memref<128x128xf32, #tpu.memory_space<vmem>>, vector<128x128xf32>
    %c0_2 = arith.constant 0 : index
    %c0_3 = arith.constant 0 : index
    %4 = vector.load %arg2[%c0_2, %c0_3] : memref<128x576xbf16, #tpu.memory_space<vmem>>, vector<128x576xbf16>
    %c0_4 = arith.constant 0 : index
    %c0_5 = arith.constant 0 : index
    %5 = vector.load %arg3[%c0_4, %c0_5] : memref<576x128xbf16, #tpu.memory_space<vmem>>, vector<576x128xbf16>
    %cst = arith.constant dense<0.000000e+00> : vector<128x128xf32>
    %6 = tpu.matmul %4, %5, %cst {dimension_numbers = #tpu.dot_dimension_numbers<[1], [0], [0], [1], [0, 0, 1, 1], [], []>} : vector<128x576xbf16>, vector<576x128xbf16>, vector<128x128xf32> -> vector<128x128xf32>
    %7 = arith.addf %3, %6 : vector<128x128xf32>
    %c0_6 = arith.constant 0 : index
    %c0_7 = arith.constant 0 : index
    %8 = vector.load %arg6[%c0_6, %c0_7] : memref<128x128xf32, #tpu.memory_space<vmem>>, vector<128x128xf32>
    tpu.vector_store %arg6[%c0_6, %c0_7], %7 {strides = array<i32>} : memref<128x128xf32, #tpu.memory_space<vmem>>, vector<128x128xf32>,
    %c0_i32_8 = arith.constant 0 : i32
    %9 = arith.cmpi eq, %arg1, %c0_i32_8 : i32
    %10 = arith.extui %9 : i1 to i32
    %c0_i32_9 = arith.constant 0 : i32
    %11 = arith.cmpi ne, %10, %c0_i32_9 : i32
    scf.if %11 {
      %c0_10 = arith.constant 0 : index
      %c0_11 = arith.constant 0 : index
      %12 = vector.load %arg6[%c0_10, %c0_11] : memref<128x128xf32, #tpu.memory_space<vmem>>, vector<128x128xf32>
      %c0_12 = arith.constant 0 : index
      %c0_13 = arith.constant 0 : index
      %13 = vector.load %arg4[%c0_12, %c0_13] : memref<1x128xf32, #tpu.memory_space<vmem>>, vector<1x128xf32>
      %14 = vector.broadcast %13 : vector<1x128xf32> to vector<128x128xf32>
      %15 = arith.addf %12, %14 : vector<128x128xf32>
      %cst_14 = arith.constant 0.000000e+00 : f32
      %16 = vector.broadcast %cst_14 : f32 to vector<128x128xf32>
      %17 = arith.maximumf %15, %16 : vector<128x128xf32>
      %18 = arith.truncf %17 : vector<128x128xf32> to vector<128x128xbf16>
      %c0_15 = arith.constant 0 : index
      %c0_16 = arith.constant 0 : index
      %19 = vector.load %arg5[%c0_15, %c0_16] : memref<128x128xbf16, #tpu.memory_space<vmem>>, vector<128x128xbf16>
      tpu.vector_store %arg5[%c0_15, %c0_16], %18 {strides = array<i32>} : memref<128x128xbf16, #tpu.memory_space<vmem>>, vector<128x128xbf16>,
    } else {
    }
    return
  }
  func.func @transform_0(%arg0: i32, %arg1: i32) -> (i32, i32) {
    %c0_i32 = arith.constant 0 : i32
    return %arg0, %arg1 : i32, i32
  }
  func.func @transform_1(%arg0: i32, %arg1: i32) -> (i32, i32) {
    %c0_i32 = arith.constant 0 : i32
    %c0_i32_0 = arith.constant 0 : i32
    return %arg1, %c0_i32 : i32, i32
  }
  func.func @transform_2(%arg0: i32, %arg1: i32) -> (i32, i32) {
    %c0_i32 = arith.constant 0 : i32
    %c0_i32_0 = arith.constant 0 : i32
    %c0_i32_1 = arith.constant 0 : i32
    return %c0_i32, %c0_i32_0 : i32, i32
  }
  func.func @transform_3(%arg0: i32, %arg1: i32) -> (i32, i32) {
    %c0_i32 = arith.constant 0 : i32
    %c0_i32_0 = arith.constant 0 : i32
    return %arg0, %c0_i32 : i32, i32
  }
}

module attributes {stable_mosaic.version = 11 : i64} {
  func.func @_mm_bias_act_kernel(%arg0: i32, %arg1: i32, %arg2: memref<128x128xbf16, #tpu.memory_space<vmem>>, %arg3: memref<128x128xbf16, #tpu.memory_space<vmem>>, %arg4: memref<1x128xf32, #tpu.memory_space<vmem>>, %arg5: memref<128x128xbf16, #tpu.memory_space<vmem>>, %arg6: memref<128x128xf32, #tpu.memory_space<vmem>>) attributes {dimension_semantics = [#tpu.dimension_semantics<parallel>, #tpu.dimension_semantics<arbitrary>], iteration_bounds = array<i64: 1, 1>, scalar_prefetch = 0 : i64, scratch_operands = 1 : i64, tpu.core_type = #tpu.core_type<tc>, window_params = [{transform_indices = @transform_0, window_bounds = array<i64: 128, 128>}, {transform_indices = @transform_1, window_bounds = array<i64: 128, 128>}, {pipeline_mode = #tpu.pipeline_mode<synchronous>, transform_indices = @transform_2, window_bounds = array<i64: 1, 128>}, {transform_indices = @transform_3, window_bounds = array<i64: 128, 128>}]} {
    %c0_i32 = arith.constant 0 : i32
    %0 = arith.cmpi eq, %arg1, %c0_i32 : i32
    %1 = arith.extui %0 : i1 to i32
    %c0_i32_0 = arith.constant 0 : i32
    %2 = arith.cmpi ne, %1, %c0_i32_0 : i32
    scf.if %2 {
      %cst_10 = arith.constant 0.000000e+00 : f32
      %12 = vector.broadcast %cst_10 : f32 to vector<128x128xf32>
      %c0_11 = arith.constant 0 : index
      %c0_12 = arith.constant 0 : index
      %13 = vector.load %arg6[%c0_11, %c0_12] : memref<128x128xf32, #tpu.memory_space<vmem>>, vector<128x128xf32>
      tpu.vector_store %arg6[%c0_11, %c0_12], %12 {strides = array<i32>} : memref<128x128xf32, #tpu.memory_space<vmem>>, vector<128x128xf32>,
    } else {
    }
    %c0 = arith.constant 0 : index
    %c0_1 = arith.constant 0 : index
    %3 = vector.load %arg6[%c0, %c0_1] : memref<128x128xf32, #tpu.memory_space<vmem>>, vector<128x128xf32>
    %c0_2 = arith.constant 0 : index
    %c0_3 = arith.constant 0 : index
    %4 = vector.load %arg2[%c0_2, %c0_3] : memref<128x128xbf16, #tpu.memory_space<vmem>>, vector<128x128xbf16>
    %c0_4 = arith.constant 0 : index
    %c0_5 = arith.constant 0 : index
    %5 = vector.load %arg3[%c0_4, %c0_5] : memref<128x128xbf16, #tpu.memory_space<vmem>>, vector<128x128xbf16>
    %cst = arith.constant dense<0.000000e+00> : vector<128x128xf32>
    %6 = tpu.matmul %4, %5, %cst {dimension_numbers = #tpu.dot_dimension_numbers<[1], [0], [0], [1], [0, 0, 1, 1], [], []>} : vector<128x128xbf16>, vector<128x128xbf16>, vector<128x128xf32> -> vector<128x128xf32>
    %7 = arith.addf %3, %6 : vector<128x128xf32>
    %c0_6 = arith.constant 0 : index
    %c0_7 = arith.constant 0 : index
    %8 = vector.load %arg6[%c0_6, %c0_7] : memref<128x128xf32, #tpu.memory_space<vmem>>, vector<128x128xf32>
    tpu.vector_store %arg6[%c0_6, %c0_7], %7 {strides = array<i32>} : memref<128x128xf32, #tpu.memory_space<vmem>>, vector<128x128xf32>,
    %c0_i32_8 = arith.constant 0 : i32
    %9 = arith.cmpi eq, %arg1, %c0_i32_8 : i32
    %10 = arith.extui %9 : i1 to i32
    %c0_i32_9 = arith.constant 0 : i32
    %11 = arith.cmpi ne, %10, %c0_i32_9 : i32
    scf.if %11 {
      %c0_10 = arith.constant 0 : index
      %c0_11 = arith.constant 0 : index
      %12 = vector.load %arg6[%c0_10, %c0_11] : memref<128x128xf32, #tpu.memory_space<vmem>>, vector<128x128xf32>
      %c0_12 = arith.constant 0 : index
      %c0_13 = arith.constant 0 : index
      %13 = vector.load %arg4[%c0_12, %c0_13] : memref<1x128xf32, #tpu.memory_space<vmem>>, vector<1x128xf32>
      %14 = vector.broadcast %13 : vector<1x128xf32> to vector<128x128xf32>
      %15 = arith.addf %12, %14 : vector<128x128xf32>
      %cst_14 = arith.constant 0.000000e+00 : f32
      %16 = vector.broadcast %cst_14 : f32 to vector<128x128xf32>
      %17 = arith.maximumf %15, %16 : vector<128x128xf32>
      %18 = arith.truncf %17 : vector<128x128xf32> to vector<128x128xbf16>
      %c0_15 = arith.constant 0 : index
      %c0_16 = arith.constant 0 : index
      %19 = vector.load %arg5[%c0_15, %c0_16] : memref<128x128xbf16, #tpu.memory_space<vmem>>, vector<128x128xbf16>
      tpu.vector_store %arg5[%c0_15, %c0_16], %18 {strides = array<i32>} : memref<128x128xbf16, #tpu.memory_space<vmem>>, vector<128x128xbf16>,
    } else {
    }
    return
  }
  func.func @transform_0(%arg0: i32, %arg1: i32) -> (i32, i32) {
    %c0_i32 = arith.constant 0 : i32
    return %arg0, %arg1 : i32, i32
  }
  func.func @transform_1(%arg0: i32, %arg1: i32) -> (i32, i32) {
    %c0_i32 = arith.constant 0 : i32
    %c0_i32_0 = arith.constant 0 : i32
    return %arg1, %c0_i32 : i32, i32
  }
  func.func @transform_2(%arg0: i32, %arg1: i32) -> (i32, i32) {
    %c0_i32 = arith.constant 0 : i32
    %c0_i32_0 = arith.constant 0 : i32
    %c0_i32_1 = arith.constant 0 : i32
    return %c0_i32, %c0_i32_0 : i32, i32
  }
  func.func @transform_3(%arg0: i32, %arg1: i32) -> (i32, i32) {
    %c0_i32 = arith.constant 0 : i32
    %c0_i32_0 = arith.constant 0 : i32
    return %arg0, %c0_i32 : i32, i32
  }
}

module attributes {stable_mosaic.version = 11 : i64} {
  func.func @_mm_bias_act_kernel(%arg0: i32, %arg1: i32, %arg2: memref<128x1152xbf16, #tpu.memory_space<vmem>>, %arg3: memref<1152x64xbf16, #tpu.memory_space<vmem>>, %arg4: memref<1x64xf32, #tpu.memory_space<vmem>>, %arg5: memref<128x64xbf16, #tpu.memory_space<vmem>>, %arg6: memref<128x64xf32, #tpu.memory_space<vmem>>) attributes {dimension_semantics = [#tpu.dimension_semantics<parallel>, #tpu.dimension_semantics<arbitrary>], iteration_bounds = array<i64: 1, 1>, scalar_prefetch = 0 : i64, scratch_operands = 1 : i64, tpu.core_type = #tpu.core_type<tc>, window_params = [{transform_indices = @transform_0, window_bounds = array<i64: 128, 1152>}, {transform_indices = @transform_1, window_bounds = array<i64: 1152, 64>}, {pipeline_mode = #tpu.pipeline_mode<synchronous>, transform_indices = @transform_2, window_bounds = array<i64: 1, 64>}, {transform_indices = @transform_3, window_bounds = array<i64: 128, 64>}]} {
    %c0_i32 = arith.constant 0 : i32
    %0 = arith.cmpi eq, %arg1, %c0_i32 : i32
    %1 = arith.extui %0 : i1 to i32
    %c0_i32_0 = arith.constant 0 : i32
    %2 = arith.cmpi ne, %1, %c0_i32_0 : i32
    scf.if %2 {
      %cst_10 = arith.constant 0.000000e+00 : f32
      %12 = vector.broadcast %cst_10 : f32 to vector<128x64xf32>
      %c0_11 = arith.constant 0 : index
      %c0_12 = arith.constant 0 : index
      %13 = vector.load %arg6[%c0_11, %c0_12] : memref<128x64xf32, #tpu.memory_space<vmem>>, vector<128x64xf32>
      tpu.vector_store %arg6[%c0_11, %c0_12], %12 {strides = array<i32>} : memref<128x64xf32, #tpu.memory_space<vmem>>, vector<128x64xf32>,
    } else {
    }
    %c0 = arith.constant 0 : index
    %c0_1 = arith.constant 0 : index
    %3 = vector.load %arg6[%c0, %c0_1] : memref<128x64xf32, #tpu.memory_space<vmem>>, vector<128x64xf32>
    %c0_2 = arith.constant 0 : index
    %c0_3 = arith.constant 0 : index
    %4 = vector.load %arg2[%c0_2, %c0_3] : memref<128x1152xbf16, #tpu.memory_space<vmem>>, vector<128x1152xbf16>
    %c0_4 = arith.constant 0 : index
    %c0_5 = arith.constant 0 : index
    %5 = vector.load %arg3[%c0_4, %c0_5] : memref<1152x64xbf16, #tpu.memory_space<vmem>>, vector<1152x64xbf16>
    %cst = arith.constant dense<0.000000e+00> : vector<128x64xf32>
    %6 = tpu.matmul %4, %5, %cst {dimension_numbers = #tpu.dot_dimension_numbers<[1], [0], [0], [1], [0, 0, 1, 1], [], []>} : vector<128x1152xbf16>, vector<1152x64xbf16>, vector<128x64xf32> -> vector<128x64xf32>
    %7 = arith.addf %3, %6 : vector<128x64xf32>
    %c0_6 = arith.constant 0 : index
    %c0_7 = arith.constant 0 : index
    %8 = vector.load %arg6[%c0_6, %c0_7] : memref<128x64xf32, #tpu.memory_space<vmem>>, vector<128x64xf32>
    tpu.vector_store %arg6[%c0_6, %c0_7], %7 {strides = array<i32>} : memref<128x64xf32, #tpu.memory_space<vmem>>, vector<128x64xf32>,
    %c0_i32_8 = arith.constant 0 : i32
    %9 = arith.cmpi eq, %arg1, %c0_i32_8 : i32
    %10 = arith.extui %9 : i1 to i32
    %c0_i32_9 = arith.constant 0 : i32
    %11 = arith.cmpi ne, %10, %c0_i32_9 : i32
    scf.if %11 {
      %c0_10 = arith.constant 0 : index
      %c0_11 = arith.constant 0 : index
      %12 = vector.load %arg6[%c0_10, %c0_11] : memref<128x64xf32, #tpu.memory_space<vmem>>, vector<128x64xf32>
      %c0_12 = arith.constant 0 : index
      %c0_13 = arith.constant 0 : index
      %13 = vector.load %arg4[%c0_12, %c0_13] : memref<1x64xf32, #tpu.memory_space<vmem>>, vector<1x64xf32>
      %14 = vector.broadcast %13 : vector<1x64xf32> to vector<128x64xf32>
      %15 = arith.addf %12, %14 : vector<128x64xf32>
      %cst_14 = arith.constant 0.000000e+00 : f32
      %16 = vector.broadcast %cst_14 : f32 to vector<128x64xf32>
      %17 = arith.maximumf %15, %16 : vector<128x64xf32>
      %18 = arith.truncf %17 : vector<128x64xf32> to vector<128x64xbf16>
      %c0_15 = arith.constant 0 : index
      %c0_16 = arith.constant 0 : index
      %19 = vector.load %arg5[%c0_15, %c0_16] : memref<128x64xbf16, #tpu.memory_space<vmem>>, vector<128x64xbf16>
      tpu.vector_store %arg5[%c0_15, %c0_16], %18 {strides = array<i32>} : memref<128x64xbf16, #tpu.memory_space<vmem>>, vector<128x64xbf16>,
    } else {
    }
    return
  }
  func.func @transform_0(%arg0: i32, %arg1: i32) -> (i32, i32) {
    %c0_i32 = arith.constant 0 : i32
    return %arg0, %arg1 : i32, i32
  }
  func.func @transform_1(%arg0: i32, %arg1: i32) -> (i32, i32) {
    %c0_i32 = arith.constant 0 : i32
    %c0_i32_0 = arith.constant 0 : i32
    return %arg1, %c0_i32 : i32, i32
  }
  func.func @transform_2(%arg0: i32, %arg1: i32) -> (i32, i32) {
    %c0_i32 = arith.constant 0 : i32
    %c0_i32_0 = arith.constant 0 : i32
    %c0_i32_1 = arith.constant 0 : i32
    return %c0_i32, %c0_i32_0 : i32, i32
  }
  func.func @transform_3(%arg0: i32, %arg1: i32) -> (i32, i32) {
    %c0_i32 = arith.constant 0 : i32
    %c0_i32_0 = arith.constant 0 : i32
    return %arg0, %c0_i32 : i32, i32
  }
}

module attributes {stable_mosaic.version = 11 : i64} {
  func.func @_mm_bias_act_kernel(%arg0: i32, %arg1: i32, %arg2: memref<128x128xbf16, #tpu.memory_space<vmem>>, %arg3: memref<128x64xbf16, #tpu.memory_space<vmem>>, %arg4: memref<1x64xf32, #tpu.memory_space<vmem>>, %arg5: memref<128x64xbf16, #tpu.memory_space<vmem>>, %arg6: memref<128x64xf32, #tpu.memory_space<vmem>>) attributes {dimension_semantics = [#tpu.dimension_semantics<parallel>, #tpu.dimension_semantics<arbitrary>], iteration_bounds = array<i64: 1, 1>, scalar_prefetch = 0 : i64, scratch_operands = 1 : i64, tpu.core_type = #tpu.core_type<tc>, window_params = [{transform_indices = @transform_0, window_bounds = array<i64: 128, 128>}, {transform_indices = @transform_1, window_bounds = array<i64: 128, 64>}, {pipeline_mode = #tpu.pipeline_mode<synchronous>, transform_indices = @transform_2, window_bounds = array<i64: 1, 64>}, {transform_indices = @transform_3, window_bounds = array<i64: 128, 64>}]} {
    %c0_i32 = arith.constant 0 : i32
    %0 = arith.cmpi eq, %arg1, %c0_i32 : i32
    %1 = arith.extui %0 : i1 to i32
    %c0_i32_0 = arith.constant 0 : i32
    %2 = arith.cmpi ne, %1, %c0_i32_0 : i32
    scf.if %2 {
      %cst_10 = arith.constant 0.000000e+00 : f32
      %12 = vector.broadcast %cst_10 : f32 to vector<128x64xf32>
      %c0_11 = arith.constant 0 : index
      %c0_12 = arith.constant 0 : index
      %13 = vector.load %arg6[%c0_11, %c0_12] : memref<128x64xf32, #tpu.memory_space<vmem>>, vector<128x64xf32>
      tpu.vector_store %arg6[%c0_11, %c0_12], %12 {strides = array<i32>} : memref<128x64xf32, #tpu.memory_space<vmem>>, vector<128x64xf32>,
    } else {
    }
    %c0 = arith.constant 0 : index
    %c0_1 = arith.constant 0 : index
    %3 = vector.load %arg6[%c0, %c0_1] : memref<128x64xf32, #tpu.memory_space<vmem>>, vector<128x64xf32>
    %c0_2 = arith.constant 0 : index
    %c0_3 = arith.constant 0 : index
    %4 = vector.load %arg2[%c0_2, %c0_3] : memref<128x128xbf16, #tpu.memory_space<vmem>>, vector<128x128xbf16>
    %c0_4 = arith.constant 0 : index
    %c0_5 = arith.constant 0 : index
    %5 = vector.load %arg3[%c0_4, %c0_5] : memref<128x64xbf16, #tpu.memory_space<vmem>>, vector<128x64xbf16>
    %cst = arith.constant dense<0.000000e+00> : vector<128x64xf32>
    %6 = tpu.matmul %4, %5, %cst {dimension_numbers = #tpu.dot_dimension_numbers<[1], [0], [0], [1], [0, 0, 1, 1], [], []>} : vector<128x128xbf16>, vector<128x64xbf16>, vector<128x64xf32> -> vector<128x64xf32>
    %7 = arith.addf %3, %6 : vector<128x64xf32>
    %c0_6 = arith.constant 0 : index
    %c0_7 = arith.constant 0 : index
    %8 = vector.load %arg6[%c0_6, %c0_7] : memref<128x64xf32, #tpu.memory_space<vmem>>, vector<128x64xf32>
    tpu.vector_store %arg6[%c0_6, %c0_7], %7 {strides = array<i32>} : memref<128x64xf32, #tpu.memory_space<vmem>>, vector<128x64xf32>,
    %c0_i32_8 = arith.constant 0 : i32
    %9 = arith.cmpi eq, %arg1, %c0_i32_8 : i32
    %10 = arith.extui %9 : i1 to i32
    %c0_i32_9 = arith.constant 0 : i32
    %11 = arith.cmpi ne, %10, %c0_i32_9 : i32
    scf.if %11 {
      %c0_10 = arith.constant 0 : index
      %c0_11 = arith.constant 0 : index
      %12 = vector.load %arg6[%c0_10, %c0_11] : memref<128x64xf32, #tpu.memory_space<vmem>>, vector<128x64xf32>
      %c0_12 = arith.constant 0 : index
      %c0_13 = arith.constant 0 : index
      %13 = vector.load %arg4[%c0_12, %c0_13] : memref<1x64xf32, #tpu.memory_space<vmem>>, vector<1x64xf32>
      %14 = vector.broadcast %13 : vector<1x64xf32> to vector<128x64xf32>
      %15 = arith.addf %12, %14 : vector<128x64xf32>
      %cst_14 = arith.constant 0.000000e+00 : f32
      %16 = vector.broadcast %cst_14 : f32 to vector<128x64xf32>
      %17 = arith.maximumf %15, %16 : vector<128x64xf32>
      %18 = arith.truncf %17 : vector<128x64xf32> to vector<128x64xbf16>
      %c0_15 = arith.constant 0 : index
      %c0_16 = arith.constant 0 : index
      %19 = vector.load %arg5[%c0_15, %c0_16] : memref<128x64xbf16, #tpu.memory_space<vmem>>, vector<128x64xbf16>
      tpu.vector_store %arg5[%c0_15, %c0_16], %18 {strides = array<i32>} : memref<128x64xbf16, #tpu.memory_space<vmem>>, vector<128x64xbf16>,
    } else {
    }
    return
  }
  func.func @transform_0(%arg0: i32, %arg1: i32) -> (i32, i32) {
    %c0_i32 = arith.constant 0 : i32
    return %arg0, %arg1 : i32, i32
  }
  func.func @transform_1(%arg0: i32, %arg1: i32) -> (i32, i32) {
    %c0_i32 = arith.constant 0 : i32
    %c0_i32_0 = arith.constant 0 : i32
    return %arg1, %c0_i32 : i32, i32
  }
  func.func @transform_2(%arg0: i32, %arg1: i32) -> (i32, i32) {
    %c0_i32 = arith.constant 0 : i32
    %c0_i32_0 = arith.constant 0 : i32
    %c0_i32_1 = arith.constant 0 : i32
    return %c0_i32, %c0_i32_0 : i32, i32
  }
  func.func @transform_3(%arg0: i32, %arg1: i32) -> (i32, i32) {
    %c0_i32 = arith.constant 0 : i32
    %c0_i32_0 = arith.constant 0 : i32
    return %arg0, %c0_i32 : i32, i32
  }
}

module attributes {stable_mosaic.version = 11 : i64} {
  func.func @_mm_bias_act_kernel(%arg0: i32, %arg1: i32, %arg2: memref<128x320xbf16, #tpu.memory_space<vmem>>, %arg3: memref<320x64xbf16, #tpu.memory_space<vmem>>, %arg4: memref<1x64xf32, #tpu.memory_space<vmem>>, %arg5: memref<128x64xbf16, #tpu.memory_space<vmem>>, %arg6: memref<128x64xf32, #tpu.memory_space<vmem>>) attributes {dimension_semantics = [#tpu.dimension_semantics<parallel>, #tpu.dimension_semantics<arbitrary>], iteration_bounds = array<i64: 1, 1>, scalar_prefetch = 0 : i64, scratch_operands = 1 : i64, tpu.core_type = #tpu.core_type<tc>, window_params = [{transform_indices = @transform_0, window_bounds = array<i64: 128, 320>}, {transform_indices = @transform_1, window_bounds = array<i64: 320, 64>}, {pipeline_mode = #tpu.pipeline_mode<synchronous>, transform_indices = @transform_2, window_bounds = array<i64: 1, 64>}, {transform_indices = @transform_3, window_bounds = array<i64: 128, 64>}]} {
    %c0_i32 = arith.constant 0 : i32
    %0 = arith.cmpi eq, %arg1, %c0_i32 : i32
    %1 = arith.extui %0 : i1 to i32
    %c0_i32_0 = arith.constant 0 : i32
    %2 = arith.cmpi ne, %1, %c0_i32_0 : i32
    scf.if %2 {
      %cst_10 = arith.constant 0.000000e+00 : f32
      %12 = vector.broadcast %cst_10 : f32 to vector<128x64xf32>
      %c0_11 = arith.constant 0 : index
      %c0_12 = arith.constant 0 : index
      %13 = vector.load %arg6[%c0_11, %c0_12] : memref<128x64xf32, #tpu.memory_space<vmem>>, vector<128x64xf32>
      tpu.vector_store %arg6[%c0_11, %c0_12], %12 {strides = array<i32>} : memref<128x64xf32, #tpu.memory_space<vmem>>, vector<128x64xf32>,
    } else {
    }
    %c0 = arith.constant 0 : index
    %c0_1 = arith.constant 0 : index
    %3 = vector.load %arg6[%c0, %c0_1] : memref<128x64xf32, #tpu.memory_space<vmem>>, vector<128x64xf32>
    %c0_2 = arith.constant 0 : index
    %c0_3 = arith.constant 0 : index
    %4 = vector.load %arg2[%c0_2, %c0_3] : memref<128x320xbf16, #tpu.memory_space<vmem>>, vector<128x320xbf16>
    %c0_4 = arith.constant 0 : index
    %c0_5 = arith.constant 0 : index
    %5 = vector.load %arg3[%c0_4, %c0_5] : memref<320x64xbf16, #tpu.memory_space<vmem>>, vector<320x64xbf16>
    %cst = arith.constant dense<0.000000e+00> : vector<128x64xf32>
    %6 = tpu.matmul %4, %5, %cst {dimension_numbers = #tpu.dot_dimension_numbers<[1], [0], [0], [1], [0, 0, 1, 1], [], []>} : vector<128x320xbf16>, vector<320x64xbf16>, vector<128x64xf32> -> vector<128x64xf32>
    %7 = arith.addf %3, %6 : vector<128x64xf32>
    %c0_6 = arith.constant 0 : index
    %c0_7 = arith.constant 0 : index
    %8 = vector.load %arg6[%c0_6, %c0_7] : memref<128x64xf32, #tpu.memory_space<vmem>>, vector<128x64xf32>
    tpu.vector_store %arg6[%c0_6, %c0_7], %7 {strides = array<i32>} : memref<128x64xf32, #tpu.memory_space<vmem>>, vector<128x64xf32>,
    %c0_i32_8 = arith.constant 0 : i32
    %9 = arith.cmpi eq, %arg1, %c0_i32_8 : i32
    %10 = arith.extui %9 : i1 to i32
    %c0_i32_9 = arith.constant 0 : i32
    %11 = arith.cmpi ne, %10, %c0_i32_9 : i32
    scf.if %11 {
      %c0_10 = arith.constant 0 : index
      %c0_11 = arith.constant 0 : index
      %12 = vector.load %arg6[%c0_10, %c0_11] : memref<128x64xf32, #tpu.memory_space<vmem>>, vector<128x64xf32>
      %c0_12 = arith.constant 0 : index
      %c0_13 = arith.constant 0 : index
      %13 = vector.load %arg4[%c0_12, %c0_13] : memref<1x64xf32, #tpu.memory_space<vmem>>, vector<1x64xf32>
      %14 = vector.broadcast %13 : vector<1x64xf32> to vector<128x64xf32>
      %15 = arith.addf %12, %14 : vector<128x64xf32>
      %cst_14 = arith.constant 0.000000e+00 : f32
      %16 = vector.broadcast %cst_14 : f32 to vector<128x64xf32>
      %17 = arith.maximumf %15, %16 : vector<128x64xf32>
      %18 = arith.truncf %17 : vector<128x64xf32> to vector<128x64xbf16>
      %c0_15 = arith.constant 0 : index
      %c0_16 = arith.constant 0 : index
      %19 = vector.load %arg5[%c0_15, %c0_16] : memref<128x64xbf16, #tpu.memory_space<vmem>>, vector<128x64xbf16>
      tpu.vector_store %arg5[%c0_15, %c0_16], %18 {strides = array<i32>} : memref<128x64xbf16, #tpu.memory_space<vmem>>, vector<128x64xbf16>,
    } else {
    }
    return
  }
  func.func @transform_0(%arg0: i32, %arg1: i32) -> (i32, i32) {
    %c0_i32 = arith.constant 0 : i32
    return %arg0, %arg1 : i32, i32
  }
  func.func @transform_1(%arg0: i32, %arg1: i32) -> (i32, i32) {
    %c0_i32 = arith.constant 0 : i32
    %c0_i32_0 = arith.constant 0 : i32
    return %arg1, %c0_i32 : i32, i32
  }
  func.func @transform_2(%arg0: i32, %arg1: i32) -> (i32, i32) {
    %c0_i32 = arith.constant 0 : i32
    %c0_i32_0 = arith.constant 0 : i32
    %c0_i32_1 = arith.constant 0 : i32
    return %c0_i32, %c0_i32_0 : i32, i32
  }
  func.func @transform_3(%arg0: i32, %arg1: i32) -> (i32, i32) {
    %c0_i32 = arith.constant 0 : i32
    %c0_i32_0 = arith.constant 0 : i32
    return %arg0, %c0_i32 : i32, i32
  }
}

module attributes {stable_mosaic.version = 11 : i64} {
  func.func @_decoder_fused_kernel(%arg0: i32, %arg1: memref<128x576xbf16, #tpu.memory_space<vmem>>, %arg2: memref<576x64xbf16, #tpu.memory_space<vmem>>, %arg3: memref<1x64xf32, #tpu.memory_space<vmem>>, %arg4: memref<64x128xbf16, #tpu.memory_space<vmem>>, %arg5: memref<1x128xf32, #tpu.memory_space<vmem>>, %arg6: memref<128x128xf32, #tpu.memory_space<vmem>>) attributes {dimension_semantics = [#tpu.dimension_semantics<parallel>], iteration_bounds = array<i64: 1>, scalar_prefetch = 0 : i64, scratch_operands = 0 : i64, tpu.core_type = #tpu.core_type<tc>, window_params = [{transform_indices = @transform_0, window_bounds = array<i64: 128, 576>}, {pipeline_mode = #tpu.pipeline_mode<synchronous>, transform_indices = @transform_1, window_bounds = array<i64: 576, 64>}, {pipeline_mode = #tpu.pipeline_mode<synchronous>, transform_indices = @transform_2, window_bounds = array<i64: 1, 64>}, {pipeline_mode = #tpu.pipeline_mode<synchronous>, transform_indices = @transform_3, window_bounds = array<i64: 64, 128>}, {pipeline_mode = #tpu.pipeline_mode<synchronous>, transform_indices = @transform_4, window_bounds = array<i64: 1, 128>}, {transform_indices = @transform_5, window_bounds = array<i64: 128, 128>}]} {
    %c0 = arith.constant 0 : index
    %c0_0 = arith.constant 0 : index
    %0 = vector.load %arg1[%c0, %c0_0] : memref<128x576xbf16, #tpu.memory_space<vmem>>, vector<128x576xbf16>
    %c0_1 = arith.constant 0 : index
    %c0_2 = arith.constant 0 : index
    %1 = vector.load %arg2[%c0_1, %c0_2] : memref<576x64xbf16, #tpu.memory_space<vmem>>, vector<576x64xbf16>
    %cst = arith.constant dense<0.000000e+00> : vector<128x64xf32>
    %2 = tpu.matmul %0, %1, %cst {dimension_numbers = #tpu.dot_dimension_numbers<[1], [0], [0], [1], [0, 0, 1, 1], [], []>} : vector<128x576xbf16>, vector<576x64xbf16>, vector<128x64xf32> -> vector<128x64xf32>
    %c0_3 = arith.constant 0 : index
    %c0_4 = arith.constant 0 : index
    %3 = vector.load %arg3[%c0_3, %c0_4] : memref<1x64xf32, #tpu.memory_space<vmem>>, vector<1x64xf32>
    %4 = vector.broadcast %3 : vector<1x64xf32> to vector<128x64xf32>
    %5 = arith.addf %2, %4 : vector<128x64xf32>
    %cst_5 = arith.constant 0.000000e+00 : f32
    %6 = vector.broadcast %cst_5 : f32 to vector<128x64xf32>
    %7 = arith.maximumf %5, %6 : vector<128x64xf32>
    %8 = arith.truncf %7 : vector<128x64xf32> to vector<128x64xbf16>
    %c0_6 = arith.constant 0 : index
    %c0_7 = arith.constant 0 : index
    %9 = vector.load %arg4[%c0_6, %c0_7] : memref<64x128xbf16, #tpu.memory_space<vmem>>, vector<64x128xbf16>
    %cst_8 = arith.constant dense<0.000000e+00> : vector<128x128xf32>
    %10 = tpu.matmul %8, %9, %cst_8 {dimension_numbers = #tpu.dot_dimension_numbers<[1], [0], [0], [1], [0, 0, 1, 1], [], []>} : vector<128x64xbf16>, vector<64x128xbf16>, vector<128x128xf32> -> vector<128x128xf32>
    %c0_9 = arith.constant 0 : index
    %c0_10 = arith.constant 0 : index
    %11 = vector.load %arg5[%c0_9, %c0_10] : memref<1x128xf32, #tpu.memory_space<vmem>>, vector<1x128xf32>
    %12 = vector.broadcast %11 : vector<1x128xf32> to vector<128x128xf32>
    %13 = arith.addf %10, %12 : vector<128x128xf32>
    %c0_11 = arith.constant 0 : index
    %c0_12 = arith.constant 0 : index
    %14 = vector.load %arg6[%c0_11, %c0_12] : memref<128x128xf32, #tpu.memory_space<vmem>>, vector<128x128xf32>
    tpu.vector_store %arg6[%c0_11, %c0_12], %13 {strides = array<i32>} : memref<128x128xf32, #tpu.memory_space<vmem>>, vector<128x128xf32>,
    return
  }
  func.func @transform_0(%arg0: i32) -> (i32, i32) {
    %c0_i32 = arith.constant 0 : i32
    %c0_i32_0 = arith.constant 0 : i32
    return %arg0, %c0_i32 : i32, i32
  }
  func.func @transform_1(%arg0: i32) -> (i32, i32) {
    %c0_i32 = arith.constant 0 : i32
    %c0_i32_0 = arith.constant 0 : i32
    %c0_i32_1 = arith.constant 0 : i32
    return %c0_i32, %c0_i32_0 : i32, i32
  }
  func.func @transform_2(%arg0: i32) -> (i32, i32) {
    %c0_i32 = arith.constant 0 : i32
    %c0_i32_0 = arith.constant 0 : i32
    %c0_i32_1 = arith.constant 0 : i32
    return %c0_i32, %c0_i32_0 : i32, i32
  }
  func.func @transform_3(%arg0: i32) -> (i32, i32) {
    %c0_i32 = arith.constant 0 : i32
    %c0_i32_0 = arith.constant 0 : i32
    %c0_i32_1 = arith.constant 0 : i32
    return %c0_i32, %c0_i32_0 : i32, i32
  }
  func.func @transform_4(%arg0: i32) -> (i32, i32) {
    %c0_i32 = arith.constant 0 : i32
    %c0_i32_0 = arith.constant 0 : i32
    %c0_i32_1 = arith.constant 0 : i32
    return %c0_i32, %c0_i32_0 : i32, i32
  }
  func.func @transform_5(%arg0: i32) -> (i32, i32) {
    %c0_i32 = arith.constant 0 : i32
    %c0_i32_0 = arith.constant 0 : i32
    return %arg0, %c0_i32 : i32, i32
  }
}

</mosaic_0001>

<bundles_post_ra>
// kernel: deeplab_forward.10
= control target key start
LH: loop header
LB: loop body
LE: loop exit
PB: predicated region body
PF: predicated region fallthrough
CT: control target
= control target key end

     0   :  { %s762_s12 = smov 0   ;;  %s764_s13 = smov 0   ;;  %s906_s0 = inlined_call_operand.vmem [shape: bf16[512,27], index: 0, kind: input, shape index: {}]   ;;  %s907_s1 = inlined_call_operand.vmem [shape: bf16[27,32], index: 1, kind: input, shape index: {}]   ;;  %s908_s2 = inlined_call_operand.vmem [shape: f32[1,32], index: 2, kind: input, shape index: {}]   ;;  %s909_s3 = inlined_call_operand.vmem [shape: bf16[512,32], index: 3, kind: output, shape index: {}]  }
   0x1   :  { %s766_s14 = smov 0  }
   0x2 LB: > { %s25_s15 = sadd.s32 1, %s734_s13  ;;  %p618_p0 = scmp.ge.s32.totalorder %s738_s14, 1  ;;  %s738_s14 = sphi %s766_s14, %s13_s14   ;;  %s734_s13 = sphi %s764_s13, %s911_s13   ;;  %s730_s12 = sphi %s762_s12, %s910_s12  }
   0x3   : > { %p27_p1 = scmp.ge.s32.totalorder %s25_s15, 4  ;;  %p166_p2 = scmp.lt.s32.totalorder %s738_s14, 5 }
   0x5   : > { %s913_s15 = smov (%p27_p1, %s25_s15), 0  ;;  %p167_p3 = pnand %p618_p0, %p166_p2 }
   0x6   : > { %s619_s20 = sshll.u32 (!%p167_p3), %s730_s12, 4 }
   0x7   : > { %170 = sbr.rel (%p167_p3) target bundleno = 203 (0xcb), region = 32  ;;  %p199_p4 = scmp.lt.s32.totalorder (!%p167_p3), %s619_s20, 63 }
   0xc   : > { %v661_v0 = vld [vmem:[%s907_s1 + $0x8] sm:$0xf]  ;;  %v682_v1 = vld [vmem:[%s907_s1 + $0x8] sm:$0x30]  ;;  %vm353_vm0 = vcmask 1044480   ;;  %vm354_vm1 = vcmask 1045504  }
   0xd   : > { %v662_v2 = vor.u32 %v682_v1, %v661_v0  ;;  %vm224_vm2 = vcmask 261120   ;;  %v740_v3 = vmov 65535   ;;  %v741_v6 = vmov 0.0   ;;  %s915_s20 = smov (!%p199_p4, %s619_s20), 63  ;;  %v681_v8 = vld [vmem:[%s907_s1] sm:$0xff] }
   0xe   : > { %v355_v4 = vsel %vm353_vm0, 4294967295, %v740_v3  ;;  %225 = vst.msk [vmem:[#allocation2] sm:$0xff] %vm224_vm2, %v741_v6  ;;  %s620_s23 = sshll.u32 %s915_s20, 2  ;;  %vm328_vm3 = vcmask 220160   ;;  %v826_v27 = vld [vmem:[%s908_s2] ss:$0 sm:$0xff] }
   0xf   : > { %v356_v5 = vsel %vm354_vm1, %v355_v4, 0  ;;  %226 = vst.msk [vmem:[#allocation2 + $0x8] sm:$0xff] %vm224_vm2, %v741_v6  ;;  %s205_s26 = scalar_lea.vmem %s906_s0, %s620_s23  ;;  %s839_s4 = scalar_lea.vmem %s909_s3, %s620_s23  ;;  %vm513_vm4 = vcmask 257024  }
  0x10   : > { %v358_v7 = vand.u32 %v662_v2, %v356_v5  ;;  %227 = vst.msk [vmem:[#allocation2 + $0x10] sm:$0xff] %vm224_vm2, %v741_v6  ;;  %v673_v9 = vld [vmem:[%s205_s26] sm:$0xff]  ;;  %v675_v10 = vld [vmem:[%s205_s26 + $0x10] sm:$0xff]  ;;  %v674_v13 = vld [vmem:[%s205_s26 + $0x8] sm:$0xff] }
  0x11   : > { %228 = vst.msk [vmem:[#allocation2 + $0x18] sm:$0xff] %vm224_vm2, %v741_v6  ;;  %v677_v11 = vld [vmem:[%s205_s26 + $0x20] sm:$0xff]  ;;  %v679_v12 = vld [vmem:[%s205_s26 + $0x30] sm:$0xff]  ;;  %v676_v14 = vld [vmem:[%s205_s26 + $0x18] sm:$0xff] }
  0x12   : > { %366 = vmatpush.bf16.msra.mxu0 %v358_v7  ;;  %683 = vmatpush.bf16.msra.mxu1 %v358_v7  ;;  %229 = vst.msk [vmem:[#allocation2 + $0x20] sm:$0xff] %vm224_vm2, %v741_v6  ;;  %v678_v15 = vld [vmem:[%s205_s26 + $0x28] sm:$0xff]  ;;  %v680_v16 = vld [vmem:[%s205_s26 + $0x38] sm:$0xff] }
  0x13   : > { %684 = vmatpush.bf16.msra.mxu2 %v358_v7  ;;  %685 = vmatpush.bf16.msra.mxu3 %v358_v7  ;;  %230 = vst.msk [vmem:[#allocation2 + $0x28] sm:$0xff] %vm224_vm2, %v741_v6 }
  0x14   : > { %231 = vst.msk [vmem:[#allocation2 + $0x30] sm:$0xff] %vm224_vm2, %v741_v6 }
  0x15   : > { %232 = vst.msk [vmem:[#allocation2 + $0x38] sm:$0xff] %vm224_vm2, %v741_v6  ;;  %v241_v17 = vld [vmem:[#allocation2] sm:$0xff] }
  0x16   : > { %367 = vmatpush.bf16.msra.mxu0 %v681_v8  ;;  %686 = vmatpush.bf16.msra.mxu1 %v681_v8  ;;  %233 = vst.msk [vmem:[#allocation2 + $0x40] sm:$0xff] %vm224_vm2, %v741_v6  ;;  %v242_v25 = vld [vmem:[#allocation2 + $0x8] sm:$0xff] }
  0x17   : > { %687 = vmatpush.bf16.msra.mxu2 %v681_v8  ;;  %688 = vmatpush.bf16.msra.mxu3 %v681_v8  ;;  %234 = vst.msk [vmem:[#allocation2 + $0x48] sm:$0xff] %vm224_vm2, %v741_v6  ;;  %v243_v44 = vld [vmem:[#allocation2 + $0x10] sm:$0xff] }
  0x18   : > { %235 = vst.msk [vmem:[#allocation2 + $0x50] sm:$0xff] %vm224_vm2, %v741_v6 }
  0x19   : > { %663 = vmatmul.msk.bf16.vlgmr.msra.gmra.mxu0 %vm328_vm3, %v673_v9  ;;  %665 = vmatmul.msk.bf16.vlgmr.msra.gmra.mxu1 %vm328_vm3, %v675_v10  ;;  %236 = vst.msk [vmem:[#allocation2 + $0x58] sm:$0xff] %vm224_vm2, %v741_v6  ;;  %v245_v18 = vld [vmem:[#allocation2 + $0x20] sm:$0xff]  ;;  %v244_v10 = vld [vmem:[#allocation2 + $0x18] sm:$0xff] }
  0x1a   : > { %667 = vmatmul.msk.bf16.vlgmr.msra.gmra.mxu2 %vm328_vm3, %v677_v11  ;;  %669 = vmatmul.msk.bf16.vlgmr.msra.gmra.mxu3 %vm328_vm3, %v679_v12  ;;  %237 = vst.msk [vmem:[#allocation2 + $0x60] sm:$0xff] %vm224_vm2, %v741_v6  ;;  %v246_v26 = vld [vmem:[#allocation2 + $0x28] sm:$0xff] }
  0x1b   : > { %238 = vst.msk [vmem:[#allocation2 + $0x68] sm:$0xff] %vm224_vm2, %v741_v6  ;;  %v247_v48 = vld [vmem:[#allocation2 + $0x30] sm:$0xff] }
  0x1c   : > { %239 = vst.msk [vmem:[#allocation2 + $0x70] sm:$0xff] %vm224_vm2, %v741_v6 }
  0x1d   : > { %240 = vst.msk [vmem:[#allocation2 + $0x78] sm:$0xff] %vm224_vm2, %v741_v6  ;;  %v249_v23 = vld [vmem:[#allocation2 + $0x40] sm:$0xff] }
  0x1e   : > { %v250_v41 = vld [vmem:[#allocation2 + $0x48] sm:$0xff] }
  0x1f   : > { %v251_v2 = vld [vmem:[#allocation2 + $0x50] sm:$0xff] }
  0x21   : > { %v253_v24 = vld [vmem:[#allocation2 + $0x60] sm:$0xff] }
  0x22   : > { %v254_v42 = vld [vmem:[#allocation2 + $0x68] sm:$0xff] }
  0x23   : > { %v255_v5 = vld [vmem:[#allocation2 + $0x70] sm:$0xff] }
  0x29   : > { %664 = vmatmul.msk.bf16.gmra.mxu0 %vm328_vm3, %v674_v13  ;;  %666 = vmatmul.msk.bf16.gmra.mxu1 %vm328_vm3, %v676_v14  ;;  %v248_v14 = vld [vmem:[#allocation2 + $0x38] sm:$0xff] }
  0x2a   : > { %668 = vmatmul.msk.bf16.gmra.mxu2 %vm328_vm3, %v678_v15  ;;  %670 = vmatmul.msk.bf16.gmra.mxu3 %vm328_vm3, %v680_v16 }
  0x96   : > { %v369_v19 = vpop.f32.mrf.mxu0  ;;  %v379_v20 = vpop.f32.mrf.mxu1 }
  0x97   : > { %v409_v21 = vadd.f32 %v369_v19, %v241_v17  ;;  %v413_v22 = vadd.f32 %v379_v20, %v245_v18 }
  0x99   : > { %426 = vst.msk [vmem:[#allocation2] sm:$0xff] %vm224_vm2, %v409_v21 }
  0x9a   : > { %430 = vst.msk [vmem:[#allocation2 + $0x20] sm:$0xff] %vm224_vm2, %v413_v22 }
  0x9d   : > { %v389_v28 = vpop.f32.mrf.mxu2  ;;  %v399_v29 = vpop.f32.mrf.mxu3 }
  0x9e   : > { %v417_v30 = vadd.f32 %v389_v28, %v249_v23  ;;  %v421_v31 = vadd.f32 %v399_v29, %v253_v24  ;;  %v371_v32 = vpop.f32.mrf.mxu0  ;;  %v381_v33 = vpop.f32.mrf.mxu1 }
  0x9f   : > { %v410_v34 = vadd.f32 %v371_v32, %v242_v25  ;;  %v414_v35 = vadd.f32 %v381_v33, %v246_v26 }
  0xa0   : > { %v445_v36 = vld [vmem:[#allocation2] sm:$0xff]  ;;  %434 = vst.msk [vmem:[#allocation2 + $0x40] sm:$0xff] %vm224_vm2, %v417_v30 }
  0xa1   : > { %v465_v37 = vadd.f32 %v826_v27, %v445_v36  ;;  %v449_v38 = vld [vmem:[#allocation2 + $0x20] sm:$0xff]  ;;  %438 = vst.msk [vmem:[#allocation2 + $0x60] sm:$0xff] %vm224_vm2, %v421_v31  ;;  %v252_v31 = vld [vmem:[#allocation2 + $0x58] sm:$0xff] }
  0xa2   : > { %v469_v39 = vadd.f32 %v826_v27, %v449_v38  ;;  %427 = vst.msk [vmem:[#allocation2 + $0x8] sm:$0xff] %vm224_vm2, %v410_v34 }
  0xa3   : > { %v481_v40 = vmax.f32 %v465_v37, 0.0  ;;  %431 = vst.msk [vmem:[#allocation2 + $0x28] sm:$0xff] %vm224_vm2, %v414_v35  ;;  %v256_v35 = vld [vmem:[#allocation2 + $0x78] sm:$0xff] }
  0xa4   : > { %v485_v43 = vmax.f32 %v469_v39, 0.0 }
  0xa5   : > { %v497_v45 = vpack.c.bf16 %v481_v40, %v481_v40  ;;  %v391_v46 = vpop.f32.mrf.mxu2  ;;  %v401_v47 = vpop.f32.mrf.mxu3 }
  0xa6   : > { %v501_v49 = vpack.c.bf16 %v485_v43, %v485_v43  ;;  %v418_v50 = vadd.f32 %v391_v46, %v250_v41  ;;  %v422_v51 = vadd.f32 %v401_v47, %v254_v42  ;;  %v374_v52 = vpop.f32.mrf.mxu0  ;;  %v384_v53 = vpop.f32.mrf.mxu1 }
  0xa7   : > { %514 = vst.msk [vmem:[%s839_s4] sm:$0xf] %vm513_vm4, %v497_v45  ;;  %v453_v54 = vld [vmem:[#allocation2 + $0x40] sm:$0xff]  ;;  %v411_v55 = vadd.f32 %v374_v52, %v243_v44  ;;  %v415_v58 = vadd.f32 %v384_v53, %v247_v48 }
  0xa8   : > { %518 = vst.msk [vmem:[%s839_s4 + $0x10] sm:$0xf] %vm513_vm4, %v501_v49  ;;  %v473_v56 = vadd.f32 %v826_v27, %v453_v54  ;;  %v457_v57 = vld [vmem:[#allocation2 + $0x60] sm:$0xff] }
  0xa9   : > { %v477_v59 = vadd.f32 %v826_v27, %v457_v57  ;;  %v446_v60 = vld [vmem:[#allocation2 + $0x8] sm:$0xff]  ;;  %435 = vst.msk [vmem:[#allocation2 + $0x48] sm:$0xff] %vm224_vm2, %v418_v50 }
  0xaa   : > { %v489_v61 = vmax.f32 %v473_v56, 0.0  ;;  %v466_v62 = vadd.f32 %v826_v27, %v446_v60  ;;  %v450_v63 = vld [vmem:[#allocation2 + $0x28] sm:$0xff]  ;;  %439 = vst.msk [vmem:[#allocation2 + $0x68] sm:$0xff] %vm224_vm2, %v422_v51 }
  0xab   : > { %v493_v0 = vmax.f32 %v477_v59, 0.0  ;;  %v470_v1 = vadd.f32 %v826_v27, %v450_v63  ;;  %428 = vst.msk [vmem:[#allocation2 + $0x10] sm:$0xff] %vm224_vm2, %v411_v55 }
  0xac   : > { %v505_v3 = vpack.c.bf16 %v489_v61, %v489_v61  ;;  %v482_v4 = vmax.f32 %v466_v62, 0.0  ;;  %432 = vst.msk [vmem:[#allocation2 + $0x30] sm:$0xff] %vm224_vm2, %v415_v58 }
  0xad   : > { %v509_v6 = vpack.c.bf16 %v493_v0, %v493_v0  ;;  %v486_v7 = vmax.f32 %v470_v1, 0.0  ;;  %v394_v8 = vpop.f32.mrf.mxu2  ;;  %v404_v9 = vpop.f32.mrf.mxu3 }
  0xae   : > { %522 = vst.msk [vmem:[%s839_s4 + $0x20] sm:$0xf] %vm513_vm4, %v505_v3  ;;  %v498_v11 = vpack.c.bf16 %v482_v4, %v482_v4  ;;  %v419_v12 = vadd.f32 %v394_v8, %v251_v2  ;;  %v376_v13 = vpop.f32.mrf.mxu0  ;;  %v386_v15 = vpop.f32.mrf.mxu1  ;;  %v423_v17 = vadd.f32 %v404_v9, %v255_v5 }
  0xaf   : > { %526 = vst.msk [vmem:[%s839_s4 + $0x30] sm:$0xf] %vm513_vm4, %v509_v6  ;;  %v502_v16 = vpack.c.bf16 %v486_v7, %v486_v7  ;;  %v412_v19 = vadd.f32 %v376_v13, %v244_v10  ;;  %v416_v22 = vadd.f32 %v386_v15, %v248_v14 }
  0xb0   : > { %515 = vst.msk [vmem:[%s839_s4 + $0x4] sm:$0xf] %vm513_vm4, %v498_v11  ;;  %v454_v18 = vld [vmem:[#allocation2 + $0x48] sm:$0xff] }
  0xb1   : > { %519 = vst.msk [vmem:[%s839_s4 + $0x14] sm:$0xf] %vm513_vm4, %v502_v16  ;;  %v474_v20 = vadd.f32 %v826_v27, %v454_v18  ;;  %v458_v21 = vld [vmem:[#allocation2 + $0x68] sm:$0xff] }
  0xb2   : > { %v478_v23 = vadd.f32 %v826_v27, %v458_v21  ;;  %v447_v24 = vld [vmem:[#allocation2 + $0x10] sm:$0xff]  ;;  %436 = vst.msk [vmem:[#allocation2 + $0x50] sm:$0xff] %vm224_vm2, %v419_v12 }
  0xb3   : > { %v490_v25 = vmax.f32 %v474_v20, 0.0  ;;  %v467_v26 = vadd.f32 %v826_v27, %v447_v24  ;;  %v451_v28 = vld [vmem:[#allocation2 + $0x30] sm:$0xff]  ;;  %440 = vst.msk [vmem:[#allocation2 + $0x70] sm:$0xff] %vm224_vm2, %v423_v17 }
  0xb4   : > { %v494_v29 = vmax.f32 %v478_v23, 0.0  ;;  %v471_v30 = vadd.f32 %v826_v27, %v451_v28  ;;  %429 = vst.msk [vmem:[#allocation2 + $0x18] sm:$0xff] %vm224_vm2, %v412_v19 }
  0xb5   : > { %v506_v32 = vpack.c.bf16 %v490_v25, %v490_v25  ;;  %v483_v33 = vmax.f32 %v467_v26, 0.0  ;;  %433 = vst.msk [vmem:[#allocation2 + $0x38] sm:$0xff] %vm224_vm2, %v416_v22  ;;  %v396_v34 = vpop.f32.mrf.mxu2  ;;  %v406_v36 = vpop.f32.mrf.mxu3 }
  0xb6   : > { %v510_v37 = vpack.c.bf16 %v494_v29, %v494_v29  ;;  %v487_v38 = vmax.f32 %v471_v30, 0.0  ;;  %v420_v40 = vadd.f32 %v396_v34, %v252_v31  ;;  %v424_v42 = vadd.f32 %v406_v36, %v256_v35 }
  0xb7   : > { %523 = vst.msk [vmem:[%s839_s4 + $0x24] sm:$0xf] %vm513_vm4, %v506_v32  ;;  %v499_v39 = vpack.c.bf16 %v483_v33, %v483_v33 }
  0xb8   : > { %527 = vst.msk [vmem:[%s839_s4 + $0x34] sm:$0xf] %vm513_vm4, %v510_v37  ;;  %v503_v41 = vpack.c.bf16 %v487_v38, %v487_v38 }
  0xb9   : > { %516 = vst.msk [vmem:[%s839_s4 + $0x8] sm:$0xf] %vm513_vm4, %v499_v39  ;;  %v455_v43 = vld [vmem:[#allocation2 + $0x50] sm:$0xff] }
  0xba   : > { %520 = vst.msk [vmem:[%s839_s4 + $0x18] sm:$0xf] %vm513_vm4, %v503_v41  ;;  %v475_v44 = vadd.f32 %v826_v27, %v455_v43  ;;  %v459_v45 = vld [vmem:[#allocation2 + $0x70] sm:$0xff] }
  0xbb   : > { %v479_v46 = vadd.f32 %v826_v27, %v459_v45  ;;  %v448_v47 = vld [vmem:[#allocation2 + $0x18] sm:$0xff]  ;;  %437 = vst.msk [vmem:[#allocation2 + $0x58] sm:$0xff] %vm224_vm2, %v420_v40 }
  0xbc   : > { %v491_v48 = vmax.f32 %v475_v44, 0.0  ;;  %v468_v49 = vadd.f32 %v826_v27, %v448_v47  ;;  %v452_v50 = vld [vmem:[#allocation2 + $0x38] sm:$0xff]  ;;  %441 = vst.msk [vmem:[#allocation2 + $0x78] sm:$0xff] %vm224_vm2, %v424_v42 }
  0xbd   : > { %v495_v51 = vmax.f32 %v479_v46, 0.0  ;;  %v472_v52 = vadd.f32 %v826_v27, %v452_v50 }
  0xbe   : > { %v507_v53 = vpack.c.bf16 %v491_v48, %v491_v48  ;;  %v484_v54 = vmax.f32 %v468_v49, 0.0 }
  0xbf   : > { %v511_v55 = vpack.c.bf16 %v495_v51, %v495_v51  ;;  %v488_v56 = vmax.f32 %v472_v52, 0.0 }
  0xc0   : > { %524 = vst.msk [vmem:[%s839_s4 + $0x28] sm:$0xf] %vm513_vm4, %v507_v53  ;;  %v500_v57 = vpack.c.bf16 %v484_v54, %v484_v54 }
  0xc1   : > { %528 = vst.msk [vmem:[%s839_s4 + $0x38] sm:$0xf] %vm513_vm4, %v511_v55  ;;  %v504_v58 = vpack.c.bf16 %v488_v56, %v488_v56 }
  0xc2   : > { %517 = vst.msk [vmem:[%s839_s4 + $0xc] sm:$0xf] %vm513_vm4, %v500_v57  ;;  %v456_v59 = vld [vmem:[#allocation2 + $0x58] sm:$0xff] }
  0xc3   : > { %521 = vst.msk [vmem:[%s839_s4 + $0x1c] sm:$0xf] %vm513_vm4, %v504_v58  ;;  %v476_v60 = vadd.f32 %v826_v27, %v456_v59  ;;  %v460_v61 = vld [vmem:[#allocation2 + $0x78] sm:$0xff] }
  0xc4   : > { %v480_v62 = vadd.f32 %v826_v27, %v460_v61 }
  0xc5   : > { %v492_v63 = vmax.f32 %v476_v60, 0.0 }
  0xc6   : > { %v496_v0 = vmax.f32 %v480_v62, 0.0 }
  0xc7   : > { %v508_v1 = vpack.c.bf16 %v492_v63, %v492_v63 }
  0xc8   : > { %v512_v2 = vpack.c.bf16 %v496_v0, %v496_v0 }
  0xc9   : > { %525 = vst.msk [vmem:[%s839_s4 + $0x2c] sm:$0xf] %vm513_vm4, %v508_v1 }
  0xca   : > { %529 = vst.msk [vmem:[%s839_s4 + $0x3c] sm:$0xf] %vm513_vm4, %v512_v2 }
  0xcb PF: > { %s13_s14 = sadd.s32 1, %s738_s14   ;;  %s910_s12 = smov %s734_s13 }
  0xcc   : > { %p10_p5 = scmp.ge.s32.totalorder %s13_s14, 6   ;;  %s911_s13 = smov %s913_s15 }
  0xce   :  { %12 = sbr.rel (!%p10_p5) target bundleno = 2 (0x2), region = 73 }

// kernel: deeplab_forward.11
= control target key start
LH: loop header
LB: loop body
LE: loop exit
PB: predicated region body
PF: predicated region fallthrough
CT: control target
= control target key end

     0   :  { %vm348_vm0 = vcmask 261120   ;;  %vm19_vm1 = vcmask 523264   ;;  %vm624_vm2 = vcmask 519168   ;;  %s1237_s1 = inlined_call_operand.vmem [shape: bf16[288,64], index: 1, kind: input, shape index: {}]   ;;  %s1238_s0 = inlined_call_operand.vmem [shape: bf16[128,288], index: 0, kind: input, shape index: {}]   ;;  %s1239_s2 = inlined_call_operand.vmem [shape: f32[1,64], index: 2, kind: input, shape index: {}]   ;;  %s1240_s3 = inlined_call_operand.vmem [shape: bf16[128,64], index: 3, kind: output, shape index: {}]  }
   0x1   :  { %v852_v0 = vld [vmem:[%s1237_s1 + $0x38] sm:$0xff]  ;;  %v862_v2 = vld [vmem:[%s1237_s1 + $0x88] sm:$0xff]  ;;  %v851_v3 = vld [vmem:[%s1237_s1 + $0x30] sm:$0xff] }
   0x2   :  { %v860_v1 = vld [vmem:[%s1237_s1 + $0x78] sm:$0xff]  ;;  %373 = vmatpush.bf16.msra.mxu0 %v852_v0  ;;  %863 = vmatpush.bf16.msra.mxu3 %v852_v0  ;;  %v859_v4 = vld [vmem:[%s1237_s1 + $0x70] sm:$0xff]  ;;  %v861_v5 = vld [vmem:[%s1237_s1 + $0x80] sm:$0xff] }
   0x3   :  { %422 = vmatpush.bf16.msra.mxu1 %v860_v1  ;;  %477 = vmatpush.bf16.msra.mxu2 %v862_v2  ;;  %v655_v6 = vld [vmem:[%s1238_s0 + $0x8] sm:$0xf]  ;;  %v823_v7 = vld [vmem:[%s1238_s0 + $0x10] sm:$0xf0]  ;;  %v849_v11 = vld [vmem:[%s1237_s1 + $0x20] sm:$0xff] }
   0x4   :  { %v656_v8 = vor.u32 %v823_v7, %v655_v6  ;;  %v850_v9 = vld [vmem:[%s1237_s1 + $0x28] sm:$0xff]  ;;  %v857_v12 = vld [vmem:[%s1237_s1 + $0x60] sm:$0xff]  ;;  %v848_v13 = vld [vmem:[%s1237_s1 + $0x18] sm:$0xff] }
   0x5   :  { %v858_v10 = vld [vmem:[%s1237_s1 + $0x68] sm:$0xff]  ;;  %v856_v14 = vld [vmem:[%s1237_s1 + $0x58] sm:$0xff]  ;;  %v847_v15 = vld [vmem:[%s1237_s1 + $0x10] sm:$0xff] }
   0x6   :  { %374 = vmatpush.bf16.msra.mxu0 %v851_v3  ;;  %864 = vmatpush.bf16.msra.mxu3 %v851_v3  ;;  %v855_v16 = vld [vmem:[%s1237_s1 + $0x50] sm:$0xff]  ;;  %v667_v17 = vld [vmem:[%s1238_s0 + $0x20] sm:$0xf]  ;;  %v826_v18 = vld [vmem:[%s1238_s0 + $0x28] sm:$0xf0] }
   0x7   :  { %423 = vmatpush.bf16.msra.mxu1 %v859_v4  ;;  %478 = vmatpush.bf16.msra.mxu2 %v861_v5  ;;  %v668_v19 = vor.u32 %v826_v18, %v667_v17  ;;  %v846_v20 = vld [vmem:[%s1237_s1 + $0x8] sm:$0xff]  ;;  %v845_v22 = vld [vmem:[%s1237_s1] sm:$0xff]  ;;  %v719_v26 = vld [vmem:[%s1238_s0 + $0x90] sm:$0xf] }
   0x8   :  { %v854_v21 = vld [vmem:[%s1237_s1 + $0x48] sm:$0xff]  ;;  %v853_v23 = vld [vmem:[%s1237_s1 + $0x40] sm:$0xff]  ;;  %v840_v27 = vld [vmem:[%s1238_s0 + $0x98] sm:$0xf0] }
   0x9   :  { %v647_v24 = vld [vmem:[%s1238_s0] sm:$0xf]  ;;  %v822_v25 = vld [vmem:[%s1238_s0 + $0x8] sm:$0xf0]  ;;  %v821_v28 = vld [vmem:[%s1238_s0 + $0x4] sm:$0xf]  ;;  %v720_v31 = vor.u32 %v840_v27, %v719_v26 }
   0xa   :  { %813 = vmatmul.msk.bf16.vlgmr.msra.gmra.mxu2 %vm348_vm0, %v656_v8  ;;  %375 = vmatpush.bf16.msra.mxu0 %v850_v9  ;;  %v649_v29 = vld [vmem:[%s1238_s0 + $0xc] sm:$0xf0]  ;;  %v648_v30 = vor.u32 %v822_v25, %v647_v24  ;;  %v679_v33 = vld [vmem:[%s1238_s0 + $0x38] sm:$0xf]  ;;  %v829_v34 = vld [vmem:[%s1238_s0 + $0x40] sm:$0xf0] }
   0xb   :  { %865 = vmatpush.bf16.msra.mxu3 %v850_v9  ;;  %424 = vmatpush.bf16.msra.mxu1 %v858_v10  ;;  %v652_v32 = vor.u32 %v821_v28, %v649_v29  ;;  %v680_v35 = vor.u32 %v829_v34, %v679_v33  ;;  %v659_v36 = vld [vmem:[%s1238_s0 + $0x18] sm:$0xf]  ;;  %v825_v37 = vld [vmem:[%s1238_s0 + $0x20] sm:$0xf0]  ;;  %v731_v38 = vld [vmem:[%s1238_s0 + $0xa8] sm:$0xf] }
   0xc   :  { %v843_v39 = vld [vmem:[%s1238_s0 + $0xb0] sm:$0xf0]  ;;  %v824_v40 = vld [vmem:[%s1238_s0 + $0x1c] sm:$0xf]  ;;  %v661_v41 = vld [vmem:[%s1238_s0 + $0x24] sm:$0xf0]  ;;  %v660_v42 = vor.u32 %v825_v37, %v659_v36 }
   0xd   :  { %v732_v43 = vor.u32 %v843_v39, %v731_v38  ;;  %v664_v44 = vor.u32 %v824_v40, %v661_v41  ;;  %v691_v45 = vld [vmem:[%s1238_s0 + $0x50] sm:$0xf]  ;;  %v832_v46 = vld [vmem:[%s1238_s0 + $0x58] sm:$0xf0]  ;;  %v827_v50 = vld [vmem:[%s1238_s0 + $0x34] sm:$0xf] }
   0xe   :  { %376 = vmatpush.bf16.msra.mxu0 %v849_v11  ;;  %v692_v47 = vor.u32 %v832_v46, %v691_v45  ;;  %v671_v48 = vld [vmem:[%s1238_s0 + $0x30] sm:$0xf]  ;;  %v828_v49 = vld [vmem:[%s1238_s0 + $0x38] sm:$0xf0]  ;;  %v673_v51 = vld [vmem:[%s1238_s0 + $0x3c] sm:$0xf0] }
   0xf   :  { %866 = vmatpush.bf16.msra.mxu3 %v849_v11  ;;  %425 = vmatpush.bf16.msra.mxu1 %v857_v12  ;;  %v839_v52 = vld [vmem:[%s1238_s0 + $0x94] sm:$0xf]  ;;  %v721_v53 = vld [vmem:[%s1238_s0 + $0x9c] sm:$0xf0]  ;;  %v672_v54 = vor.u32 %v828_v49, %v671_v48  ;;  %v676_v55 = vor.u32 %v827_v50, %v673_v51  ;;  %v703_v57 = vld [vmem:[%s1238_s0 + $0x68] sm:$0xf] }
  0x10   :  { %v724_v56 = vor.u32 %v839_v52, %v721_v53  ;;  %v835_v58 = vld [vmem:[%s1238_s0 + $0x70] sm:$0xf0]  ;;  %v683_v60 = vld [vmem:[%s1238_s0 + $0x48] sm:$0xf]  ;;  %v830_v62 = vld [vmem:[%s1238_s0 + $0x4c] sm:$0xf] }
  0x11   :  { %v704_v59 = vor.u32 %v835_v58, %v703_v57  ;;  %v831_v61 = vld [vmem:[%s1238_s0 + $0x50] sm:$0xf0]  ;;  %v685_v63 = vld [vmem:[%s1238_s0 + $0x54] sm:$0xf0]  ;;  %v842_v0 = vld [vmem:[%s1238_s0 + $0xac] sm:$0xf] }
  0x12   :  { %377 = vmatpush.bf16.msra.mxu0 %v848_v13  ;;  %v684_v2 = vor.u32 %v831_v61, %v683_v60  ;;  %v688_v3 = vor.u32 %v830_v62, %v685_v63  ;;  %v715_v5 = vld [vmem:[%s1238_s0 + $0x80] sm:$0xf]  ;;  %v838_v6 = vld [vmem:[%s1238_s0 + $0x88] sm:$0xf0]  ;;  %v697_v11 = vld [vmem:[%s1238_s0 + $0x6c] sm:$0xf0] }
  0x13   :  { %867 = vmatpush.bf16.msra.mxu3 %v848_v13  ;;  %426 = vmatpush.bf16.msra.mxu1 %v856_v14  ;;  %v716_v7 = vor.u32 %v838_v6, %v715_v5  ;;  %v695_v8 = vld [vmem:[%s1238_s0 + $0x60] sm:$0xf]  ;;  %v834_v9 = vld [vmem:[%s1238_s0 + $0x68] sm:$0xf0]  ;;  %v707_v17 = vld [vmem:[%s1238_s0 + $0x78] sm:$0xf] }
  0x14   :  { %v837_v18 = vld [vmem:[%s1238_s0 + $0x80] sm:$0xf0]  ;;  %v844_v24 = vld [vmem:[%s1238_s0 + $0xb8] sm:$0xf0]  ;;  %v881_v26 = vmov 0.0  }
  0x15   :  { %20 = vst.msk [vmem:[#allocation2] sm:$0xff] %vm19_vm1, %v881_v26  ;;  %v1128_v41 = vld [vmem:[%s1239_s2] ss:$0 sm:$0xff] }
  0x16   :  { %378 = vmatpush.bf16.msra.mxu0 %v847_v15  ;;  %21 = vst.msk [vmem:[#allocation2 + $0x8] sm:$0xff] %vm19_vm1, %v881_v26 }
  0x17   :  { %868 = vmatpush.bf16.msra.mxu3 %v847_v15  ;;  %427 = vmatpush.bf16.msra.mxu1 %v855_v16  ;;  %v841_v15 = vld [vmem:[%s1238_s0 + $0xa0] sm:$0xf0]  ;;  %22 = vst.msk [vmem:[#allocation2 + $0x10] sm:$0xff] %vm19_vm1, %v881_v26 }
  0x18   :  { %23 = vst.msk [vmem:[#allocation2 + $0x18] sm:$0xff] %vm19_vm1, %v881_v26 }
  0x19   :  { %24 = vst.msk [vmem:[#allocation2 + $0x20] sm:$0xff] %vm19_vm1, %v881_v26 }
  0x1a   :  { %814 = vmatmul.msk.bf16.gmra.mxu2 %vm348_vm0, %v668_v19  ;;  %379 = vmatpush.bf16.msra.mxu0 %v846_v20  ;;  %v836_v19 = vld [vmem:[%s1238_s0 + $0x7c] sm:$0xf]  ;;  %25 = vst.msk [vmem:[#allocation2 + $0x28] sm:$0xff] %vm19_vm1, %v881_v26 }
  0x1b   :  { %869 = vmatpush.bf16.msra.mxu3 %v846_v20  ;;  %428 = vmatpush.bf16.msra.mxu1 %v854_v21  ;;  %v709_v20 = vld [vmem:[%s1238_s0 + $0x84] sm:$0xf0]  ;;  %26 = vst.msk [vmem:[#allocation2 + $0x30] sm:$0xff] %vm19_vm1, %v881_v26 }
  0x1c   :  { %27 = vst.msk [vmem:[#allocation2 + $0x38] sm:$0xff] %vm19_vm1, %v881_v26  ;;  %v36_v33 = vld [vmem:[#allocation2] sm:$0xff] }
  0x1d   :  { %28 = vst.msk [vmem:[#allocation2 + $0x40] sm:$0xff] %vm19_vm1, %v881_v26  ;;  %v37_v40 = vld [vmem:[#allocation2 + $0x8] sm:$0xff] }
  0x1e   :  { %380 = vmatpush.bf16.msra.mxu0 %v845_v22  ;;  %29 = vst.msk [vmem:[#allocation2 + $0x48] sm:$0xff] %vm19_vm1, %v881_v26  ;;  %v38_v51 = vld [vmem:[#allocation2 + $0x10] sm:$0xff] }
  0x1f   :  { %870 = vmatpush.bf16.msra.mxu3 %v845_v22  ;;  %429 = vmatpush.bf16.msra.mxu1 %v853_v23  ;;  %v712_v22 = vor.u32 %v836_v19, %v709_v20  ;;  %30 = vst.msk [vmem:[#allocation2 + $0x50] sm:$0xff] %vm19_vm1, %v881_v26  ;;  %v39_v62 = vld [vmem:[#allocation2 + $0x18] sm:$0xff] }
  0x20   :  { %31 = vst.msk [vmem:[#allocation2 + $0x58] sm:$0xff] %vm19_vm1, %v881_v26 }
  0x21   :  { %381 = vmatmul.bf16.vlgmr.msra.gmra.mxu0 %v648_v30  ;;  %32 = vst.msk [vmem:[#allocation2 + $0x60] sm:$0xff] %vm19_vm1, %v881_v26 }
  0x22   :  { %411 = vmatmul.bf16.vlgmr.msra.gmra.mxu3 %v720_v31  ;;  %430 = vmatmul.bf16.vlgmr.msra.gmra.mxu1 %v652_v32  ;;  %33 = vst.msk [vmem:[#allocation2 + $0x68] sm:$0xff] %vm19_vm1, %v881_v26 }
  0x23   :  { %871 = vmatpush.bf16.msrb.mxu3 %v860_v1  ;;  %v733_v1 = vld [vmem:[%s1238_s0 + $0xb4] sm:$0xf0]  ;;  %34 = vst.msk [vmem:[#allocation2 + $0x70] sm:$0xff] %vm19_vm1, %v881_v26 }
  0x24   :  { %35 = vst.msk [vmem:[#allocation2 + $0x78] sm:$0xff] %vm19_vm1, %v881_v26 }
  0x27   :  { %872 = vmatpush.bf16.msrb.mxu3 %v859_v4  ;;  %v736_v4 = vor.u32 %v842_v0, %v733_v1 }
  0x2a   :  { %815 = vmatmul.msk.bf16.gmra.mxu2 %vm348_vm0, %v680_v35 }
  0x2b   :  { %873 = vmatpush.bf16.msrb.mxu3 %v858_v10  ;;  %v833_v10 = vld [vmem:[%s1238_s0 + $0x64] sm:$0xf] }
  0x2c   :  { %v700_v13 = vor.u32 %v833_v10, %v697_v11  ;;  %v40_v10 = vld [vmem:[#allocation2 + $0x20] sm:$0xff] }
  0x2f   :  { %874 = vmatpush.bf16.msrb.mxu3 %v857_v12  ;;  %v696_v12 = vor.u32 %v834_v9, %v695_v8 }
  0x31   :  { %386 = vmatmul.bf16.gmra.mxu0 %v660_v42 }
  0x32   :  { %416 = vmatmul.bf16.gmra.mxu3 %v732_v43  ;;  %435 = vmatmul.bf16.gmra.mxu1 %v664_v44 }
  0x33   :  { %875 = vmatpush.bf16.msrb.mxu3 %v856_v14  ;;  %v727_v14 = vld [vmem:[%s1238_s0 + $0x98] sm:$0xf] }
  0x37   :  { %876 = vmatpush.bf16.msrb.mxu3 %v855_v16  ;;  %v728_v16 = vor.u32 %v841_v15, %v727_v14 }
  0x3a   :  { %816 = vmatmul.msk.bf16.gmra.mxu2 %vm348_vm0, %v692_v47 }
  0x3b   :  { %877 = vmatpush.bf16.msrb.mxu3 %v854_v21  ;;  %v708_v21 = vor.u32 %v837_v18, %v707_v17 }
  0x3f   :  { %878 = vmatpush.bf16.msrb.mxu3 %v853_v23  ;;  %v739_v23 = vld [vmem:[%s1238_s0 + $0xb0] sm:$0xf] }
  0x40   :  { %v740_v25 = vor.u32 %v844_v24, %v739_v23 }
  0x41   :  { %391 = vmatmul.bf16.gmra.mxu0 %v672_v54 }
  0x42   :  { %440 = vmatmul.bf16.gmra.mxu1 %v676_v55  ;;  %460 = vmatmul.bf16.vlgmr.msrb.gmra.mxu3 %v724_v56 }
  0x4a   :  { %817 = vmatmul.msk.bf16.gmra.mxu2 %vm348_vm0, %v704_v59 }
  0x51   :  { %396 = vmatmul.bf16.gmra.mxu0 %v684_v2 }
  0x52   :  { %445 = vmatmul.bf16.gmra.mxu1 %v688_v3  ;;  %465 = vmatmul.bf16.gmra.mxu3 %v736_v4 }
  0x5a   :  { %818 = vmatmul.msk.bf16.gmra.mxu2 %vm348_vm0, %v716_v7 }
  0x61   :  { %401 = vmatmul.bf16.gmra.mxu0 %v696_v12 }
  0x62   :  { %450 = vmatmul.bf16.gmra.mxu1 %v700_v13 }
  0x6a   :  { %819 = vmatmul.msk.bf16.gmra.mxu2 %vm348_vm0, %v728_v16 }
  0x71   :  { %406 = vmatmul.bf16.gmra.mxu0 %v708_v21 }
  0x72   :  { %455 = vmatmul.bf16.gmra.mxu1 %v712_v22  ;;  %v41_v22 = vld [vmem:[#allocation2 + $0x28] sm:$0xff] }
  0x7a   :  { %820 = vmatmul.msk.bf16.gmra.mxu2 %vm348_vm0, %v740_v25 }
  0x8d   :  { %v480_v27 = vpop.f32.mrf.mxu2 }
  0x95   :  { %v482_v28 = vpop.f32.mrf.mxu2 }
  0x9d   :  { %v485_v29 = vpop.f32.mrf.mxu2 }
  0x9e   :  { %v382_v30 = vpop.f32.mrf.mxu0 }
  0x9f   :  { %v431_v31 = vpop.f32.mrf.mxu1 }
  0xa0   :  { %v432_v32 = vadd.f32 %v431_v31, %v382_v30 }
  0xa2   :  { %v481_v34 = vadd.f32 %v480_v27, %v432_v32 }
  0xa4   :  { %v520_v35 = vadd.f32 %v481_v34, %v36_v33  ;;  %v42_v34 = vld [vmem:[#allocation2 + $0x30] sm:$0xff] }
  0xa5   :  { %v487_v36 = vpop.f32.mrf.mxu2  ;;  %v1138_v1 = vpop.f32.mrf.mxu3 }
  0xa6   :  { %537 = vst.msk [vmem:[#allocation2] sm:$0xff] %vm19_vm1, %v520_v35  ;;  %v384_v37 = vpop.f32.mrf.mxu0 }
  0xa7   :  { %v433_v38 = vpop.f32.mrf.mxu1 }
  0xa8   :  { %v434_v39 = vadd.f32 %v433_v38, %v384_v37 }
  0xaa   :  { %v483_v42 = vadd.f32 %v482_v28, %v434_v39 }
  0xac   :  { %v521_v43 = vadd.f32 %v483_v42, %v37_v40 }
  0xad   :  { %v556_v44 = vld [vmem:[#allocation2] sm:$0xff]  ;;  %v490_v45 = vpop.f32.mrf.mxu2  ;;  %v1150_v14 = vpop.f32.mrf.mxu3 }
  0xae   :  { %v576_v46 = vadd.f32 %v1128_v41, %v556_v44  ;;  %538 = vst.msk [vmem:[#allocation2 + $0x8] sm:$0xff] %vm19_vm1, %v521_v43  ;;  %v387_v47 = vpop.f32.mrf.mxu0 }
  0xaf   :  { %v436_v48 = vpop.f32.mrf.mxu1 }
  0xb0   :  { %v592_v49 = vmax.f32 %v576_v46, 0.0  ;;  %v437_v50 = vadd.f32 %v436_v48, %v387_v47  ;;  %v43_v47 = vld [vmem:[#allocation2 + $0x38] sm:$0xff] }
  0xb2   :  { %v608_v52 = vpack.c.bf16 %v592_v49, %v592_v49  ;;  %v486_v53 = vadd.f32 %v485_v29, %v437_v50 }
  0xb4   :  { %625 = vst.msk [vmem:[%s1240_s3] sm:$0xf] %vm624_vm2, %v608_v52  ;;  %v522_v54 = vadd.f32 %v486_v53, %v38_v51 }
  0xb5   :  { %v557_v55 = vld [vmem:[#allocation2 + $0x8] sm:$0xff]  ;;  %v492_v56 = vpop.f32.mrf.mxu2  ;;  %v1160_v30 = vpop.f32.mrf.mxu3 }
  0xb6   :  { %v577_v57 = vadd.f32 %v1128_v41, %v557_v55  ;;  %539 = vst.msk [vmem:[#allocation2 + $0x10] sm:$0xff] %vm19_vm1, %v522_v54  ;;  %v389_v58 = vpop.f32.mrf.mxu0 }
  0xb7   :  { %v438_v59 = vpop.f32.mrf.mxu1 }
  0xb8   :  { %v593_v60 = vmax.f32 %v577_v57, 0.0  ;;  %v439_v61 = vadd.f32 %v438_v59, %v389_v58  ;;  %v44_v58 = vld [vmem:[#allocation2 + $0x40] sm:$0xff] }
  0xba   :  { %v609_v63 = vpack.c.bf16 %v593_v60, %v593_v60  ;;  %v488_v0 = vadd.f32 %v487_v36, %v439_v61 }
  0xbc   :  { %626 = vst.msk [vmem:[%s1240_s3 + $0x4] sm:$0xf] %vm624_vm2, %v609_v63  ;;  %v523_v2 = vadd.f32 %v488_v0, %v39_v62 }
  0xbd   :  { %v558_v3 = vld [vmem:[#allocation2 + $0x10] sm:$0xff]  ;;  %v495_v4 = vpop.f32.mrf.mxu2  ;;  %v1168_v46 = vpop.f32.mrf.mxu3 }
  0xbe   :  { %v578_v5 = vadd.f32 %v1128_v41, %v558_v3  ;;  %540 = vst.msk [vmem:[#allocation2 + $0x18] sm:$0xff] %vm19_vm1, %v523_v2  ;;  %v392_v6 = vpop.f32.mrf.mxu0 }
  0xbf   :  { %v441_v7 = vpop.f32.mrf.mxu1 }
  0xc0   :  { %v594_v8 = vmax.f32 %v578_v5, 0.0  ;;  %v442_v9 = vadd.f32 %v441_v7, %v392_v6  ;;  %v45_v7 = vld [vmem:[#allocation2 + $0x48] sm:$0xff] }
  0xc2   :  { %v610_v11 = vpack.c.bf16 %v594_v8, %v594_v8  ;;  %v491_v12 = vadd.f32 %v490_v45, %v442_v9 }
  0xc4   :  { %627 = vst.msk [vmem:[%s1240_s3 + $0x8] sm:$0xf] %vm624_vm2, %v610_v11  ;;  %v524_v13 = vadd.f32 %v491_v12, %v40_v10 }
  0xc5   :  { %v559_v15 = vld [vmem:[#allocation2 + $0x18] sm:$0xff]  ;;  %v497_v16 = vpop.f32.mrf.mxu2  ;;  %v461_v61 = vpop.f32.mrf.mxu3 }
  0xc6   :  { %v579_v17 = vadd.f32 %v1128_v41, %v559_v15  ;;  %541 = vst.msk [vmem:[#allocation2 + $0x20] sm:$0xff] %vm19_vm1, %v524_v13  ;;  %v394_v18 = vpop.f32.mrf.mxu0  ;;  %v462_v10 = vadd.f32 %v461_v61, %v1138_v1  ;;  %v48_v15 = vld [vmem:[#allocation2 + $0x60] sm:$0xff] }
  0xc7   :  { %v443_v19 = vpop.f32.mrf.mxu1 }
  0xc8   :  { %v595_v20 = vmax.f32 %v579_v17, 0.0  ;;  %v444_v21 = vadd.f32 %v443_v19, %v394_v18 }
  0xca   :  { %v611_v23 = vpack.c.bf16 %v595_v20, %v595_v20  ;;  %v493_v24 = vadd.f32 %v492_v56, %v444_v21 }
  0xcc   :  { %628 = vst.msk [vmem:[%s1240_s3 + $0xc] sm:$0xf] %vm624_vm2, %v611_v23  ;;  %v525_v25 = vadd.f32 %v493_v24, %v41_v22  ;;  %v46_v23 = vld [vmem:[#allocation2 + $0x50] sm:$0xff] }
  0xcd   :  { %v560_v26 = vld [vmem:[#allocation2 + $0x20] sm:$0xff]  ;;  %v500_v27 = vpop.f32.mrf.mxu2  ;;  %v463_v12 = vpop.f32.mrf.mxu3 }
  0xce   :  { %v580_v28 = vadd.f32 %v1128_v41, %v560_v26  ;;  %542 = vst.msk [vmem:[#allocation2 + $0x28] sm:$0xff] %vm19_vm1, %v525_v25  ;;  %v397_v29 = vpop.f32.mrf.mxu0  ;;  %v464_v26 = vadd.f32 %v463_v12, %v1150_v14 }
  0xcf   :  { %v446_v31 = vpop.f32.mrf.mxu1 }
  0xd0   :  { %v596_v32 = vmax.f32 %v580_v28, 0.0  ;;  %v447_v33 = vadd.f32 %v446_v31, %v397_v29  ;;  %v49_v29 = vld [vmem:[#allocation2 + $0x68] sm:$0xff] }
  0xd2   :  { %v612_v35 = vpack.c.bf16 %v596_v32, %v596_v32  ;;  %v496_v36 = vadd.f32 %v495_v4, %v447_v33 }
  0xd4   :  { %629 = vst.msk [vmem:[%s1240_s3 + $0x10] sm:$0xf] %vm624_vm2, %v612_v35  ;;  %v526_v37 = vadd.f32 %v496_v36, %v42_v34 }
  0xd5   :  { %v561_v38 = vld [vmem:[#allocation2 + $0x28] sm:$0xff]  ;;  %v502_v39 = vpop.f32.mrf.mxu2  ;;  %v466_v35 = vpop.f32.mrf.mxu3 }
  0xd6   :  { %v581_v40 = vadd.f32 %v1128_v41, %v561_v38  ;;  %543 = vst.msk [vmem:[#allocation2 + $0x30] sm:$0xff] %vm19_vm1, %v526_v37  ;;  %v399_v42 = vpop.f32.mrf.mxu0 }
  0xd7   :  { %v448_v43 = vpop.f32.mrf.mxu1 }
  0xd8   :  { %v597_v44 = vmax.f32 %v581_v40, 0.0  ;;  %v449_v45 = vadd.f32 %v448_v43, %v399_v42  ;;  %v47_v40 = vld [vmem:[#allocation2 + $0x58] sm:$0xff] }
  0xda   :  { %v613_v48 = vpack.c.bf16 %v597_v44, %v597_v44  ;;  %v498_v49 = vadd.f32 %v497_v16, %v449_v45  ;;  %v467_v45 = vadd.f32 %v466_v35, %v1160_v30 }
  0xdc   :  { %630 = vst.msk [vmem:[%s1240_s3 + $0x14] sm:$0xf] %vm624_vm2, %v613_v48  ;;  %v527_v50 = vadd.f32 %v498_v49, %v43_v47 }
  0xdd   :  { %v562_v51 = vld [vmem:[#allocation2 + $0x30] sm:$0xff]  ;;  %v505_v52 = vpop.f32.mrf.mxu2 }
  0xde   :  { %v582_v53 = vadd.f32 %v1128_v41, %v562_v51  ;;  %544 = vst.msk [vmem:[#allocation2 + $0x38] sm:$0xff] %vm19_vm1, %v527_v50  ;;  %v402_v54 = vpop.f32.mrf.mxu0  ;;  %v50_v50 = vld [vmem:[#allocation2 + $0x70] sm:$0xff] }
  0xdf   :  { %v451_v55 = vpop.f32.mrf.mxu1 }
  0xe0   :  { %v598_v56 = vmax.f32 %v582_v53, 0.0  ;;  %v452_v57 = vadd.f32 %v451_v55, %v402_v54 }
  0xe2   :  { %v614_v59 = vpack.c.bf16 %v598_v56, %v598_v56  ;;  %v501_v60 = vadd.f32 %v500_v27, %v452_v57  ;;  %v468_v56 = vpop.f32.mrf.mxu3 }
  0xe4   :  { %631 = vst.msk [vmem:[%s1240_s3 + $0x18] sm:$0xf] %vm624_vm2, %v614_v59  ;;  %v528_v62 = vadd.f32 %v501_v60, %v44_v58  ;;  %v469_v60 = vadd.f32 %v468_v56, %v1168_v46 }
  0xe5   :  { %v563_v63 = vld [vmem:[#allocation2 + $0x38] sm:$0xff]  ;;  %v507_v0 = vpop.f32.mrf.mxu2 }
  0xe6   :  { %v583_v2 = vadd.f32 %v1128_v41, %v563_v63  ;;  %545 = vst.msk [vmem:[#allocation2 + $0x40] sm:$0xff] %vm19_vm1, %v528_v62  ;;  %v404_v3 = vpop.f32.mrf.mxu0  ;;  %v51_v63 = vld [vmem:[#allocation2 + $0x78] sm:$0xff] }
  0xe7   :  { %v453_v4 = vpop.f32.mrf.mxu1 }
  0xe8   :  { %v599_v5 = vmax.f32 %v583_v2, 0.0  ;;  %v454_v6 = vadd.f32 %v453_v4, %v404_v3 }
  0xea   :  { %v615_v8 = vpack.c.bf16 %v599_v5, %v599_v5  ;;  %v503_v9 = vadd.f32 %v502_v39, %v454_v6 }
  0xec   :  { %632 = vst.msk [vmem:[%s1240_s3 + $0x1c] sm:$0xf] %vm624_vm2, %v615_v8  ;;  %v529_v11 = vadd.f32 %v503_v9, %v45_v7 }
  0xed   :  { %v564_v13 = vld [vmem:[#allocation2 + $0x40] sm:$0xff]  ;;  %v510_v16 = vpop.f32.mrf.mxu2 }
  0xee   :  { %v584_v17 = vadd.f32 %v1128_v41, %v564_v13  ;;  %546 = vst.msk [vmem:[#allocation2 + $0x48] sm:$0xff] %vm19_vm1, %v529_v11  ;;  %v511_v18 = vadd.f32 %v510_v16, %v462_v10  ;;  %v407_v19 = vpop.f32.mrf.mxu0 }
  0xef   :  { %v456_v20 = vpop.f32.mrf.mxu1 }
  0xf0   :  { %v600_v21 = vmax.f32 %v584_v17, 0.0  ;;  %v532_v22 = vadd.f32 %v511_v18, %v48_v15  ;;  %v457_v1 = vadd.f32 %v456_v20, %v407_v19 }
  0xf2   :  { %v616_v24 = vpack.c.bf16 %v600_v21, %v600_v21  ;;  %549 = vst.msk [vmem:[#allocation2 + $0x60] sm:$0xff] %vm19_vm1, %v532_v22  ;;  %v506_v25 = vadd.f32 %v505_v52, %v457_v1 }
  0xf4   :  { %633 = vst.msk [vmem:[%s1240_s3 + $0x20] sm:$0xf] %vm624_vm2, %v616_v24  ;;  %v530_v27 = vadd.f32 %v506_v25, %v46_v23 }
  0xf5   :  { %v565_v28 = vld [vmem:[#allocation2 + $0x48] sm:$0xff]  ;;  %v512_v31 = vpop.f32.mrf.mxu2 }
  0xf6   :  { %v585_v32 = vadd.f32 %v1128_v41, %v565_v28  ;;  %547 = vst.msk [vmem:[#allocation2 + $0x50] sm:$0xff] %vm19_vm1, %v530_v27  ;;  %v513_v33 = vadd.f32 %v512_v31, %v464_v26  ;;  %v409_v34 = vpop.f32.mrf.mxu0 }
  0xf7   :  { %v458_v36 = vpop.f32.mrf.mxu1 }
  0xf8   :  { %v601_v37 = vmax.f32 %v585_v32, 0.0  ;;  %v533_v38 = vadd.f32 %v513_v33, %v49_v29  ;;  %v459_v14 = vadd.f32 %v458_v36, %v409_v34 }
  0xf9   :  { %v568_v39 = vld [vmem:[#allocation2 + $0x60] sm:$0xff] }
  0xfa   :  { %v617_v42 = vpack.c.bf16 %v601_v37, %v601_v37  ;;  %v588_v43 = vadd.f32 %v1128_v41, %v568_v39  ;;  %550 = vst.msk [vmem:[#allocation2 + $0x68] sm:$0xff] %vm19_vm1, %v533_v38  ;;  %v508_v44 = vadd.f32 %v507_v0, %v459_v14 }
  0xfc   :  { %634 = vst.msk [vmem:[%s1240_s3 + $0x24] sm:$0xf] %vm624_vm2, %v617_v42  ;;  %v604_v47 = vmax.f32 %v588_v43, 0.0  ;;  %v531_v48 = vadd.f32 %v508_v44, %v47_v40 }
  0xfd   :  { %v566_v49 = vld [vmem:[#allocation2 + $0x50] sm:$0xff]  ;;  %v515_v51 = vpop.f32.mrf.mxu2 }
  0xfe   :  { %v620_v52 = vpack.c.bf16 %v604_v47, %v604_v47  ;;  %v586_v53 = vadd.f32 %v1128_v41, %v566_v49  ;;  %548 = vst.msk [vmem:[#allocation2 + $0x58] sm:$0xff] %vm19_vm1, %v531_v48  ;;  %v516_v54 = vadd.f32 %v515_v51, %v467_v45 }
 0x100   :  { %637 = vst.msk [vmem:[%s1240_s3 + $0x30] sm:$0xf] %vm624_vm2, %v620_v52  ;;  %v602_v30 = vmax.f32 %v586_v53, 0.0  ;;  %v534_v55 = vadd.f32 %v516_v54, %v50_v50 }
 0x101   :  { %v569_v57 = vld [vmem:[#allocation2 + $0x68] sm:$0xff] }
 0x102   :  { %v618_v58 = vpack.c.bf16 %v602_v30, %v602_v30  ;;  %v589_v59 = vadd.f32 %v1128_v41, %v569_v57  ;;  %551 = vst.msk [vmem:[#allocation2 + $0x70] sm:$0xff] %vm19_vm1, %v534_v55 }
 0x104   :  { %635 = vst.msk [vmem:[%s1240_s3 + $0x28] sm:$0xf] %vm624_vm2, %v618_v58  ;;  %v605_v61 = vmax.f32 %v589_v59, 0.0 }
 0x105   :  { %v567_v62 = vld [vmem:[#allocation2 + $0x58] sm:$0xff]  ;;  %v517_v0 = vpop.f32.mrf.mxu2 }
 0x106   :  { %v621_v2 = vpack.c.bf16 %v605_v61, %v605_v61  ;;  %v587_v3 = vadd.f32 %v1128_v41, %v567_v62  ;;  %v518_v4 = vadd.f32 %v517_v0, %v469_v60 }
 0x108   :  { %638 = vst.msk [vmem:[%s1240_s3 + $0x34] sm:$0xf] %vm624_vm2, %v621_v2  ;;  %v603_v5 = vmax.f32 %v587_v3, 0.0  ;;  %v535_v46 = vadd.f32 %v518_v4, %v51_v63 }
 0x109   :  { %v570_v6 = vld [vmem:[#allocation2 + $0x70] sm:$0xff] }
 0x10a   :  { %v619_v7 = vpack.c.bf16 %v603_v5, %v603_v5  ;;  %v590_v8 = vadd.f32 %v1128_v41, %v570_v6  ;;  %552 = vst.msk [vmem:[#allocation2 + $0x78] sm:$0xff] %vm19_vm1, %v535_v46 }
 0x10c   :  { %636 = vst.msk [vmem:[%s1240_s3 + $0x2c] sm:$0xf] %vm624_vm2, %v619_v7  ;;  %v606_v9 = vmax.f32 %v590_v8, 0.0 }
 0x10e   :  { %v622_v10 = vpack.c.bf16 %v606_v9, %v606_v9 }
 0x110   :  { %639 = vst.msk [vmem:[%s1240_s3 + $0x38] sm:$0xf] %vm624_vm2, %v622_v10 }
 0x111   :  { %v571_v11 = vld [vmem:[#allocation2 + $0x78] sm:$0xff] }
 0x112   :  { %v591_v12 = vadd.f32 %v1128_v41, %v571_v11 }
 0x114   :  { %v607_v13 = vmax.f32 %v591_v12, 0.0 }
 0x116   :  { %v623_v15 = vpack.c.bf16 %v607_v13, %v607_v13 }
 0x118   :  { %640 = vst.msk [vmem:[%s1240_s3 + $0x3c] sm:$0xf] %vm624_vm2, %v623_v15 }

// kernel: deeplab_forward.12
= control target key start
LH: loop header
LB: loop body
LE: loop exit
PB: predicated region body
PF: predicated region fallthrough
CT: control target
= control target key end

     0   :  { %vm587_vm0 = vcmask 523264   ;;  %s1882_s0 = inlined_call_operand.vmem [shape: bf16[32,576], index: 0, kind: input, shape index: {}]   ;;  %s1883_s1 = inlined_call_operand.vmem [shape: bf16[576,128], index: 1, kind: input, shape index: {}]   ;;  %s1884_s2 = inlined_call_operand.vmem [shape: f32[1,128], index: 2, kind: input, shape index: {}]   ;;  %s1885_s3 = inlined_call_operand.vmem [shape: bf16[32,128], index: 3, kind: output, shape index: {}]  }
   0x1   :  { %v1396_v0 = vld [vmem:[%s1883_s1 + $0x38] sm:$0xff]  ;;  %v1395_v1 = vld [vmem:[%s1883_s1 + $0x30] sm:$0xff]  ;;  %v1394_v2 = vld [vmem:[%s1883_s1 + $0x28] sm:$0xff] }
   0x2   :  { %1472 = vmatpush.bf16.msra.mxu1 %v1396_v0  ;;  %1473 = vmatpush.bf16.msra.mxu2 %v1396_v0  ;;  %v1393_v3 = vld [vmem:[%s1883_s1 + $0x20] sm:$0xff]  ;;  %v1392_v4 = vld [vmem:[%s1883_s1 + $0x18] sm:$0xff]  ;;  %v1391_v5 = vld [vmem:[%s1883_s1 + $0x10] sm:$0xff] }
   0x3   :  { %1474 = vmatpush.bf16.msra.mxu3 %v1396_v0  ;;  %612 = vmatpush.bf16.msra.mxu0 %v1396_v0  ;;  %v1390_v6 = vld [vmem:[%s1883_s1 + $0x8] sm:$0xff]  ;;  %v1389_v7 = vld [vmem:[%s1883_s1] sm:$0xff]  ;;  %v1079_v8 = vld [vmem:[%s1882_s0 + $0x50] sm:$0xf] }
   0x4   :  { %v1361_v9 = vld [vmem:[%s1882_s0 + $0x60] sm:$0xf0]  ;;  %v1119_v10 = vld [vmem:[%s1882_s0 + $0xa0] sm:$0xf]  ;;  %v1371_v11 = vld [vmem:[%s1882_s0 + $0xb0] sm:$0xf0] }
   0x5   :  { %v1159_v12 = vld [vmem:[%s1882_s0 + $0xf0] sm:$0xf]  ;;  %v1381_v13 = vld [vmem:[%s1882_s0 + $0x100] sm:$0xf0]  ;;  %v1039_v14 = vld [vmem:[%s1882_s0] sm:$0xf]  ;;  %v1080_v18 = vor.u32 %v1361_v9, %v1079_v8  ;;  %v1120_v19 = vor.u32 %v1371_v11, %v1119_v10 }
   0x6   :  { %1475 = vmatpush.bf16.msra.mxu1 %v1395_v1  ;;  %1476 = vmatpush.bf16.msra.mxu2 %v1395_v1  ;;  %v1351_v15 = vld [vmem:[%s1882_s0 + $0x10] sm:$0xf0]  ;;  %v1412_v16 = vld [vmem:[%s1883_s1 + $0xb8] sm:$0xff]  ;;  %v1160_v20 = vor.u32 %v1381_v13, %v1159_v12  ;;  %v1410_v28 = vld [vmem:[%s1883_s1 + $0xa8] sm:$0xff] }
   0x7   :  { %1477 = vmatpush.bf16.msra.mxu3 %v1395_v1  ;;  %613 = vmatpush.bf16.msra.mxu0 %v1395_v1  ;;  %v1404_v17 = vld [vmem:[%s1883_s1 + $0x78] sm:$0xff]  ;;  %v1040_v21 = vor.u32 %v1351_v15, %v1039_v14  ;;  %v1411_v24 = vld [vmem:[%s1883_s1 + $0xb0] sm:$0xff]  ;;  %v1402_v29 = vld [vmem:[%s1883_s1 + $0x68] sm:$0xff] }
   0x8   :  { %v1420_v22 = vld [vmem:[%s1883_s1 + $0xf8] sm:$0xff]  ;;  %v1403_v25 = vld [vmem:[%s1883_s1 + $0x70] sm:$0xff]  ;;  %v1418_v30 = vld [vmem:[%s1883_s1 + $0xe8] sm:$0xff] }
   0x9   :  { %v1424_v23 = vld [vmem:[%s1883_s1 + $0x118] sm:$0xff]  ;;  %v1419_v26 = vld [vmem:[%s1883_s1 + $0xf0] sm:$0xff]  ;;  %v1422_v31 = vld [vmem:[%s1883_s1 + $0x108] sm:$0xff] }
   0xa   :  { %1478 = vmatpush.bf16.msra.mxu1 %v1394_v2  ;;  %1479 = vmatpush.bf16.msra.mxu2 %v1394_v2  ;;  %v1423_v27 = vld [vmem:[%s1883_s1 + $0x110] sm:$0xff]  ;;  %v1409_v32 = vld [vmem:[%s1883_s1 + $0xa0] sm:$0xff]  ;;  %v1099_v35 = vld [vmem:[%s1882_s0 + $0x78] sm:$0xf] }
   0xb   :  { %1480 = vmatpush.bf16.msra.mxu3 %v1394_v2  ;;  %614 = vmatpush.bf16.msra.mxu0 %v1394_v2  ;;  %v1401_v33 = vld [vmem:[%s1883_s1 + $0x60] sm:$0xff]  ;;  %v1366_v36 = vld [vmem:[%s1882_s0 + $0x88] sm:$0xf0]  ;;  %v1139_v37 = vld [vmem:[%s1882_s0 + $0xc8] sm:$0xf] }
   0xc   :  { %v1417_v34 = vld [vmem:[%s1883_s1 + $0xe0] sm:$0xff]  ;;  %v1376_v38 = vld [vmem:[%s1882_s0 + $0xd8] sm:$0xf0]  ;;  %v1179_v39 = vld [vmem:[%s1882_s0 + $0x118] sm:$0xf]  ;;  %v1100_v46 = vor.u32 %v1366_v36, %v1099_v35 }
   0xd   :  { %v1386_v40 = vld [vmem:[%s1882_s0 + $0x128] sm:$0xf0]  ;;  %v1059_v41 = vld [vmem:[%s1882_s0 + $0x28] sm:$0xf]  ;;  %v1356_v42 = vld [vmem:[%s1882_s0 + $0x38] sm:$0xf0]  ;;  %v1140_v47 = vor.u32 %v1376_v38, %v1139_v37 }
   0xe   :  { %1481 = vmatpush.bf16.msra.mxu1 %v1393_v3  ;;  %1482 = vmatpush.bf16.msra.mxu2 %v1393_v3  ;;  %v1421_v43 = vld [vmem:[%s1883_s1 + $0x100] sm:$0xff]  ;;  %v1408_v44 = vld [vmem:[%s1883_s1 + $0x98] sm:$0xff]  ;;  %v1180_v48 = vor.u32 %v1386_v40, %v1179_v39  ;;  %v1060_v49 = vor.u32 %v1356_v42, %v1059_v41  ;;  %v1407_v51 = vld [vmem:[%s1883_s1 + $0x90] sm:$0xff] }
   0xf   :  { %1483 = vmatpush.bf16.msra.mxu3 %v1393_v3  ;;  %615 = vmatpush.bf16.msra.mxu0 %v1393_v3  ;;  %v1400_v45 = vld [vmem:[%s1883_s1 + $0x58] sm:$0xff]  ;;  %v1399_v52 = vld [vmem:[%s1883_s1 + $0x50] sm:$0xff]  ;;  %v1406_v54 = vld [vmem:[%s1883_s1 + $0x88] sm:$0xff] }
  0x10   :  { %v1416_v50 = vld [vmem:[%s1883_s1 + $0xd8] sm:$0xff]  ;;  %v1415_v53 = vld [vmem:[%s1883_s1 + $0xd0] sm:$0xff]  ;;  %v1398_v55 = vld [vmem:[%s1883_s1 + $0x48] sm:$0xff] }
  0x11   :  { %v1414_v56 = vld [vmem:[%s1883_s1 + $0xc8] sm:$0xff]  ;;  %v1405_v57 = vld [vmem:[%s1883_s1 + $0x80] sm:$0xff]  ;;  %v1041_v61 = vld [vmem:[%s1882_s0 + $0x14] sm:$0xf0] }
  0x12   :  { %1484 = vmatpush.bf16.msra.mxu1 %v1392_v4  ;;  %1485 = vmatpush.bf16.msra.mxu2 %v1392_v4  ;;  %v1397_v58 = vld [vmem:[%s1883_s1 + $0x40] sm:$0xff]  ;;  %v1047_v62 = vld [vmem:[%s1882_s0 + $0x8] sm:$0xf]  ;;  %v1352_v63 = vld [vmem:[%s1882_s0 + $0x18] sm:$0xf0] }
  0x13   :  { %1486 = vmatpush.bf16.msra.mxu3 %v1392_v4  ;;  %616 = vmatpush.bf16.msra.mxu0 %v1392_v4  ;;  %v1413_v59 = vld [vmem:[%s1883_s1 + $0xc0] sm:$0xff]  ;;  %v1350_v0 = vld [vmem:[%s1882_s0 + $0xc] sm:$0xf]  ;;  %v1055_v2 = vld [vmem:[%s1882_s0 + $0x10] sm:$0xf] }
  0x14   :  { %v1349_v60 = vld [vmem:[%s1882_s0 + $0x4] sm:$0xf]  ;;  %v1049_v1 = vld [vmem:[%s1882_s0 + $0x1c] sm:$0xf0]  ;;  %v1354_v8 = vld [vmem:[%s1882_s0 + $0x2c] sm:$0xf] }
  0x15   :  { %v1353_v3 = vld [vmem:[%s1882_s0 + $0x20] sm:$0xf0]  ;;  %v1044_v4 = vor.u32 %v1349_v60, %v1041_v61  ;;  %v1061_v9 = vld [vmem:[%s1882_s0 + $0x3c] sm:$0xf0]  ;;  %v1067_v10 = vld [vmem:[%s1882_s0 + $0x30] sm:$0xf] }
  0x16   :  { %1487 = vmatpush.bf16.msra.mxu1 %v1391_v5  ;;  %1488 = vmatpush.bf16.msra.mxu2 %v1391_v5  ;;  %v1357_v11 = vld [vmem:[%s1882_s0 + $0x40] sm:$0xf0]  ;;  %v1355_v12 = vld [vmem:[%s1882_s0 + $0x34] sm:$0xf]  ;;  %v1069_v13 = vld [vmem:[%s1882_s0 + $0x44] sm:$0xf0] }
  0x17   :  { %1489 = vmatpush.bf16.msra.mxu3 %v1391_v5  ;;  %617 = vmatpush.bf16.msra.mxu0 %v1391_v5  ;;  %v1048_v5 = vor.u32 %v1352_v63, %v1047_v62  ;;  %v1075_v14 = vld [vmem:[%s1882_s0 + $0x38] sm:$0xf]  ;;  %v1358_v15 = vld [vmem:[%s1882_s0 + $0x48] sm:$0xf0]  ;;  %v1367_v35 = vld [vmem:[%s1882_s0 + $0x90] sm:$0xf0] }
  0x18   :  { %v1365_v36 = vld [vmem:[%s1882_s0 + $0x84] sm:$0xf]  ;;  %v1109_v37 = vld [vmem:[%s1882_s0 + $0x94] sm:$0xf0]  ;;  %v1115_v38 = vld [vmem:[%s1882_s0 + $0x88] sm:$0xf] }
  0x19   :  { %v1368_v39 = vld [vmem:[%s1882_s0 + $0x98] sm:$0xf0]  ;;  %v1112_v42 = vor.u32 %v1365_v36, %v1109_v37  ;;  %v1375_v60 = vld [vmem:[%s1882_s0 + $0xd4] sm:$0xf]  ;;  %v1149_v61 = vld [vmem:[%s1882_s0 + $0xe4] sm:$0xf0] }
  0x1a   :  { %1490 = vmatpush.bf16.msra.mxu1 %v1390_v6  ;;  %1491 = vmatpush.bf16.msra.mxu2 %v1390_v6  ;;  %v1155_v62 = vld [vmem:[%s1882_s0 + $0xd8] sm:$0xf]  ;;  %v1378_v63 = vld [vmem:[%s1882_s0 + $0xe8] sm:$0xf0] }
  0x1b   :  { %1492 = vmatpush.bf16.msra.mxu3 %v1390_v6  ;;  %618 = vmatpush.bf16.msra.mxu0 %v1390_v6  ;;  %v1052_v6 = vor.u32 %v1350_v0, %v1049_v1 }
  0x1e   :  { %1493 = vmatpush.bf16.msra.mxu1 %v1389_v7  ;;  %1494 = vmatpush.bf16.msra.mxu2 %v1389_v7 }
  0x1f   :  { %1495 = vmatpush.bf16.msra.mxu3 %v1389_v7  ;;  %619 = vmatpush.bf16.msra.mxu0 %v1389_v7  ;;  %v1056_v7 = vor.u32 %v1353_v3, %v1055_v2  ;;  %v1152_v2 = vor.u32 %v1375_v60, %v1149_v61  ;;  %v1156_v3 = vor.u32 %v1378_v63, %v1155_v62 }
  0x21   :  { %630 = vmatmul.bf16.vlgmr.msra.gmra.mxu1 %v1080_v18  ;;  %640 = vmatmul.bf16.vlgmr.msra.gmra.mxu2 %v1120_v19  ;;  %v1072_v18 = vor.u32 %v1355_v12, %v1069_v13  ;;  %v1076_v19 = vor.u32 %v1358_v15, %v1075_v14 }
  0x22   :  { %710 = vmatpush.bf16.msrb.mxu2 %v1412_v16  ;;  %661 = vmatpush.bf16.msrb.mxu1 %v1404_v17  ;;  %v1064_v16 = vor.u32 %v1354_v8, %v1061_v9  ;;  %v1068_v17 = vor.u32 %v1357_v11, %v1067_v10  ;;  %v1380_v8 = vld [vmem:[%s1882_s0 + $0xfc] sm:$0xf]  ;;  %v1169_v9 = vld [vmem:[%s1882_s0 + $0x10c] sm:$0xf0]  ;;  %v1175_v10 = vld [vmem:[%s1882_s0 + $0x100] sm:$0xf] }
  0x23   :  { %650 = vmatmul.bf16.vlgmr.msra.gmra.mxu3 %v1160_v20  ;;  %620 = vmatmul.bf16.vlgmr.msra.gmra.mxu0 %v1040_v21  ;;  %v1359_v20 = vld [vmem:[%s1882_s0 + $0x54] sm:$0xf]  ;;  %v1081_v21 = vld [vmem:[%s1882_s0 + $0x64] sm:$0xf0]  ;;  %v1172_v15 = vor.u32 %v1380_v8, %v1169_v9 }
  0x24   :  { %759 = vmatpush.bf16.msrb.mxu3 %v1420_v22  ;;  %812 = vmatpush.bf16.msrb.mxu0 %v1424_v23  ;;  %v1087_v22 = vld [vmem:[%s1882_s0 + $0x58] sm:$0xf]  ;;  %v1362_v23 = vld [vmem:[%s1882_s0 + $0x68] sm:$0xf0]  ;;  %v1383_v11 = vld [vmem:[%s1882_s0 + $0x110] sm:$0xf0] }
  0x26   :  { %711 = vmatpush.bf16.msrb.mxu2 %v1411_v24  ;;  %662 = vmatpush.bf16.msrb.mxu1 %v1403_v25  ;;  %v1360_v24 = vld [vmem:[%s1882_s0 + $0x5c] sm:$0xf]  ;;  %v1089_v25 = vld [vmem:[%s1882_s0 + $0x6c] sm:$0xf0] }
  0x28   :  { %760 = vmatpush.bf16.msrb.mxu3 %v1419_v26  ;;  %813 = vmatpush.bf16.msrb.mxu0 %v1423_v27  ;;  %v1095_v26 = vld [vmem:[%s1882_s0 + $0x60] sm:$0xf]  ;;  %v1363_v27 = vld [vmem:[%s1882_s0 + $0x70] sm:$0xf0] }
  0x2a   :  { %712 = vmatpush.bf16.msrb.mxu2 %v1410_v28  ;;  %663 = vmatpush.bf16.msrb.mxu1 %v1402_v29  ;;  %v1084_v28 = vor.u32 %v1359_v20, %v1081_v21  ;;  %v1088_v29 = vor.u32 %v1362_v23, %v1087_v22  ;;  %v1384_v22 = vld [vmem:[%s1882_s0 + $0x11c] sm:$0xf]  ;;  %v1181_v23 = vld [vmem:[%s1882_s0 + $0x12c] sm:$0xf0] }
  0x2c   :  { %761 = vmatpush.bf16.msrb.mxu3 %v1418_v30  ;;  %814 = vmatpush.bf16.msrb.mxu0 %v1422_v31  ;;  %v1092_v30 = vor.u32 %v1360_v24, %v1089_v25  ;;  %v1096_v31 = vor.u32 %v1363_v27, %v1095_v26  ;;  %v1187_v24 = vld [vmem:[%s1882_s0 + $0x120] sm:$0xf]  ;;  %v1387_v25 = vld [vmem:[%s1882_s0 + $0x130] sm:$0xf0]  ;;  %v1385_v26 = vld [vmem:[%s1882_s0 + $0x124] sm:$0xf] }
  0x2d   :  { %v1189_v27 = vld [vmem:[%s1882_s0 + $0x134] sm:$0xf0] }
  0x2e   :  { %713 = vmatpush.bf16.msrb.mxu2 %v1409_v32  ;;  %664 = vmatpush.bf16.msrb.mxu1 %v1401_v33  ;;  %v1364_v32 = vld [vmem:[%s1882_s0 + $0x7c] sm:$0xf]  ;;  %v1101_v33 = vld [vmem:[%s1882_s0 + $0x8c] sm:$0xf0] }
  0x2f   :  { %v1104_v40 = vor.u32 %v1364_v32, %v1101_v33  ;;  %v1184_v32 = vor.u32 %v1384_v22, %v1181_v23  ;;  %v1188_v33 = vor.u32 %v1387_v25, %v1187_v24 }
  0x30   :  { %762 = vmatpush.bf16.msrb.mxu3 %v1417_v34  ;;  %815 = vmatpush.bf16.msrb.mxu0 %v1421_v43  ;;  %v1107_v34 = vld [vmem:[%s1882_s0 + $0x80] sm:$0xf]  ;;  %v1116_v43 = vor.u32 %v1368_v39, %v1115_v38 }
  0x31   :  { %635 = vmatmul.bf16.gmra.mxu1 %v1100_v46  ;;  %645 = vmatmul.bf16.gmra.mxu2 %v1140_v47  ;;  %v1108_v41 = vor.u32 %v1367_v35, %v1107_v34  ;;  %v1127_v46 = vld [vmem:[%s1882_s0 + $0xa8] sm:$0xf]  ;;  %v1372_v47 = vld [vmem:[%s1882_s0 + $0xb8] sm:$0xf0]  ;;  %v1192_v35 = vor.u32 %v1385_v26, %v1189_v27 }
  0x32   :  { %714 = vmatpush.bf16.msrb.mxu2 %v1408_v44  ;;  %665 = vmatpush.bf16.msrb.mxu1 %v1400_v45  ;;  %v1369_v44 = vld [vmem:[%s1882_s0 + $0xa4] sm:$0xf]  ;;  %v1121_v45 = vld [vmem:[%s1882_s0 + $0xb4] sm:$0xf0] }
  0x33   :  { %655 = vmatmul.bf16.gmra.mxu3 %v1180_v48  ;;  %625 = vmatmul.bf16.gmra.mxu0 %v1060_v49  ;;  %v1370_v48 = vld [vmem:[%s1882_s0 + $0xac] sm:$0xf]  ;;  %v1129_v49 = vld [vmem:[%s1882_s0 + $0xbc] sm:$0xf0] }
  0x34   :  { %763 = vmatpush.bf16.msrb.mxu3 %v1416_v50  ;;  %v1135_v50 = vld [vmem:[%s1882_s0 + $0xb0] sm:$0xf] }
  0x36   :  { %715 = vmatpush.bf16.msrb.mxu2 %v1407_v51  ;;  %666 = vmatpush.bf16.msrb.mxu1 %v1399_v52  ;;  %v1373_v51 = vld [vmem:[%s1882_s0 + $0xc0] sm:$0xf0]  ;;  %v1124_v52 = vor.u32 %v1369_v44, %v1121_v45 }
  0x38   :  { %764 = vmatpush.bf16.msrb.mxu3 %v1415_v53  ;;  %v1128_v53 = vor.u32 %v1372_v47, %v1127_v46 }
  0x3a   :  { %716 = vmatpush.bf16.msrb.mxu2 %v1406_v54  ;;  %667 = vmatpush.bf16.msrb.mxu1 %v1398_v55  ;;  %v1132_v54 = vor.u32 %v1370_v48, %v1129_v49  ;;  %v1136_v55 = vor.u32 %v1373_v51, %v1135_v50 }
  0x3c   :  { %765 = vmatpush.bf16.msrb.mxu3 %v1414_v56  ;;  %v1374_v56 = vld [vmem:[%s1882_s0 + $0xcc] sm:$0xf] }
  0x3e   :  { %717 = vmatpush.bf16.msrb.mxu2 %v1405_v57  ;;  %668 = vmatpush.bf16.msrb.mxu1 %v1397_v58  ;;  %v1141_v57 = vld [vmem:[%s1882_s0 + $0xdc] sm:$0xf0]  ;;  %v1147_v58 = vld [vmem:[%s1882_s0 + $0xd0] sm:$0xf] }
  0x3f   :  { %v1144_v0 = vor.u32 %v1374_v56, %v1141_v57  ;;  %v1496_v56 = vld [vmem:[%s1884_s2] ss:$0 sm:$0xff] }
  0x40   :  { %766 = vmatpush.bf16.msrb.mxu3 %v1413_v59  ;;  %v1377_v59 = vld [vmem:[%s1882_s0 + $0xe0] sm:$0xf0] }
  0x41   :  { %669 = vmatmul.bf16.vlgmr.msrb.gmra.mxu1 %v1044_v4  ;;  %718 = vmatmul.bf16.vlgmr.msrb.gmra.mxu2 %v1048_v5  ;;  %v1148_v1 = vor.u32 %v1377_v59, %v1147_v58  ;;  %v1379_v4 = vld [vmem:[%s1882_s0 + $0xf4] sm:$0xf]  ;;  %v1161_v5 = vld [vmem:[%s1882_s0 + $0x104] sm:$0xf0] }
  0x42   :  { %v1164_v12 = vor.u32 %v1379_v4, %v1161_v5 }
  0x43   :  { %767 = vmatmul.bf16.vlgmr.msrb.gmra.mxu3 %v1052_v6  ;;  %1341 = vmatmul.msk.bf16.vlgmr.msrb.gmra.mxu0 %vm587_vm0, %v1056_v7  ;;  %v1167_v6 = vld [vmem:[%s1882_s0 + $0xf8] sm:$0xf]  ;;  %v1382_v7 = vld [vmem:[%s1882_s0 + $0x108] sm:$0xf0] }
  0x44   :  { %v1168_v13 = vor.u32 %v1382_v7, %v1167_v6 }
  0x51   :  { %674 = vmatmul.bf16.gmra.mxu1 %v1064_v16  ;;  %723 = vmatmul.bf16.gmra.mxu2 %v1068_v17  ;;  %v1176_v16 = vor.u32 %v1383_v11, %v1175_v10 }
  0x53   :  { %772 = vmatmul.bf16.gmra.mxu3 %v1072_v18  ;;  %1342 = vmatmul.msk.bf16.gmra.mxu0 %vm587_vm0, %v1076_v19 }
  0x61   :  { %679 = vmatmul.bf16.gmra.mxu1 %v1084_v28  ;;  %728 = vmatmul.bf16.gmra.mxu2 %v1088_v29  ;;  %v1195_v28 = vld [vmem:[%s1882_s0 + $0x128] sm:$0xf]  ;;  %v1388_v29 = vld [vmem:[%s1882_s0 + $0x138] sm:$0xf0] }
  0x62   :  { %v1196_v36 = vor.u32 %v1388_v29, %v1195_v28 }
  0x63   :  { %777 = vmatmul.bf16.gmra.mxu3 %v1092_v30  ;;  %1343 = vmatmul.msk.bf16.gmra.mxu0 %vm587_vm0, %v1096_v31 }
  0x71   :  { %684 = vmatmul.bf16.gmra.mxu1 %v1104_v40  ;;  %733 = vmatmul.bf16.gmra.mxu2 %v1108_v41 }
  0x73   :  { %782 = vmatmul.bf16.gmra.mxu3 %v1112_v42  ;;  %1344 = vmatmul.msk.bf16.gmra.mxu0 %vm587_vm0, %v1116_v43 }
  0x81   :  { %689 = vmatmul.bf16.gmra.mxu1 %v1124_v52  ;;  %738 = vmatmul.bf16.gmra.mxu2 %v1128_v53 }
  0x83   :  { %787 = vmatmul.bf16.gmra.mxu3 %v1132_v54  ;;  %1345 = vmatmul.msk.bf16.gmra.mxu0 %vm587_vm0, %v1136_v55 }
  0x91   :  { %694 = vmatmul.bf16.gmra.mxu1 %v1144_v0  ;;  %743 = vmatmul.bf16.gmra.mxu2 %v1148_v1 }
  0x93   :  { %792 = vmatmul.bf16.gmra.mxu3 %v1152_v2  ;;  %1346 = vmatmul.msk.bf16.gmra.mxu0 %vm587_vm0, %v1156_v3 }
  0x9e   :  { %v631_v14 = vpop.f32.mrf.mxu1 }
  0xa0   :  { %v621_v17 = vpop.f32.mrf.mxu0 }
  0xa1   :  { %699 = vmatmul.bf16.gmra.mxu1 %v1164_v12  ;;  %748 = vmatmul.bf16.gmra.mxu2 %v1168_v13 }
  0xa3   :  { %797 = vmatmul.bf16.gmra.mxu3 %v1172_v15  ;;  %1347 = vmatmul.msk.bf16.gmra.mxu0 %vm587_vm0, %v1176_v16 }
  0xa4   :  { %v641_v18 = vpop.f32.mrf.mxu2 }
  0xa6   :  { %v651_v19 = vpop.f32.mrf.mxu3  ;;  %v633_v20 = vpop.f32.mrf.mxu1 }
  0xa8   :  { %v623_v21 = vpop.f32.mrf.mxu0 }
  0xac   :  { %v643_v30 = vpop.f32.mrf.mxu2 }
  0xae   :  { %v653_v31 = vpop.f32.mrf.mxu3  ;;  %v636_v34 = vpop.f32.mrf.mxu1 }
  0xb0   :  { %v626_v37 = vpop.f32.mrf.mxu0 }
  0xb1   :  { %704 = vmatmul.bf16.gmra.mxu1 %v1184_v32  ;;  %753 = vmatmul.bf16.gmra.mxu2 %v1188_v33 }
  0xb3   :  { %802 = vmatmul.bf16.gmra.mxu3 %v1192_v35  ;;  %1348 = vmatmul.msk.bf16.gmra.mxu0 %vm587_vm0, %v1196_v36 }
  0xb4   :  { %v646_v38 = vpop.f32.mrf.mxu2 }
  0xb6   :  { %v656_v39 = vpop.f32.mrf.mxu3  ;;  %v638_v40 = vpop.f32.mrf.mxu1 }
  0xb8   :  { %v628_v41 = vpop.f32.mrf.mxu0 }
  0xbc   :  { %v648_v42 = vpop.f32.mrf.mxu2 }
  0xbe   :  { %v658_v43 = vpop.f32.mrf.mxu3  ;;  %v670_v44 = vpop.f32.mrf.mxu1 }
  0xbf   :  { %v671_v46 = vadd.f32 %v670_v44, %v621_v17 }
  0xc0   :  { %v817_v45 = vpop.f32.mrf.mxu0 }
  0xc4   :  { %v719_v47 = vpop.f32.mrf.mxu2 }
  0xc5   :  { %v720_v48 = vadd.f32 %v719_v47, %v671_v46 }
  0xc6   :  { %v768_v49 = vpop.f32.mrf.mxu3  ;;  %v672_v50 = vpop.f32.mrf.mxu1 }
  0xc7   :  { %v769_v52 = vadd.f32 %v768_v49, %v720_v48  ;;  %v673_v53 = vadd.f32 %v672_v50, %v623_v21 }
  0xc8   :  { %v819_v51 = vpop.f32.mrf.mxu0 }
  0xc9   :  { %v818_v55 = vadd.f32 %v817_v45, %v769_v52 }
  0xcb   :  { %v912_v62 = vadd.f32 %v1496_v56, %v818_v55 }
  0xcc   :  { %v721_v54 = vpop.f32.mrf.mxu2 }
  0xcd   :  { %v722_v57 = vadd.f32 %v721_v54, %v673_v53  ;;  %v928_v3 = vmax.f32 %v912_v62, 0.0 }
  0xce   :  { %v770_v58 = vpop.f32.mrf.mxu3  ;;  %v675_v59 = vpop.f32.mrf.mxu1 }
  0xcf   :  { %v771_v60 = vadd.f32 %v770_v58, %v722_v57  ;;  %v676_v1 = vadd.f32 %v675_v59, %v626_v37 }
  0xd0   :  { %v822_v61 = vpop.f32.mrf.mxu0 }
  0xd1   :  { %v820_v63 = vadd.f32 %v819_v51, %v771_v60 }
  0xd3   :  { %v913_v0 = vadd.f32 %v1496_v56, %v820_v63 }
  0xd4   :  { %v724_v2 = vpop.f32.mrf.mxu2 }
  0xd5   :  { %v929_v4 = vmax.f32 %v913_v0, 0.0  ;;  %v725_v5 = vadd.f32 %v724_v2, %v676_v1 }
  0xd6   :  { %v773_v6 = vpop.f32.mrf.mxu3  ;;  %v677_v7 = vpop.f32.mrf.mxu1 }
  0xd7   :  { %v1428_v8 = vpack.c.bf16 %v929_v4, %v928_v3  ;;  %v774_v10 = vadd.f32 %v773_v6, %v725_v5  ;;  %v678_v11 = vadd.f32 %v677_v7, %v628_v41 }
  0xd8   :  { %v824_v9 = vpop.f32.mrf.mxu0 }
  0xd9   :  { %1429 = vst [vmem:[#allocation3] sm:$0xff] %v1428_v8   ;;  %v823_v13 = vadd.f32 %v822_v61, %v774_v10 }
  0xdb   :  { %v914_v20 = vadd.f32 %v1496_v56, %v823_v13 }
  0xdc   :  { %v726_v12 = vpop.f32.mrf.mxu2 }
  0xdd   :  { %v727_v14 = vadd.f32 %v726_v12, %v678_v11  ;;  %v930_v24 = vmax.f32 %v914_v20, 0.0 }
  0xde   :  { %v775_v15 = vpop.f32.mrf.mxu3  ;;  %v680_v16 = vpop.f32.mrf.mxu1 }
  0xdf   :  { %v776_v17 = vadd.f32 %v775_v15, %v727_v14 }
  0xe0   :  { %v827_v18 = vpop.f32.mrf.mxu0  ;;  %v994_v19 = vld [vmem:[#allocation3] sm:$0xff]  }
  0xe1   :  { %995 = vst [vmem:[%s1885_s3] sm:$0xff] %v994_v19   ;;  %v825_v21 = vadd.f32 %v824_v9, %v776_v17 }
  0xe3   :  { %v915_v22 = vadd.f32 %v1496_v56, %v825_v21 }
  0xe4   :  { %v729_v23 = vpop.f32.mrf.mxu2 }
  0xe5   :  { %v931_v25 = vmax.f32 %v915_v22, 0.0 }
  0xe6   :  { %v778_v26 = vpop.f32.mrf.mxu3  ;;  %v682_v27 = vpop.f32.mrf.mxu1 }
  0xe7   :  { %v1433_v28 = vpack.c.bf16 %v931_v25, %v930_v24 }
  0xe8   :  { %v829_v29 = vpop.f32.mrf.mxu0 }
  0xe9   :  { %1465 = vst [vmem:[#allocation3 + $0x8] sm:$0xff] %v1433_v28  }
  0xec   :  { %v731_v30 = vpop.f32.mrf.mxu2 }
  0xee   :  { %v780_v31 = vpop.f32.mrf.mxu3  ;;  %v685_v32 = vpop.f32.mrf.mxu1 }
  0xf0   :  { %v832_v33 = vpop.f32.mrf.mxu0  ;;  %v998_v34 = vld [vmem:[#allocation3 + $0x8] sm:$0xff]  }
  0xf1   :  { %999 = vst [vmem:[%s1885_s3 + $0x8] sm:$0xff] %v998_v34  }
  0xf4   :  { %v734_v35 = vpop.f32.mrf.mxu2 }
  0xf6   :  { %v783_v36 = vpop.f32.mrf.mxu3  ;;  %v687_v37 = vpop.f32.mrf.mxu1 }
  0xf8   :  { %v834_v38 = vpop.f32.mrf.mxu0 }
  0xfc   :  { %v736_v39 = vpop.f32.mrf.mxu2 }
  0xfe   :  { %v785_v40 = vpop.f32.mrf.mxu3  ;;  %v690_v41 = vpop.f32.mrf.mxu1 }
 0x100   :  { %v837_v42 = vpop.f32.mrf.mxu0 }
 0x104   :  { %v739_v43 = vpop.f32.mrf.mxu2 }
 0x106   :  { %v788_v44 = vpop.f32.mrf.mxu3  ;;  %v692_v45 = vpop.f32.mrf.mxu1 }
 0x108   :  { %v839_v46 = vpop.f32.mrf.mxu0 }
 0x10c   :  { %v741_v47 = vpop.f32.mrf.mxu2 }
 0x10e   :  { %v790_v48 = vpop.f32.mrf.mxu3  ;;  %v695_v49 = vpop.f32.mrf.mxu1 }
 0x110   :  { %v842_v50 = vpop.f32.mrf.mxu0 }
 0x114   :  { %v744_v51 = vpop.f32.mrf.mxu2 }
 0x116   :  { %v793_v52 = vpop.f32.mrf.mxu3  ;;  %v697_v53 = vpop.f32.mrf.mxu1 }
 0x118   :  { %v844_v54 = vpop.f32.mrf.mxu0 }
 0x11c   :  { %v746_v55 = vpop.f32.mrf.mxu2 }
 0x11e   :  { %v795_v56 = vpop.f32.mrf.mxu3  ;;  %v700_v57 = vpop.f32.mrf.mxu1 }
 0x120   :  { %v847_v58 = vpop.f32.mrf.mxu0 }
 0x124   :  { %v749_v59 = vpop.f32.mrf.mxu2 }
 0x126   :  { %v798_v60 = vpop.f32.mrf.mxu3  ;;  %v702_v61 = vpop.f32.mrf.mxu1 }
 0x128   :  { %v849_v62 = vpop.f32.mrf.mxu0 }
 0x12c   :  { %v751_v63 = vpop.f32.mrf.mxu2 }
 0x12e   :  { %v800_v0 = vpop.f32.mrf.mxu3  ;;  %v705_v1 = vpop.f32.mrf.mxu1 }
 0x130   :  { %v852_v4 = vpop.f32.mrf.mxu0 }
 0x134   :  { %v754_v2 = vpop.f32.mrf.mxu2 }
 0x136   :  { %v803_v3 = vpop.f32.mrf.mxu3  ;;  %v707_v5 = vpop.f32.mrf.mxu1 }
 0x138   :  { %v854_v8 = vpop.f32.mrf.mxu0 }
 0x13c   :  { %v756_v6 = vpop.f32.mrf.mxu2 }
 0x13e   :  { %v805_v7 = vpop.f32.mrf.mxu3 }

// kernel: deeplab_forward.13
= control target key start
LH: loop header
LB: loop body
LE: loop exit
PB: predicated region body
PF: predicated region fallthrough
CT: control target
= control target key end

     0   :  { %s636_s0 = inlined_call_operand.vmem [shape: bf16[32,128], index: 0, kind: input, shape index: {}]   ;;  %s637_s1 = inlined_call_operand.vmem [shape: bf16[128,128], index: 1, kind: input, shape index: {}]   ;;  %s638_s2 = inlined_call_operand.vmem [shape: f32[1,128], index: 2, kind: input, shape index: {}]   ;;  %s639_s3 = inlined_call_operand.vmem [shape: bf16[32,128], index: 3, kind: output, shape index: {}]  }
   0x1   :  { %v486_v0 = vld [vmem:[%s637_s1 + $0x38] sm:$0xff]  ;;  %v485_v1 = vld [vmem:[%s637_s1 + $0x30] sm:$0xff]  ;;  %v484_v2 = vld [vmem:[%s637_s1 + $0x28] sm:$0xff] }
   0x2   :  { %178 = vmatpush.bf16.msra.mxu0 %v486_v0  ;;  %534 = vmatpush.bf16.msra.mxu1 %v486_v0  ;;  %v483_v3 = vld [vmem:[%s637_s1 + $0x20] sm:$0xff]  ;;  %v482_v4 = vld [vmem:[%s637_s1 + $0x18] sm:$0xff]  ;;  %v481_v5 = vld [vmem:[%s637_s1 + $0x10] sm:$0xff] }
   0x3   :  { %535 = vmatpush.bf16.msra.mxu2 %v486_v0  ;;  %536 = vmatpush.bf16.msra.mxu3 %v486_v0  ;;  %v480_v6 = vld [vmem:[%s637_s1 + $0x8] sm:$0xff]  ;;  %v479_v7 = vld [vmem:[%s637_s1] sm:$0xff]  ;;  %v473_v9 = vld [vmem:[%s636_s0 + $0x10] sm:$0xff] }
   0x4   :  { %v471_v8 = vld [vmem:[%s636_s0] sm:$0xff]  ;;  %v477_v11 = vld [vmem:[%s636_s0 + $0x30] sm:$0xff]  ;;  %v472_v12 = vld [vmem:[%s636_s0 + $0x8] sm:$0xff] }
   0x5   :  { %v475_v10 = vld [vmem:[%s636_s0 + $0x20] sm:$0xff]  ;;  %v474_v13 = vld [vmem:[%s636_s0 + $0x18] sm:$0xff]  ;;  %v476_v14 = vld [vmem:[%s636_s0 + $0x28] sm:$0xff] }
   0x6   :  { %179 = vmatpush.bf16.msra.mxu0 %v485_v1  ;;  %537 = vmatpush.bf16.msra.mxu1 %v485_v1  ;;  %v478_v15 = vld [vmem:[%s636_s0 + $0x38] sm:$0xff]  ;;  %v558_v18 = vld [vmem:[%s638_s2] ss:$0 sm:$0xff] }
   0x7   :  { %538 = vmatpush.bf16.msra.mxu2 %v485_v1  ;;  %539 = vmatpush.bf16.msra.mxu3 %v485_v1 }
   0xa   :  { %180 = vmatpush.bf16.msra.mxu0 %v484_v2  ;;  %540 = vmatpush.bf16.msra.mxu1 %v484_v2 }
   0xb   :  { %541 = vmatpush.bf16.msra.mxu2 %v484_v2  ;;  %542 = vmatpush.bf16.msra.mxu3 %v484_v2 }
   0xe   :  { %181 = vmatpush.bf16.msra.mxu0 %v483_v3  ;;  %543 = vmatpush.bf16.msra.mxu1 %v483_v3 }
   0xf   :  { %544 = vmatpush.bf16.msra.mxu2 %v483_v3  ;;  %545 = vmatpush.bf16.msra.mxu3 %v483_v3 }
  0x12   :  { %182 = vmatpush.bf16.msra.mxu0 %v482_v4  ;;  %546 = vmatpush.bf16.msra.mxu1 %v482_v4 }
  0x13   :  { %547 = vmatpush.bf16.msra.mxu2 %v482_v4  ;;  %548 = vmatpush.bf16.msra.mxu3 %v482_v4 }
  0x16   :  { %183 = vmatpush.bf16.msra.mxu0 %v481_v5  ;;  %549 = vmatpush.bf16.msra.mxu1 %v481_v5 }
  0x17   :  { %550 = vmatpush.bf16.msra.mxu2 %v481_v5  ;;  %551 = vmatpush.bf16.msra.mxu3 %v481_v5 }
  0x1a   :  { %184 = vmatpush.bf16.msra.mxu0 %v480_v6  ;;  %552 = vmatpush.bf16.msra.mxu1 %v480_v6 }
  0x1b   :  { %553 = vmatpush.bf16.msra.mxu2 %v480_v6  ;;  %554 = vmatpush.bf16.msra.mxu3 %v480_v6 }
  0x1e   :  { %185 = vmatpush.bf16.msra.mxu0 %v479_v7  ;;  %555 = vmatpush.bf16.msra.mxu1 %v479_v7 }
  0x1f   :  { %556 = vmatpush.bf16.msra.mxu2 %v479_v7  ;;  %557 = vmatpush.bf16.msra.mxu3 %v479_v7 }
  0x21   :  { %186 = vmatmul.bf16.vlgmr.msra.gmra.mxu0 %v471_v8  ;;  %196 = vmatmul.bf16.vlgmr.msra.gmra.mxu1 %v473_v9 }
  0x22   :  { %206 = vmatmul.bf16.vlgmr.msra.gmra.mxu2 %v475_v10  ;;  %216 = vmatmul.bf16.vlgmr.msra.gmra.mxu3 %v477_v11 }
  0x31   :  { %191 = vmatmul.bf16.gmra.mxu0 %v472_v12  ;;  %201 = vmatmul.bf16.gmra.mxu1 %v474_v13 }
  0x32   :  { %211 = vmatmul.bf16.gmra.mxu2 %v476_v14  ;;  %221 = vmatmul.bf16.gmra.mxu3 %v478_v15 }
  0x9e   :  { %v187_v16 = vpop.f32.mrf.mxu0  ;;  %v197_v17 = vpop.f32.mrf.mxu1 }
  0x9f   :  { %v282_v19 = vadd.f32 %v558_v18, %v187_v16 }
  0xa1   :  { %v298_v25 = vmax.f32 %v282_v19, 0.0 }
  0xa5   :  { %v207_v20 = vpop.f32.mrf.mxu2  ;;  %v217_v21 = vpop.f32.mrf.mxu3 }
  0xa6   :  { %v189_v22 = vpop.f32.mrf.mxu0  ;;  %v199_v23 = vpop.f32.mrf.mxu1 }
  0xa7   :  { %v283_v24 = vadd.f32 %v558_v18, %v189_v22 }
  0xa9   :  { %v299_v26 = vmax.f32 %v283_v24, 0.0 }
  0xab   :  { %v490_v27 = vpack.c.bf16 %v299_v26, %v298_v25 }
  0xad   :  { %491 = vst [vmem:[#allocation3] sm:$0xff] %v490_v27   ;;  %v209_v28 = vpop.f32.mrf.mxu2  ;;  %v219_v29 = vpop.f32.mrf.mxu3 }
  0xae   :  { %v192_v30 = vpop.f32.mrf.mxu0  ;;  %v202_v31 = vpop.f32.mrf.mxu1 }
  0xaf   :  { %v284_v33 = vadd.f32 %v558_v18, %v192_v30 }
  0xb1   :  { %v300_v39 = vmax.f32 %v284_v33, 0.0 }
  0xb4   :  { %v364_v32 = vld [vmem:[#allocation3] sm:$0xff]  }
  0xb5   :  { %365 = vst [vmem:[%s639_s3] sm:$0xff] %v364_v32   ;;  %v212_v34 = vpop.f32.mrf.mxu2  ;;  %v222_v35 = vpop.f32.mrf.mxu3 }
  0xb6   :  { %v194_v36 = vpop.f32.mrf.mxu0  ;;  %v204_v37 = vpop.f32.mrf.mxu1 }
  0xb7   :  { %v285_v38 = vadd.f32 %v558_v18, %v194_v36 }
  0xb9   :  { %v301_v40 = vmax.f32 %v285_v38, 0.0 }
  0xbb   :  { %v495_v41 = vpack.c.bf16 %v301_v40, %v300_v39 }
  0xbd   :  { %527 = vst [vmem:[#allocation3 + $0x8] sm:$0xff] %v495_v41   ;;  %v214_v42 = vpop.f32.mrf.mxu2  ;;  %v224_v43 = vpop.f32.mrf.mxu3 }
  0xc4   :  { %v368_v44 = vld [vmem:[#allocation3 + $0x8] sm:$0xff]  }
  0xc5   :  { %369 = vst [vmem:[%s639_s3 + $0x8] sm:$0xff] %v368_v44  }

// kernel: deeplab_forward.14
= control target key start
LH: loop header
LB: loop body
LE: loop exit
PB: predicated region body
PF: predicated region fallthrough
CT: control target
= control target key end

     0   :  { %vm18_vm0 = vcmask 523264   ;;  %v516_v6 = vmov 0.0   ;;  %vm332_vm1 = vcmask 519168   ;;  %s642_s0 = inlined_call_operand.vmem [shape: bf16[32,128], index: 0, kind: input, shape index: {}]   ;;  %s643_s1 = inlined_call_operand.vmem [shape: bf16[128,64], index: 1, kind: input, shape index: {}]   ;;  %s644_s2 = inlined_call_operand.vmem [shape: f32[1,64], index: 2, kind: input, shape index: {}]   ;;  %s645_s3 = inlined_call_operand.vmem [shape: bf16[32,64], index: 3, kind: output, shape index: {}]  }
   0x1   :  { %v489_v0 = vld [vmem:[%s643_s1 + $0x38] sm:$0xff]  ;;  %v488_v1 = vld [vmem:[%s643_s1 + $0x30] sm:$0xff]  ;;  %v487_v2 = vld [vmem:[%s643_s1 + $0x28] sm:$0xff]  ;;  %19 = vst.msk [vmem:[#allocation2] sm:$0xff] %vm18_vm0, %v516_v6 }
   0x2   :  { %179 = vmatpush.bf16.msra.mxu0 %v489_v0  ;;  %490 = vmatpush.bf16.msra.mxu1 %v489_v0  ;;  %v486_v3 = vld [vmem:[%s643_s1 + $0x20] sm:$0xff]  ;;  %v485_v4 = vld [vmem:[%s643_s1 + $0x18] sm:$0xff]  ;;  %v484_v5 = vld [vmem:[%s643_s1 + $0x10] sm:$0xff]  ;;  %20 = vst.msk [vmem:[#allocation2 + $0x8] sm:$0xff] %vm18_vm0, %v516_v6 }
   0x3   :  { %491 = vmatpush.bf16.msra.mxu2 %v489_v0  ;;  %492 = vmatpush.bf16.msra.mxu3 %v489_v0  ;;  %21 = vst.msk [vmem:[#allocation2 + $0x10] sm:$0xff] %vm18_vm0, %v516_v6  ;;  %v483_v7 = vld [vmem:[%s643_s1 + $0x8] sm:$0xff]  ;;  %v482_v8 = vld [vmem:[%s643_s1] sm:$0xff]  ;;  %v476_v10 = vld [vmem:[%s642_s0 + $0x10] sm:$0xff] }
   0x4   :  { %22 = vst.msk [vmem:[#allocation2 + $0x18] sm:$0xff] %vm18_vm0, %v516_v6  ;;  %v474_v9 = vld [vmem:[%s642_s0] sm:$0xff]  ;;  %v480_v12 = vld [vmem:[%s642_s0 + $0x30] sm:$0xff]  ;;  %v475_v13 = vld [vmem:[%s642_s0 + $0x8] sm:$0xff] }
   0x5   :  { %23 = vst.msk [vmem:[#allocation2 + $0x20] sm:$0xff] %vm18_vm0, %v516_v6  ;;  %v478_v11 = vld [vmem:[%s642_s0 + $0x20] sm:$0xff]  ;;  %v477_v14 = vld [vmem:[%s642_s0 + $0x18] sm:$0xff]  ;;  %v479_v15 = vld [vmem:[%s642_s0 + $0x28] sm:$0xff] }
   0x6   :  { %180 = vmatpush.bf16.msra.mxu0 %v488_v1  ;;  %493 = vmatpush.bf16.msra.mxu1 %v488_v1  ;;  %24 = vst.msk [vmem:[#allocation2 + $0x28] sm:$0xff] %vm18_vm0, %v516_v6  ;;  %v481_v16 = vld [vmem:[%s642_s0 + $0x38] sm:$0xff]  ;;  %v606_v27 = vld [vmem:[%s644_s2] ss:$0 sm:$0xff] }
   0x7   :  { %494 = vmatpush.bf16.msra.mxu2 %v488_v1  ;;  %495 = vmatpush.bf16.msra.mxu3 %v488_v1  ;;  %25 = vst.msk [vmem:[#allocation2 + $0x30] sm:$0xff] %vm18_vm0, %v516_v6 }
   0x8   :  { %26 = vst.msk [vmem:[#allocation2 + $0x38] sm:$0xff] %vm18_vm0, %v516_v6  ;;  %v35_v17 = vld [vmem:[#allocation2] sm:$0xff] }
   0x9   :  { %27 = vst.msk [vmem:[#allocation2 + $0x40] sm:$0xff] %vm18_vm0, %v516_v6  ;;  %v36_v25 = vld [vmem:[#allocation2 + $0x8] sm:$0xff] }
   0xa   :  { %181 = vmatpush.bf16.msra.mxu0 %v487_v2  ;;  %496 = vmatpush.bf16.msra.mxu1 %v487_v2  ;;  %28 = vst.msk [vmem:[#allocation2 + $0x48] sm:$0xff] %vm18_vm0, %v516_v6  ;;  %v37_v41 = vld [vmem:[#allocation2 + $0x10] sm:$0xff] }
   0xb   :  { %497 = vmatpush.bf16.msra.mxu2 %v487_v2  ;;  %498 = vmatpush.bf16.msra.mxu3 %v487_v2  ;;  %29 = vst.msk [vmem:[#allocation2 + $0x50] sm:$0xff] %vm18_vm0, %v516_v6  ;;  %v38_v61 = vld [vmem:[#allocation2 + $0x18] sm:$0xff] }
   0xc   :  { %30 = vst.msk [vmem:[#allocation2 + $0x58] sm:$0xff] %vm18_vm0, %v516_v6  ;;  %v39_v18 = vld [vmem:[#allocation2 + $0x20] sm:$0xff] }
   0xd   :  { %31 = vst.msk [vmem:[#allocation2 + $0x60] sm:$0xff] %vm18_vm0, %v516_v6  ;;  %v40_v26 = vld [vmem:[#allocation2 + $0x28] sm:$0xff] }
   0xe   :  { %182 = vmatpush.bf16.msra.mxu0 %v486_v3  ;;  %499 = vmatpush.bf16.msra.mxu1 %v486_v3  ;;  %32 = vst.msk [vmem:[#allocation2 + $0x68] sm:$0xff] %vm18_vm0, %v516_v6  ;;  %v41_v45 = vld [vmem:[#allocation2 + $0x30] sm:$0xff] }
   0xf   :  { %500 = vmatpush.bf16.msra.mxu2 %v486_v3  ;;  %501 = vmatpush.bf16.msra.mxu3 %v486_v3  ;;  %33 = vst.msk [vmem:[#allocation2 + $0x70] sm:$0xff] %vm18_vm0, %v516_v6  ;;  %v42_v0 = vld [vmem:[#allocation2 + $0x38] sm:$0xff] }
  0x10   :  { %34 = vst.msk [vmem:[#allocation2 + $0x78] sm:$0xff] %vm18_vm0, %v516_v6  ;;  %v43_v23 = vld [vmem:[#allocation2 + $0x40] sm:$0xff] }
  0x11   :  { %v44_v39 = vld [vmem:[#allocation2 + $0x48] sm:$0xff] }
  0x12   :  { %183 = vmatpush.bf16.msra.mxu0 %v485_v4  ;;  %502 = vmatpush.bf16.msra.mxu1 %v485_v4  ;;  %v45_v55 = vld [vmem:[#allocation2 + $0x50] sm:$0xff] }
  0x13   :  { %503 = vmatpush.bf16.msra.mxu2 %v485_v4  ;;  %504 = vmatpush.bf16.msra.mxu3 %v485_v4 }
  0x14   :  { %v47_v24 = vld [vmem:[#allocation2 + $0x60] sm:$0xff] }
  0x15   :  { %v48_v40 = vld [vmem:[#allocation2 + $0x68] sm:$0xff] }
  0x16   :  { %184 = vmatpush.bf16.msra.mxu0 %v484_v5  ;;  %505 = vmatpush.bf16.msra.mxu1 %v484_v5  ;;  %v49_v57 = vld [vmem:[#allocation2 + $0x70] sm:$0xff] }
  0x17   :  { %506 = vmatpush.bf16.msra.mxu2 %v484_v5  ;;  %507 = vmatpush.bf16.msra.mxu3 %v484_v5 }
  0x1a   :  { %185 = vmatpush.bf16.msra.mxu0 %v483_v7  ;;  %508 = vmatpush.bf16.msra.mxu1 %v483_v7 }
  0x1b   :  { %509 = vmatpush.bf16.msra.mxu2 %v483_v7  ;;  %510 = vmatpush.bf16.msra.mxu3 %v483_v7 }
  0x1e   :  { %186 = vmatpush.bf16.msra.mxu0 %v482_v8  ;;  %511 = vmatpush.bf16.msra.mxu1 %v482_v8 }
  0x1f   :  { %512 = vmatpush.bf16.msra.mxu2 %v482_v8  ;;  %513 = vmatpush.bf16.msra.mxu3 %v482_v8  ;;  %v46_v8 = vld [vmem:[#allocation2 + $0x58] sm:$0xff] }
  0x21   :  { %187 = vmatmul.bf16.vlgmr.msra.gmra.mxu0 %v474_v9  ;;  %197 = vmatmul.bf16.vlgmr.msra.gmra.mxu1 %v476_v10  ;;  %v50_v10 = vld [vmem:[#allocation2 + $0x78] sm:$0xff] }
  0x22   :  { %207 = vmatmul.bf16.vlgmr.msra.gmra.mxu2 %v478_v11  ;;  %217 = vmatmul.bf16.vlgmr.msra.gmra.mxu3 %v480_v12 }
  0x31   :  { %192 = vmatmul.bf16.gmra.mxu0 %v475_v13  ;;  %202 = vmatmul.bf16.gmra.mxu1 %v477_v14 }
  0x32   :  { %212 = vmatmul.bf16.gmra.mxu2 %v479_v15  ;;  %222 = vmatmul.bf16.gmra.mxu3 %v481_v16 }
  0x9e   :  { %v188_v19 = vpop.f32.mrf.mxu0  ;;  %v198_v20 = vpop.f32.mrf.mxu1 }
  0x9f   :  { %v228_v21 = vadd.f32 %v188_v19, %v35_v17  ;;  %v232_v22 = vadd.f32 %v198_v20, %v39_v18 }
  0xa1   :  { %245 = vst.msk [vmem:[#allocation2] sm:$0xff] %vm18_vm0, %v228_v21 }
  0xa2   :  { %249 = vst.msk [vmem:[#allocation2 + $0x20] sm:$0xff] %vm18_vm0, %v232_v22 }
  0xa5   :  { %v208_v28 = vpop.f32.mrf.mxu2  ;;  %v218_v29 = vpop.f32.mrf.mxu3 }
  0xa6   :  { %v236_v30 = vadd.f32 %v208_v28, %v43_v23  ;;  %v240_v31 = vadd.f32 %v218_v29, %v47_v24  ;;  %v190_v32 = vpop.f32.mrf.mxu0  ;;  %v200_v33 = vpop.f32.mrf.mxu1 }
  0xa7   :  { %v229_v34 = vadd.f32 %v190_v32, %v36_v25  ;;  %v233_v35 = vadd.f32 %v200_v33, %v40_v26 }
  0xa8   :  { %v264_v36 = vld [vmem:[#allocation2] sm:$0xff]  ;;  %253 = vst.msk [vmem:[#allocation2 + $0x40] sm:$0xff] %vm18_vm0, %v236_v30 }
  0xa9   :  { %v284_v37 = vadd.f32 %v606_v27, %v264_v36  ;;  %257 = vst.msk [vmem:[#allocation2 + $0x60] sm:$0xff] %vm18_vm0, %v240_v31 }
  0xaa   :  { %246 = vst.msk [vmem:[#allocation2 + $0x8] sm:$0xff] %vm18_vm0, %v229_v34 }
  0xab   :  { %v300_v38 = vmax.f32 %v284_v37, 0.0  ;;  %250 = vst.msk [vmem:[#allocation2 + $0x28] sm:$0xff] %vm18_vm0, %v233_v35 }
  0xad   :  { %v316_v42 = vpack.c.bf16 %v300_v38, %v300_v38  ;;  %v210_v43 = vpop.f32.mrf.mxu2  ;;  %v220_v44 = vpop.f32.mrf.mxu3 }
  0xae   :  { %v237_v46 = vadd.f32 %v210_v43, %v44_v39  ;;  %v241_v47 = vadd.f32 %v220_v44, %v48_v40  ;;  %v193_v48 = vpop.f32.mrf.mxu0  ;;  %v203_v49 = vpop.f32.mrf.mxu1 }
  0xaf   :  { %333 = vst.msk [vmem:[#allocation3] sm:$0xf] %vm332_vm1, %v316_v42  ;;  %v230_v50 = vadd.f32 %v193_v48, %v37_v41  ;;  %v234_v51 = vadd.f32 %v203_v49, %v41_v45 }
  0xb0   :  { %254 = vst.msk [vmem:[#allocation2 + $0x48] sm:$0xff] %vm18_vm0, %v237_v46 }
  0xb1   :  { %v265_v52 = vld [vmem:[#allocation2 + $0x8] sm:$0xff]  ;;  %258 = vst.msk [vmem:[#allocation2 + $0x68] sm:$0xff] %vm18_vm0, %v241_v47 }
  0xb2   :  { %v285_v53 = vadd.f32 %v606_v27, %v265_v52  ;;  %247 = vst.msk [vmem:[#allocation2 + $0x10] sm:$0xff] %vm18_vm0, %v230_v50 }
  0xb3   :  { %251 = vst.msk [vmem:[#allocation2 + $0x30] sm:$0xff] %vm18_vm0, %v234_v51 }
  0xb4   :  { %v301_v54 = vmax.f32 %v285_v53, 0.0 }
  0xb5   :  { %v213_v56 = vpop.f32.mrf.mxu2  ;;  %v223_v58 = vpop.f32.mrf.mxu3 }
  0xb6   :  { %v367_v59 = vld [vmem:[#allocation3] sm:$0xf]  ;;  %v317_v60 = vpack.c.bf16 %v301_v54, %v301_v54  ;;  %v195_v62 = vpop.f32.mrf.mxu0  ;;  %v238_v63 = vadd.f32 %v213_v56, %v45_v55  ;;  %v205_v1 = vpop.f32.mrf.mxu1  ;;  %v242_v2 = vadd.f32 %v223_v58, %v49_v57 }
  0xb7   :  { %368 = vst [vmem:[%s645_s3] sm:$0xf] %v367_v59  ;;  %v231_v3 = vadd.f32 %v195_v62, %v38_v61  ;;  %v235_v5 = vadd.f32 %v205_v1, %v42_v0 }
  0xb8   :  { %334 = vst.msk [vmem:[#allocation3 + $0x4] sm:$0xf] %vm332_vm1, %v317_v60 }
  0xb9   :  { %v266_v4 = vld [vmem:[#allocation2 + $0x10] sm:$0xff]  ;;  %255 = vst.msk [vmem:[#allocation2 + $0x50] sm:$0xff] %vm18_vm0, %v238_v63 }
  0xba   :  { %v286_v6 = vadd.f32 %v606_v27, %v266_v4  ;;  %259 = vst.msk [vmem:[#allocation2 + $0x70] sm:$0xff] %vm18_vm0, %v242_v2 }
  0xbb   :  { %248 = vst.msk [vmem:[#allocation2 + $0x18] sm:$0xff] %vm18_vm0, %v231_v3 }
  0xbc   :  { %v302_v7 = vmax.f32 %v286_v6, 0.0  ;;  %252 = vst.msk [vmem:[#allocation2 + $0x38] sm:$0xff] %vm18_vm0, %v235_v5 }
  0xbd   :  { %v215_v9 = vpop.f32.mrf.mxu2  ;;  %v225_v11 = vpop.f32.mrf.mxu3 }
  0xbe   :  { %v318_v12 = vpack.c.bf16 %v302_v7, %v302_v7  ;;  %v239_v14 = vadd.f32 %v215_v9, %v46_v8  ;;  %v243_v15 = vadd.f32 %v225_v11, %v50_v10 }
  0xbf   :  { %v369_v13 = vld [vmem:[#allocation3 + $0x4] sm:$0xf] }
  0xc0   :  { %370 = vst [vmem:[%s645_s3 + $0x4] sm:$0xf] %v369_v13 }
  0xc1   :  { %335 = vst.msk [vmem:[#allocation3 + $0x8] sm:$0xf] %vm332_vm1, %v318_v12 }
  0xc2   :  { %v267_v16 = vld [vmem:[#allocation2 + $0x18] sm:$0xff]  ;;  %256 = vst.msk [vmem:[#allocation2 + $0x58] sm:$0xff] %vm18_vm0, %v239_v14 }
  0xc3   :  { %v287_v17 = vadd.f32 %v606_v27, %v267_v16  ;;  %260 = vst.msk [vmem:[#allocation2 + $0x78] sm:$0xff] %vm18_vm0, %v243_v15 }
  0xc5   :  { %v303_v18 = vmax.f32 %v287_v17, 0.0 }
  0xc7   :  { %v319_v20 = vpack.c.bf16 %v303_v18, %v303_v18 }
  0xc8   :  { %v371_v19 = vld [vmem:[#allocation3 + $0x8] sm:$0xf] }
  0xc9   :  { %372 = vst [vmem:[%s645_s3 + $0x8] sm:$0xf] %v371_v19 }
  0xca   :  { %336 = vst.msk [vmem:[#allocation3 + $0xc] sm:$0xf] %vm332_vm1, %v319_v20 }
  0xd1   :  { %v373_v21 = vld [vmem:[#allocation3 + $0xc] sm:$0xf] }
  0xd2   :  { %374 = vst [vmem:[%s645_s3 + $0xc] sm:$0xf] %v373_v21 }

// kernel: deeplab_forward.15
= control target key start
LH: loop header
LB: loop body
LE: loop exit
PB: predicated region body
PF: predicated region fallthrough
CT: control target
= control target key end

     0   :  { %vm18_vm0 = vcmask 523264   ;;  %vm1620_vm1 = vcmask 519168   ;;  %s3248_s0 = inlined_call_operand.vmem [shape: bf16[32,1152], index: 0, kind: input, shape index: {}]   ;;  %s3249_s1 = inlined_call_operand.vmem [shape: bf16[1152,64], index: 1, kind: input, shape index: {}]   ;;  %s3250_s2 = inlined_call_operand.vmem [shape: f32[1,64], index: 2, kind: input, shape index: {}]   ;;  %s3251_s3 = inlined_call_operand.vmem [shape: bf16[32,64], index: 3, kind: output, shape index: {}]  }
   0x1   :  { %v2353_v0 = vld [vmem:[%s3249_s1 + $0x38] sm:$0xff]  ;;  %v2352_v1 = vld [vmem:[%s3249_s1 + $0x30] sm:$0xff]  ;;  %v2351_v2 = vld [vmem:[%s3249_s1 + $0x28] sm:$0xff] }
   0x2   :  { %2418 = vmatpush.bf16.msra.mxu1 %v2353_v0  ;;  %2419 = vmatpush.bf16.msra.mxu2 %v2353_v0  ;;  %v2350_v3 = vld [vmem:[%s3249_s1 + $0x20] sm:$0xff]  ;;  %v2349_v4 = vld [vmem:[%s3249_s1 + $0x18] sm:$0xff]  ;;  %v2348_v5 = vld [vmem:[%s3249_s1 + $0x10] sm:$0xff] }
   0x3   :  { %2420 = vmatpush.bf16.msra.mxu3 %v2353_v0  ;;  %1075 = vmatpush.bf16.msra.mxu0 %v2353_v0  ;;  %v2347_v6 = vld [vmem:[%s3249_s1 + $0x8] sm:$0xff]  ;;  %v2346_v7 = vld [vmem:[%s3249_s1] sm:$0xff]  ;;  %v1772_v8 = vld [vmem:[%s3248_s0 + $0x90] sm:$0xf] }
   0x4   :  { %v2296_v9 = vld [vmem:[%s3248_s0 + $0xb0] sm:$0xf0]  ;;  %v1844_v10 = vld [vmem:[%s3248_s0 + $0x120] sm:$0xf]  ;;  %v2314_v11 = vld [vmem:[%s3248_s0 + $0x140] sm:$0xf0] }
   0x5   :  { %v1916_v12 = vld [vmem:[%s3248_s0 + $0x1b0] sm:$0xf]  ;;  %v2332_v13 = vld [vmem:[%s3248_s0 + $0x1d0] sm:$0xf0]  ;;  %v1700_v14 = vld [vmem:[%s3248_s0] sm:$0xf]  ;;  %v1773_v18 = vor.u32 %v2296_v9, %v1772_v8  ;;  %v1845_v19 = vor.u32 %v2314_v11, %v1844_v10 }
   0x6   :  { %2421 = vmatpush.bf16.msra.mxu1 %v2352_v1  ;;  %2422 = vmatpush.bf16.msra.mxu2 %v2352_v1  ;;  %v2278_v15 = vld [vmem:[%s3248_s0 + $0x20] sm:$0xf0]  ;;  %v2369_v16 = vld [vmem:[%s3249_s1 + $0xb8] sm:$0xff]  ;;  %v1917_v20 = vor.u32 %v2332_v13, %v1916_v12  ;;  %v2368_v24 = vld [vmem:[%s3249_s1 + $0xb0] sm:$0xff] }
   0x7   :  { %2423 = vmatpush.bf16.msra.mxu3 %v2352_v1  ;;  %1076 = vmatpush.bf16.msra.mxu0 %v2352_v1  ;;  %v2361_v17 = vld [vmem:[%s3249_s1 + $0x78] sm:$0xff]  ;;  %v1701_v21 = vor.u32 %v2278_v15, %v1700_v14  ;;  %v2360_v25 = vld [vmem:[%s3249_s1 + $0x70] sm:$0xff]  ;;  %v2367_v28 = vld [vmem:[%s3249_s1 + $0xa8] sm:$0xff] }
   0x8   :  { %v2377_v22 = vld [vmem:[%s3249_s1 + $0xf8] sm:$0xff]  ;;  %v2376_v26 = vld [vmem:[%s3249_s1 + $0xf0] sm:$0xff]  ;;  %v2359_v29 = vld [vmem:[%s3249_s1 + $0x68] sm:$0xff] }
   0x9   :  { %v2385_v23 = vld [vmem:[%s3249_s1 + $0x138] sm:$0xff]  ;;  %v2384_v27 = vld [vmem:[%s3249_s1 + $0x130] sm:$0xff]  ;;  %v2375_v30 = vld [vmem:[%s3249_s1 + $0xe8] sm:$0xff] }
   0xa   :  { %2424 = vmatpush.bf16.msra.mxu1 %v2351_v2  ;;  %2425 = vmatpush.bf16.msra.mxu2 %v2351_v2  ;;  %v2383_v31 = vld [vmem:[%s3249_s1 + $0x128] sm:$0xff]  ;;  %v2366_v32 = vld [vmem:[%s3249_s1 + $0xa0] sm:$0xff]  ;;  %v1808_v36 = vld [vmem:[%s3248_s0 + $0xd8] sm:$0xf] }
   0xb   :  { %2426 = vmatpush.bf16.msra.mxu3 %v2351_v2  ;;  %1077 = vmatpush.bf16.msra.mxu0 %v2351_v2  ;;  %v2358_v33 = vld [vmem:[%s3249_s1 + $0x60] sm:$0xff]  ;;  %v2305_v37 = vld [vmem:[%s3248_s0 + $0xf8] sm:$0xf0]  ;;  %v1880_v38 = vld [vmem:[%s3248_s0 + $0x168] sm:$0xf] }
   0xc   :  { %v2374_v34 = vld [vmem:[%s3249_s1 + $0xe0] sm:$0xff]  ;;  %v2323_v39 = vld [vmem:[%s3248_s0 + $0x188] sm:$0xf0]  ;;  %v1952_v40 = vld [vmem:[%s3248_s0 + $0x1f8] sm:$0xf]  ;;  %v1809_v46 = vor.u32 %v2305_v37, %v1808_v36 }
   0xd   :  { %v2382_v35 = vld [vmem:[%s3249_s1 + $0x120] sm:$0xff]  ;;  %v2341_v41 = vld [vmem:[%s3248_s0 + $0x218] sm:$0xf0]  ;;  %v1736_v42 = vld [vmem:[%s3248_s0 + $0x48] sm:$0xf]  ;;  %v1881_v47 = vor.u32 %v2323_v39, %v1880_v38 }
   0xe   :  { %2427 = vmatpush.bf16.msra.mxu1 %v2350_v3  ;;  %2428 = vmatpush.bf16.msra.mxu2 %v2350_v3  ;;  %v2287_v43 = vld [vmem:[%s3248_s0 + $0x68] sm:$0xf0]  ;;  %v2365_v44 = vld [vmem:[%s3249_s1 + $0x98] sm:$0xff]  ;;  %v1953_v48 = vor.u32 %v2341_v41, %v1952_v40  ;;  %v2364_v52 = vld [vmem:[%s3249_s1 + $0x90] sm:$0xff] }
   0xf   :  { %2429 = vmatpush.bf16.msra.mxu3 %v2350_v3  ;;  %1078 = vmatpush.bf16.msra.mxu0 %v2350_v3  ;;  %v2357_v45 = vld [vmem:[%s3249_s1 + $0x58] sm:$0xff]  ;;  %v1737_v49 = vor.u32 %v2287_v43, %v1736_v42  ;;  %v2356_v53 = vld [vmem:[%s3249_s1 + $0x50] sm:$0xff]  ;;  %v2363_v56 = vld [vmem:[%s3249_s1 + $0x88] sm:$0xff] }
  0x10   :  { %v2373_v50 = vld [vmem:[%s3249_s1 + $0xd8] sm:$0xff]  ;;  %v2372_v54 = vld [vmem:[%s3249_s1 + $0xd0] sm:$0xff]  ;;  %v2355_v57 = vld [vmem:[%s3249_s1 + $0x48] sm:$0xff] }
  0x11   :  { %v2381_v51 = vld [vmem:[%s3249_s1 + $0x118] sm:$0xff]  ;;  %v2380_v55 = vld [vmem:[%s3249_s1 + $0x110] sm:$0xff]  ;;  %v2371_v58 = vld [vmem:[%s3249_s1 + $0xc8] sm:$0xff] }
  0x12   :  { %2430 = vmatpush.bf16.msra.mxu1 %v2349_v4  ;;  %2431 = vmatpush.bf16.msra.mxu2 %v2349_v4  ;;  %v2379_v59 = vld [vmem:[%s3249_s1 + $0x108] sm:$0xff]  ;;  %v2362_v60 = vld [vmem:[%s3249_s1 + $0x80] sm:$0xff]  ;;  %v2401_v2 = vld [vmem:[%s3249_s1 + $0x1b8] sm:$0xff] }
  0x13   :  { %2432 = vmatpush.bf16.msra.mxu3 %v2349_v4  ;;  %1079 = vmatpush.bf16.msra.mxu0 %v2349_v4  ;;  %v2354_v61 = vld [vmem:[%s3249_s1 + $0x40] sm:$0xff]  ;;  %v1702_v1 = vld [vmem:[%s3248_s0 + $0x24] sm:$0xf0]  ;;  %v2393_v3 = vld [vmem:[%s3249_s1 + $0x178] sm:$0xff] }
  0x14   :  { %v2274_v62 = vld [vmem:[%s3248_s0 + $0x4] sm:$0xf]  ;;  %v1708_v4 = vld [vmem:[%s3248_s0 + $0x8] sm:$0xf]  ;;  %v1716_v8 = vld [vmem:[%s3248_s0 + $0x10] sm:$0xf] }
  0x15   :  { %v2370_v63 = vld [vmem:[%s3249_s1 + $0xc0] sm:$0xff]  ;;  %v2280_v9 = vld [vmem:[%s3248_s0 + $0x30] sm:$0xf0]  ;;  %v2409_v10 = vld [vmem:[%s3249_s1 + $0x1f8] sm:$0xff]  ;;  %v1705_v12 = vor.u32 %v2274_v62, %v1702_v1 }
  0x16   :  { %2433 = vmatpush.bf16.msra.mxu1 %v2348_v5  ;;  %2434 = vmatpush.bf16.msra.mxu2 %v2348_v5  ;;  %v2378_v0 = vld [vmem:[%s3249_s1 + $0x100] sm:$0xff]  ;;  %v2417_v11 = vld [vmem:[%s3249_s1 + $0x238] sm:$0xff]  ;;  %v1717_v15 = vor.u32 %v2280_v9, %v1716_v8  ;;  %v2292_v40 = vld [vmem:[%s3248_s0 + $0x94] sm:$0xf] }
  0x17   :  { %2435 = vmatpush.bf16.msra.mxu3 %v2348_v5  ;;  %1080 = vmatpush.bf16.msra.mxu0 %v2348_v5  ;;  %v2279_v5 = vld [vmem:[%s3248_s0 + $0x28] sm:$0xf0]  ;;  %v2398_v36 = vld [vmem:[%s3249_s1 + $0x1a0] sm:$0xff]  ;;  %v1774_v41 = vld [vmem:[%s3248_s0 + $0xb4] sm:$0xf0] }
  0x18   :  { %v1709_v13 = vor.u32 %v2279_v5, %v1708_v4  ;;  %v2406_v37 = vld [vmem:[%s3249_s1 + $0x1e0] sm:$0xff]  ;;  %v1780_v42 = vld [vmem:[%s3248_s0 + $0x98] sm:$0xf]  ;;  %v2297_v43 = vld [vmem:[%s3248_s0 + $0xb8] sm:$0xf0] }
  0x19   :  { %v2390_v38 = vld [vmem:[%s3249_s1 + $0x160] sm:$0xff]  ;;  %v1824_v62 = vld [vmem:[%s3248_s0 + $0xe8] sm:$0xf]  ;;  %v2396_v4 = vld [vmem:[%s3249_s1 + $0x190] sm:$0xff] }
  0x1a   :  { %2436 = vmatpush.bf16.msra.mxu1 %v2347_v6  ;;  %2437 = vmatpush.bf16.msra.mxu2 %v2347_v6  ;;  %v2414_v39 = vld [vmem:[%s3249_s1 + $0x220] sm:$0xff]  ;;  %v2404_v5 = vld [vmem:[%s3249_s1 + $0x1d0] sm:$0xff]  ;;  %v1846_v9 = vld [vmem:[%s3248_s0 + $0x144] sm:$0xf0] }
  0x1b   :  { %2438 = vmatpush.bf16.msra.mxu3 %v2347_v6  ;;  %1081 = vmatpush.bf16.msra.mxu0 %v2347_v6  ;;  %v2275_v6 = vld [vmem:[%s3248_s0 + $0xc] sm:$0xf]  ;;  %v2310_v8 = vld [vmem:[%s3248_s0 + $0x124] sm:$0xf] }
  0x1e   :  { %2439 = vmatpush.bf16.msra.mxu1 %v2346_v7  ;;  %2440 = vmatpush.bf16.msra.mxu2 %v2346_v7 }
  0x1f   :  { %2441 = vmatpush.bf16.msra.mxu3 %v2346_v7  ;;  %1082 = vmatpush.bf16.msra.mxu0 %v2346_v7  ;;  %v1710_v7 = vld [vmem:[%s3248_s0 + $0x2c] sm:$0xf0] }
  0x20   :  { %v1713_v14 = vor.u32 %v2275_v6, %v1710_v7  ;;  %v2388_v6 = vld [vmem:[%s3249_s1 + $0x150] sm:$0xff] }
  0x21   :  { %1093 = vmatmul.bf16.vlgmr.msra.gmra.mxu1 %v1773_v18  ;;  %1103 = vmatmul.bf16.vlgmr.msra.gmra.mxu2 %v1845_v19  ;;  %v2408_v18 = vld [vmem:[%s3249_s1 + $0x1f0] sm:$0xff] }
  0x22   :  { %1173 = vmatpush.bf16.msrb.mxu2 %v2369_v16  ;;  %1124 = vmatpush.bf16.msrb.mxu1 %v2361_v17  ;;  %v2400_v16 = vld [vmem:[%s3249_s1 + $0x1b0] sm:$0xff] }
  0x23   :  { %1113 = vmatmul.bf16.vlgmr.msra.gmra.mxu3 %v1917_v20  ;;  %1083 = vmatmul.bf16.vlgmr.msra.gmra.mxu0 %v1701_v21  ;;  %v2392_v17 = vld [vmem:[%s3249_s1 + $0x170] sm:$0xff]  ;;  %v2399_v20 = vld [vmem:[%s3249_s1 + $0x1a8] sm:$0xff] }
  0x24   :  { %1222 = vmatpush.bf16.msrb.mxu3 %v2377_v22  ;;  %1271 = vmatpush.bf16.msrb.mxu0 %v2385_v23  ;;  %v2416_v19 = vld [vmem:[%s3249_s1 + $0x230] sm:$0xff]  ;;  %v2391_v21 = vld [vmem:[%s3249_s1 + $0x168] sm:$0xff] }
  0x25   :  { %v2407_v22 = vld [vmem:[%s3249_s1 + $0x1e8] sm:$0xff]  ;;  %v2412_v7 = vld [vmem:[%s3249_s1 + $0x210] sm:$0xff] }
  0x26   :  { %1174 = vmatpush.bf16.msrb.mxu2 %v2368_v24  ;;  %1125 = vmatpush.bf16.msrb.mxu1 %v2360_v25  ;;  %v2415_v23 = vld [vmem:[%s3249_s1 + $0x228] sm:$0xff]  ;;  %v1738_v25 = vld [vmem:[%s3248_s0 + $0x6c] sm:$0xf0] }
  0x27   :  { %v2283_v24 = vld [vmem:[%s3248_s0 + $0x4c] sm:$0xf] }
  0x28   :  { %1223 = vmatpush.bf16.msrb.mxu3 %v2376_v26  ;;  %1272 = vmatpush.bf16.msrb.mxu0 %v2384_v27  ;;  %v1744_v26 = vld [vmem:[%s3248_s0 + $0x50] sm:$0xf]  ;;  %v2288_v27 = vld [vmem:[%s3248_s0 + $0x70] sm:$0xf0] }
  0x2a   :  { %1175 = vmatpush.bf16.msrb.mxu2 %v2367_v28  ;;  %1126 = vmatpush.bf16.msrb.mxu1 %v2359_v29  ;;  %v2284_v28 = vld [vmem:[%s3248_s0 + $0x54] sm:$0xf]  ;;  %v1746_v29 = vld [vmem:[%s3248_s0 + $0x74] sm:$0xf0] }
  0x2c   :  { %1224 = vmatpush.bf16.msrb.mxu3 %v2375_v30  ;;  %1273 = vmatpush.bf16.msrb.mxu0 %v2383_v31  ;;  %v1752_v30 = vld [vmem:[%s3248_s0 + $0x58] sm:$0xf]  ;;  %v2289_v31 = vld [vmem:[%s3248_s0 + $0x78] sm:$0xf0] }
  0x2e   :  { %1176 = vmatpush.bf16.msrb.mxu2 %v2366_v32  ;;  %1127 = vmatpush.bf16.msrb.mxu1 %v2358_v33  ;;  %v1741_v32 = vor.u32 %v2283_v24, %v1738_v25  ;;  %v1745_v33 = vor.u32 %v2288_v27, %v1744_v26  ;;  %v2319_v24 = vld [vmem:[%s3248_s0 + $0x16c] sm:$0xf]  ;;  %v1882_v25 = vld [vmem:[%s3248_s0 + $0x18c] sm:$0xf0]  ;;  %v2324_v27 = vld [vmem:[%s3248_s0 + $0x190] sm:$0xf0] }
  0x2f   :  { %v1888_v26 = vld [vmem:[%s3248_s0 + $0x170] sm:$0xf] }
  0x30   :  { %1225 = vmatpush.bf16.msrb.mxu3 %v2374_v34  ;;  %1274 = vmatpush.bf16.msrb.mxu0 %v2382_v35  ;;  %v1749_v34 = vor.u32 %v2284_v28, %v1746_v29  ;;  %v1753_v35 = vor.u32 %v2289_v31, %v1752_v30  ;;  %v2320_v28 = vld [vmem:[%s3248_s0 + $0x174] sm:$0xf]  ;;  %v1890_v29 = vld [vmem:[%s3248_s0 + $0x194] sm:$0xf0]  ;;  %v2325_v31 = vld [vmem:[%s3248_s0 + $0x198] sm:$0xf0] }
  0x31   :  { %1098 = vmatmul.bf16.gmra.mxu1 %v1809_v46  ;;  %1108 = vmatmul.bf16.gmra.mxu2 %v1881_v47  ;;  %v1788_v46 = vld [vmem:[%s3248_s0 + $0xa0] sm:$0xf]  ;;  %v2298_v47 = vld [vmem:[%s3248_s0 + $0xc0] sm:$0xf0]  ;;  %v1896_v30 = vld [vmem:[%s3248_s0 + $0x178] sm:$0xf] }
  0x32   :  { %1177 = vmatpush.bf16.msrb.mxu2 %v2365_v44  ;;  %1128 = vmatpush.bf16.msrb.mxu1 %v2357_v45  ;;  %v2293_v44 = vld [vmem:[%s3248_s0 + $0x9c] sm:$0xf]  ;;  %v1782_v45 = vld [vmem:[%s3248_s0 + $0xbc] sm:$0xf0] }
  0x33   :  { %1118 = vmatmul.bf16.gmra.mxu3 %v1953_v48  ;;  %1088 = vmatmul.bf16.gmra.mxu0 %v1737_v49  ;;  %v1777_v48 = vor.u32 %v2292_v40, %v1774_v41  ;;  %v1781_v49 = vor.u32 %v2297_v43, %v1780_v42  ;;  %v2328_v40 = vld [vmem:[%s3248_s0 + $0x1b4] sm:$0xf]  ;;  %v1918_v41 = vld [vmem:[%s3248_s0 + $0x1d4] sm:$0xf0]  ;;  %v2333_v43 = vld [vmem:[%s3248_s0 + $0x1d8] sm:$0xf0] }
  0x34   :  { %1226 = vmatpush.bf16.msrb.mxu3 %v2373_v50  ;;  %1275 = vmatpush.bf16.msrb.mxu0 %v2381_v51  ;;  %v1785_v50 = vor.u32 %v2293_v44, %v1782_v45  ;;  %v1789_v51 = vor.u32 %v2298_v47, %v1788_v46  ;;  %v1924_v42 = vld [vmem:[%s3248_s0 + $0x1b8] sm:$0xf]  ;;  %v2329_v44 = vld [vmem:[%s3248_s0 + $0x1bc] sm:$0xf]  ;;  %v1926_v45 = vld [vmem:[%s3248_s0 + $0x1dc] sm:$0xf0] }
  0x35   :  { %v1932_v46 = vld [vmem:[%s3248_s0 + $0x1c0] sm:$0xf]  ;;  %v2334_v47 = vld [vmem:[%s3248_s0 + $0x1e0] sm:$0xf0] }
  0x36   :  { %1178 = vmatpush.bf16.msrb.mxu2 %v2364_v52  ;;  %1129 = vmatpush.bf16.msrb.mxu1 %v2356_v53  ;;  %v2397_v52 = vld [vmem:[%s3249_s1 + $0x198] sm:$0xff] }
  0x37   :  { %v2405_v53 = vld [vmem:[%s3249_s1 + $0x1d8] sm:$0xff] }
  0x38   :  { %1227 = vmatpush.bf16.msrb.mxu3 %v2372_v54  ;;  %1276 = vmatpush.bf16.msrb.mxu0 %v2380_v55  ;;  %v2389_v54 = vld [vmem:[%s3249_s1 + $0x158] sm:$0xff] }
  0x39   :  { %v2413_v55 = vld [vmem:[%s3249_s1 + $0x218] sm:$0xff] }
  0x3a   :  { %1179 = vmatpush.bf16.msrb.mxu2 %v2363_v56  ;;  %1130 = vmatpush.bf16.msrb.mxu1 %v2355_v57  ;;  %v2301_v56 = vld [vmem:[%s3248_s0 + $0xdc] sm:$0xf]  ;;  %v1810_v57 = vld [vmem:[%s3248_s0 + $0xfc] sm:$0xf0] }
  0x3c   :  { %1228 = vmatpush.bf16.msrb.mxu3 %v2371_v58  ;;  %1277 = vmatpush.bf16.msrb.mxu0 %v2379_v59  ;;  %v1816_v58 = vld [vmem:[%s3248_s0 + $0xe0] sm:$0xf]  ;;  %v2306_v59 = vld [vmem:[%s3248_s0 + $0x100] sm:$0xf0] }
  0x3d   :  { %v1817_v1 = vor.u32 %v2306_v59, %v1816_v58  ;;  %v2337_v58 = vld [vmem:[%s3248_s0 + $0x1fc] sm:$0xf]  ;;  %v1954_v59 = vld [vmem:[%s3248_s0 + $0x21c] sm:$0xf0] }
  0x3e   :  { %1180 = vmatpush.bf16.msrb.mxu2 %v2362_v60  ;;  %1131 = vmatpush.bf16.msrb.mxu1 %v2354_v61  ;;  %v2302_v60 = vld [vmem:[%s3248_s0 + $0xe4] sm:$0xf]  ;;  %v1818_v61 = vld [vmem:[%s3248_s0 + $0x104] sm:$0xf0] }
  0x40   :  { %1229 = vmatpush.bf16.msrb.mxu3 %v2370_v63  ;;  %1278 = vmatpush.bf16.msrb.mxu0 %v2378_v0  ;;  %v2307_v63 = vld [vmem:[%s3248_s0 + $0x108] sm:$0xf0]  ;;  %v1813_v0 = vor.u32 %v2301_v56, %v1810_v57 }
  0x41   :  { %1132 = vmatmul.bf16.vlgmr.msrb.gmra.mxu1 %v1705_v12  ;;  %1181 = vmatmul.bf16.vlgmr.msrb.gmra.mxu2 %v1709_v13  ;;  %v2311_v12 = vld [vmem:[%s3248_s0 + $0x12c] sm:$0xf]  ;;  %v1854_v13 = vld [vmem:[%s3248_s0 + $0x14c] sm:$0xf0] }
  0x42   :  { %1369 = vmatpush.bf16.msra.mxu2 %v2401_v2  ;;  %1320 = vmatpush.bf16.msra.mxu1 %v2393_v3  ;;  %v1821_v2 = vor.u32 %v2302_v60, %v1818_v61  ;;  %v1825_v3 = vor.u32 %v2307_v63, %v1824_v62  ;;  %v1960_v60 = vld [vmem:[%s3248_s0 + $0x200] sm:$0xf]  ;;  %v2342_v61 = vld [vmem:[%s3248_s0 + $0x220] sm:$0xf0]  ;;  %v1962_v63 = vld [vmem:[%s3248_s0 + $0x224] sm:$0xf0] }
  0x43   :  { %1230 = vmatmul.bf16.vlgmr.msrb.gmra.mxu3 %v1713_v14  ;;  %1279 = vmatmul.bf16.vlgmr.msrb.gmra.mxu0 %v1717_v15  ;;  %v1860_v14 = vld [vmem:[%s3248_s0 + $0x130] sm:$0xf]  ;;  %v2316_v15 = vld [vmem:[%s3248_s0 + $0x150] sm:$0xf0]  ;;  %v2338_v62 = vld [vmem:[%s3248_s0 + $0x204] sm:$0xf] }
  0x44   :  { %1418 = vmatpush.bf16.msra.mxu3 %v2409_v10  ;;  %1467 = vmatpush.bf16.msra.mxu0 %v2417_v11  ;;  %v1852_v10 = vld [vmem:[%s3248_s0 + $0x128] sm:$0xf]  ;;  %v2315_v11 = vld [vmem:[%s3248_s0 + $0x148] sm:$0xf0] }
  0x46   :  { %1370 = vmatpush.bf16.msra.mxu2 %v2400_v16  ;;  %1321 = vmatpush.bf16.msra.mxu1 %v2392_v17  ;;  %v1849_v16 = vor.u32 %v2310_v8, %v1846_v9  ;;  %v1853_v17 = vor.u32 %v2315_v11, %v1852_v10 }
  0x48   :  { %1419 = vmatpush.bf16.msra.mxu3 %v2408_v18  ;;  %1468 = vmatpush.bf16.msra.mxu0 %v2416_v19  ;;  %v1857_v18 = vor.u32 %v2311_v12, %v1854_v13  ;;  %v1861_v19 = vor.u32 %v2316_v15, %v1860_v14  ;;  %v2276_v14 = vld [vmem:[%s3248_s0 + $0x14] sm:$0xf]  ;;  %v1718_v15 = vld [vmem:[%s3248_s0 + $0x34] sm:$0xf0] }
  0x4a   :  { %1371 = vmatpush.bf16.msra.mxu2 %v2399_v20  ;;  %1322 = vmatpush.bf16.msra.mxu1 %v2391_v21  ;;  %v2395_v20 = vld [vmem:[%s3249_s1 + $0x188] sm:$0xff] }
  0x4b   :  { %v2403_v21 = vld [vmem:[%s3249_s1 + $0x1c8] sm:$0xff] }
  0x4c   :  { %1420 = vmatpush.bf16.msra.mxu3 %v2407_v22  ;;  %1469 = vmatpush.bf16.msra.mxu0 %v2415_v23  ;;  %v2387_v22 = vld [vmem:[%s3249_s1 + $0x148] sm:$0xff] }
  0x4d   :  { %v2411_v23 = vld [vmem:[%s3249_s1 + $0x208] sm:$0xff] }
  0x4e   :  { %1372 = vmatpush.bf16.msra.mxu2 %v2398_v36  ;;  %1323 = vmatpush.bf16.msra.mxu1 %v2390_v38  ;;  %v2394_v36 = vld [vmem:[%s3249_s1 + $0x180] sm:$0xff] }
  0x4f   :  { %v2386_v38 = vld [vmem:[%s3249_s1 + $0x140] sm:$0xff] }
  0x50   :  { %1421 = vmatpush.bf16.msra.mxu3 %v2406_v37  ;;  %1470 = vmatpush.bf16.msra.mxu0 %v2414_v39  ;;  %v2402_v37 = vld [vmem:[%s3249_s1 + $0x1c0] sm:$0xff] }
  0x51   :  { %1137 = vmatmul.bf16.gmra.mxu1 %v1741_v32  ;;  %1186 = vmatmul.bf16.gmra.mxu2 %v1745_v33  ;;  %v1885_v32 = vor.u32 %v2319_v24, %v1882_v25  ;;  %v1889_v33 = vor.u32 %v2324_v27, %v1888_v26  ;;  %v2410_v39 = vld [vmem:[%s3249_s1 + $0x200] sm:$0xff]  ;;  %v1721_v24 = vor.u32 %v2276_v14, %v1718_v15 }
  0x52   :  { %1373 = vmatpush.bf16.msra.mxu2 %v2397_v52  ;;  %1324 = vmatpush.bf16.msra.mxu1 %v2389_v54  ;;  %v1933_v52 = vor.u32 %v2334_v47, %v1932_v46  ;;  %v2291_v46 = vld [vmem:[%s3248_s0 + $0x88] sm:$0xf0]  ;;  %v2294_v14 = vld [vmem:[%s3248_s0 + $0xa4] sm:$0xf] }
  0x53   :  { %1235 = vmatmul.bf16.gmra.mxu3 %v1749_v34  ;;  %1284 = vmatmul.bf16.gmra.mxu0 %v1753_v35  ;;  %v1893_v34 = vor.u32 %v2320_v28, %v1890_v29  ;;  %v1897_v35 = vor.u32 %v2325_v31, %v1896_v30 }
  0x54   :  { %1422 = vmatpush.bf16.msra.mxu3 %v2405_v53  ;;  %1471 = vmatpush.bf16.msra.mxu0 %v2413_v55 }
  0x56   :  { %1374 = vmatpush.bf16.msra.mxu2 %v2396_v4  ;;  %1325 = vmatpush.bf16.msra.mxu1 %v2388_v6  ;;  %v1957_v4 = vor.u32 %v2337_v58, %v1954_v59 }
  0x58   :  { %1423 = vmatpush.bf16.msra.mxu3 %v2404_v5  ;;  %1472 = vmatpush.bf16.msra.mxu0 %v2412_v7  ;;  %v1961_v5 = vor.u32 %v2342_v61, %v1960_v60  ;;  %v1965_v7 = vor.u32 %v2338_v62, %v1962_v63 }
  0x5a   :  { %1375 = vmatpush.bf16.msra.mxu2 %v2395_v20  ;;  %1326 = vmatpush.bf16.msra.mxu1 %v2387_v22  ;;  %v1732_v20 = vld [vmem:[%s3248_s0 + $0x20] sm:$0xf] }
  0x5c   :  { %1424 = vmatpush.bf16.msra.mxu3 %v2403_v21  ;;  %1473 = vmatpush.bf16.msra.mxu0 %v2411_v23  ;;  %v2282_v21 = vld [vmem:[%s3248_s0 + $0x40] sm:$0xf0] }
  0x5d   :  { %v1733_v28 = vor.u32 %v2282_v21, %v1732_v20  ;;  %v2300_v20 = vld [vmem:[%s3248_s0 + $0xd0] sm:$0xf0] }
  0x5e   :  { %1376 = vmatpush.bf16.msra.mxu2 %v2394_v36  ;;  %1327 = vmatpush.bf16.msra.mxu1 %v2386_v38  ;;  %v2285_v38 = vld [vmem:[%s3248_s0 + $0x5c] sm:$0xf] }
  0x60   :  { %1425 = vmatpush.bf16.msra.mxu3 %v2402_v37  ;;  %1474 = vmatpush.bf16.msra.mxu0 %v2410_v39  ;;  %v1754_v39 = vld [vmem:[%s3248_s0 + $0x7c] sm:$0xf0] }
  0x61   :  { %1142 = vmatmul.bf16.gmra.mxu1 %v1777_v48  ;;  %1191 = vmatmul.bf16.gmra.mxu2 %v1781_v49  ;;  %v1921_v48 = vor.u32 %v2328_v40, %v1918_v41  ;;  %v1925_v49 = vor.u32 %v2333_v43, %v1924_v42  ;;  %v1760_v41 = vld [vmem:[%s3248_s0 + $0x60] sm:$0xf]  ;;  %v2290_v42 = vld [vmem:[%s3248_s0 + $0x80] sm:$0xf0] }
  0x62   :  { %v2286_v43 = vld [vmem:[%s3248_s0 + $0x64] sm:$0xf] }
  0x63   :  { %1240 = vmatmul.bf16.gmra.mxu3 %v1785_v50  ;;  %1289 = vmatmul.bf16.gmra.mxu0 %v1789_v51  ;;  %v1929_v51 = vor.u32 %v2329_v44, %v1926_v45  ;;  %v1762_v44 = vld [vmem:[%s3248_s0 + $0x84] sm:$0xf0] }
  0x64   :  { %v1768_v45 = vld [vmem:[%s3248_s0 + $0x68] sm:$0xf] }
  0x65   :  { %v1769_v58 = vor.u32 %v2291_v46, %v1768_v45  ;;  %v1832_v45 = vld [vmem:[%s3248_s0 + $0xf0] sm:$0xf]  ;;  %v2308_v46 = vld [vmem:[%s3248_s0 + $0x110] sm:$0xf0] }
  0x71   :  { %1147 = vmatmul.bf16.gmra.mxu1 %v1813_v0  ;;  %1196 = vmatmul.bf16.gmra.mxu2 %v1817_v1  ;;  %v1968_v0 = vld [vmem:[%s3248_s0 + $0x208] sm:$0xf]  ;;  %v2343_v1 = vld [vmem:[%s3248_s0 + $0x228] sm:$0xf0] }
  0x72   :  { %v1969_v8 = vor.u32 %v2343_v1, %v1968_v0 }
  0x73   :  { %1245 = vmatmul.bf16.gmra.mxu3 %v1821_v2  ;;  %1294 = vmatmul.bf16.gmra.mxu0 %v1825_v3 }
  0x81   :  { %1152 = vmatmul.bf16.gmra.mxu1 %v1849_v16  ;;  %1201 = vmatmul.bf16.gmra.mxu2 %v1853_v17  ;;  %v1724_v16 = vld [vmem:[%s3248_s0 + $0x18] sm:$0xf]  ;;  %v2281_v17 = vld [vmem:[%s3248_s0 + $0x38] sm:$0xf0] }
  0x82   :  { %v1725_v25 = vor.u32 %v2281_v17, %v1724_v16  ;;  %v1796_v16 = vld [vmem:[%s3248_s0 + $0xa8] sm:$0xf]  ;;  %v2299_v17 = vld [vmem:[%s3248_s0 + $0xc8] sm:$0xf0] }
  0x83   :  { %1250 = vmatmul.bf16.gmra.mxu3 %v1857_v18  ;;  %1299 = vmatmul.bf16.gmra.mxu0 %v1861_v19  ;;  %v2277_v18 = vld [vmem:[%s3248_s0 + $0x1c] sm:$0xf]  ;;  %v1726_v19 = vld [vmem:[%s3248_s0 + $0x3c] sm:$0xf0] }
  0x84   :  { %v1729_v27 = vor.u32 %v2277_v18, %v1726_v19  ;;  %v1798_v18 = vld [vmem:[%s3248_s0 + $0xcc] sm:$0xf0] }
  0x85   :  { %v1804_v19 = vld [vmem:[%s3248_s0 + $0xb0] sm:$0xf] }
  0x91   :  { %1157 = vmatmul.bf16.gmra.mxu1 %v1885_v32  ;;  %1206 = vmatmul.bf16.gmra.mxu2 %v1889_v33 }
  0x93   :  { %1255 = vmatmul.bf16.gmra.mxu3 %v1893_v34  ;;  %1304 = vmatmul.bf16.gmra.mxu0 %v1897_v35 }
  0x9e   :  { %v2897_v50 = vpop.f32.mrf.mxu1 }
  0xa0   :  { %v1084_v53 = vpop.f32.mrf.mxu0 }
  0xa1   :  { %1162 = vmatmul.bf16.gmra.mxu1 %v1921_v48  ;;  %1211 = vmatmul.bf16.gmra.mxu2 %v1925_v49 }
  0xa3   :  { %1260 = vmatmul.bf16.gmra.mxu3 %v1929_v51  ;;  %1309 = vmatmul.bf16.gmra.mxu0 %v1933_v52  ;;  %v1757_v51 = vor.u32 %v2285_v38, %v1754_v39  ;;  %v1761_v52 = vor.u32 %v2290_v42, %v1760_v41 }
  0xa4   :  { %v2899_v54 = vpop.f32.mrf.mxu2 }
  0xa6   :  { %v2901_v55 = vpop.f32.mrf.mxu3  ;;  %v2903_v56 = vpop.f32.mrf.mxu1 }
  0xa8   :  { %v1086_v57 = vpop.f32.mrf.mxu0 }
  0xac   :  { %v2929_v2 = vpop.f32.mrf.mxu2 }
  0xae   :  { %v2931_v3 = vpop.f32.mrf.mxu3  ;;  %v2933_v6 = vpop.f32.mrf.mxu1 }
  0xb0   :  { %v1089_v9 = vpop.f32.mrf.mxu0 }
  0xb1   :  { %1167 = vmatmul.bf16.gmra.mxu1 %v1957_v4  ;;  %1216 = vmatmul.bf16.gmra.mxu2 %v1961_v5 }
  0xb3   :  { %1265 = vmatmul.bf16.gmra.mxu3 %v1965_v7  ;;  %1314 = vmatmul.bf16.gmra.mxu0 %v1969_v8 }
  0xb4   :  { %v2935_v10 = vpop.f32.mrf.mxu2 }
  0xb6   :  { %v2937_v11 = vpop.f32.mrf.mxu3  ;;  %v2939_v12 = vpop.f32.mrf.mxu1 }
  0xb8   :  { %v1091_v13 = vpop.f32.mrf.mxu0 }
  0xbc   :  { %v2965_v22 = vpop.f32.mrf.mxu2 }
  0xbe   :  { %v2967_v23 = vpop.f32.mrf.mxu3  ;;  %v1133_v26 = vpop.f32.mrf.mxu1 }
  0xbf   :  { %v1134_v29 = vadd.f32 %v1133_v26, %v1084_v53 }
  0xc0   :  { %v1280_v30 = vpop.f32.mrf.mxu0 }
  0xc1   :  { %1328 = vmatmul.bf16.vlgmr.msra.gmra.mxu1 %v1721_v24  ;;  %1377 = vmatmul.bf16.vlgmr.msra.gmra.mxu2 %v1725_v25 }
  0xc3   :  { %1426 = vmatmul.bf16.vlgmr.msra.gmra.mxu3 %v1729_v27  ;;  %1475 = vmatmul.bf16.vlgmr.msra.gmra.mxu0 %v1733_v28  ;;  %v1797_v27 = vor.u32 %v2299_v17, %v1796_v16 }
  0xc4   :  { %v1182_v31 = vpop.f32.mrf.mxu2 }
  0xc5   :  { %v1183_v32 = vadd.f32 %v1182_v31, %v1134_v29 }
  0xc6   :  { %v1231_v33 = vpop.f32.mrf.mxu3  ;;  %v1135_v34 = vpop.f32.mrf.mxu1 }
  0xc7   :  { %v1232_v35 = vadd.f32 %v1231_v33, %v1183_v32  ;;  %v1136_v36 = vadd.f32 %v1135_v34, %v1086_v57  ;;  %v1765_v57 = vor.u32 %v2286_v43, %v1762_v44  ;;  %v2303_v43 = vld [vmem:[%s3248_s0 + $0xec] sm:$0xf] }
  0xc8   :  { %v1282_v37 = vpop.f32.mrf.mxu0 }
  0xc9   :  { %v2975_v40 = vadd.f32 %v1280_v30, %v1232_v35  ;;  %v1805_v30 = vor.u32 %v2300_v20, %v1804_v19  ;;  %v1868_v19 = vld [vmem:[%s3248_s0 + $0x138] sm:$0xf]  ;;  %v2317_v20 = vld [vmem:[%s3248_s0 + $0x158] sm:$0xf0] }
  0xcc   :  { %v1184_v47 = vpop.f32.mrf.mxu2 }
  0xcd   :  { %v1185_v48 = vadd.f32 %v1184_v47, %v1136_v36  ;;  %v1834_v47 = vld [vmem:[%s3248_s0 + $0x114] sm:$0xf0] }
  0xce   :  { %v1233_v49 = vpop.f32.mrf.mxu3  ;;  %v1138_v53 = vpop.f32.mrf.mxu1 }
  0xcf   :  { %v1234_v59 = vadd.f32 %v1233_v49, %v1185_v48  ;;  %v1139_v60 = vadd.f32 %v1138_v53, %v1089_v9  ;;  %v1790_v9 = vld [vmem:[%s3248_s0 + $0xc4] sm:$0xf0]  ;;  %v1840_v48 = vld [vmem:[%s3248_s0 + $0xf8] sm:$0xf]  ;;  %v2309_v49 = vld [vmem:[%s3248_s0 + $0x118] sm:$0xf0] }
  0xd0   :  { %v1285_v61 = vpop.f32.mrf.mxu0  ;;  %v1793_v26 = vor.u32 %v2294_v14, %v1790_v9 }
  0xd1   :  { %1333 = vmatmul.bf16.gmra.mxu1 %v1757_v51  ;;  %1382 = vmatmul.bf16.gmra.mxu2 %v1761_v52  ;;  %v2995_v62 = vadd.f32 %v1282_v37, %v1234_v59 }
  0xd3   :  { %1431 = vmatmul.bf16.gmra.mxu3 %v1765_v57  ;;  %1480 = vmatmul.bf16.gmra.mxu0 %v1769_v58  ;;  %v1833_v58 = vor.u32 %v2308_v46, %v1832_v45  ;;  %v2321_v46 = vld [vmem:[%s3248_s0 + $0x17c] sm:$0xf] }
  0xd4   :  { %v1187_v63 = vpop.f32.mrf.mxu2 }
  0xd5   :  { %v1188_v0 = vadd.f32 %v1187_v63, %v1139_v60 }
  0xd6   :  { %v1236_v1 = vpop.f32.mrf.mxu3  ;;  %v1140_v4 = vpop.f32.mrf.mxu1 }
  0xd7   :  { %v1237_v5 = vadd.f32 %v1236_v1, %v1188_v0  ;;  %v1141_v7 = vadd.f32 %v1140_v4, %v1091_v13  ;;  %v2295_v13 = vld [vmem:[%s3248_s0 + $0xac] sm:$0xf] }
  0xd8   :  { %v1287_v8 = vpop.f32.mrf.mxu0  ;;  %v1801_v29 = vor.u32 %v2295_v13, %v1798_v18  ;;  %v2312_v13 = vld [vmem:[%s3248_s0 + $0x134] sm:$0xf] }
  0xd9   :  { %v3003_v15 = vadd.f32 %v1285_v61, %v1237_v5  ;;  %v1841_v61 = vor.u32 %v2309_v49, %v1840_v48  ;;  %v2326_v48 = vld [vmem:[%s3248_s0 + $0x1a0] sm:$0xf0] }
  0xda   :  { %v2322_v49 = vld [vmem:[%s3248_s0 + $0x184] sm:$0xf] }
  0xdc   :  { %v1189_v21 = vpop.f32.mrf.mxu2 }
  0xdd   :  { %v1190_v24 = vadd.f32 %v1189_v21, %v1141_v7  ;;  %v1870_v21 = vld [vmem:[%s3248_s0 + $0x15c] sm:$0xf0] }
  0xde   :  { %v1238_v25 = vpop.f32.mrf.mxu3  ;;  %v1143_v28 = vpop.f32.mrf.mxu1 }
  0xdf   :  { %v1239_v31 = vadd.f32 %v1238_v25, %v1190_v24  ;;  %v1144_v32 = vadd.f32 %v1143_v28, %v2897_v50  ;;  %v1826_v50 = vld [vmem:[%s3248_s0 + $0x10c] sm:$0xf0]  ;;  %v1876_v24 = vld [vmem:[%s3248_s0 + $0x140] sm:$0xf]  ;;  %v2318_v25 = vld [vmem:[%s3248_s0 + $0x160] sm:$0xf0] }
  0xe0   :  { %v1290_v33 = vpop.f32.mrf.mxu0  ;;  %v1829_v57 = vor.u32 %v2303_v43, %v1826_v50 }
  0xe1   :  { %1338 = vmatmul.bf16.gmra.mxu1 %v1793_v26  ;;  %1387 = vmatmul.bf16.gmra.mxu2 %v1797_v27  ;;  %v3024_v34 = vadd.f32 %v1287_v8, %v1239_v31 }
  0xe3   :  { %1436 = vmatmul.bf16.gmra.mxu3 %v1801_v29  ;;  %1485 = vmatmul.bf16.gmra.mxu0 %v1805_v30  ;;  %v1869_v30 = vor.u32 %v2317_v20, %v1868_v19  ;;  %v2330_v20 = vld [vmem:[%s3248_s0 + $0x1c4] sm:$0xf] }
  0xe4   :  { %v1192_v35 = vpop.f32.mrf.mxu2 }
  0xe5   :  { %v1193_v36 = vadd.f32 %v1192_v35, %v1144_v32 }
  0xe6   :  { %v1241_v37 = vpop.f32.mrf.mxu3  ;;  %v1145_v38 = vpop.f32.mrf.mxu1 }
  0xe7   :  { %v1242_v39 = vadd.f32 %v1241_v37, %v1193_v36  ;;  %v1146_v41 = vadd.f32 %v1145_v38, %v2903_v56  ;;  %v2304_v56 = vld [vmem:[%s3248_s0 + $0xf4] sm:$0xf] }
  0xe8   :  { %v1292_v42 = vpop.f32.mrf.mxu0  ;;  %v1837_v60 = vor.u32 %v2304_v56, %v1834_v47  ;;  %v1898_v56 = vld [vmem:[%s3248_s0 + $0x19c] sm:$0xf0] }
  0xe9   :  { %v3033_v44 = vadd.f32 %v1290_v33, %v1242_v39  ;;  %v1877_v33 = vor.u32 %v2318_v25, %v1876_v24  ;;  %v2335_v24 = vld [vmem:[%s3248_s0 + $0x1e8] sm:$0xf0] }
  0xea   :  { %v2331_v25 = vld [vmem:[%s3248_s0 + $0x1cc] sm:$0xf] }
  0xec   :  { %v1194_v51 = vpop.f32.mrf.mxu2 }
  0xed   :  { %v1195_v52 = vadd.f32 %v1194_v51, %v1146_v41 }
  0xee   :  { %v1243_v53 = vpop.f32.mrf.mxu3  ;;  %v1148_v59 = vpop.f32.mrf.mxu1 }
  0xef   :  { %v1244_v63 = vadd.f32 %v1243_v53, %v1195_v52  ;;  %v1149_v0 = vadd.f32 %v1148_v59, %v2933_v6  ;;  %v1862_v6 = vld [vmem:[%s3248_s0 + $0x154] sm:$0xf0]  ;;  %v1906_v52 = vld [vmem:[%s3248_s0 + $0x1a4] sm:$0xf0] }
  0xf0   :  { %v1295_v1 = vpop.f32.mrf.mxu0  ;;  %v1865_v29 = vor.u32 %v2312_v13, %v1862_v6  ;;  %v1912_v53 = vld [vmem:[%s3248_s0 + $0x188] sm:$0xf] }
  0xf1   :  { %1343 = vmatmul.bf16.gmra.mxu1 %v1829_v57  ;;  %1392 = vmatmul.bf16.gmra.mxu2 %v1833_v58  ;;  %v3054_v4 = vadd.f32 %v1292_v42, %v1244_v63  ;;  %v2327_v57 = vld [vmem:[%s3248_s0 + $0x1a8] sm:$0xf0] }
  0xf3   :  { %1441 = vmatmul.bf16.gmra.mxu3 %v1837_v60  ;;  %1490 = vmatmul.bf16.gmra.mxu0 %v1841_v61  ;;  %v1901_v61 = vor.u32 %v2321_v46, %v1898_v56 }
  0xf4   :  { %v1197_v5 = vpop.f32.mrf.mxu2 }
  0xf5   :  { %v1198_v7 = vadd.f32 %v1197_v5, %v1149_v0 }
  0xf6   :  { %v1246_v8 = vpop.f32.mrf.mxu3  ;;  %v1150_v14 = vpop.f32.mrf.mxu1 }
  0xf7   :  { %v1247_v9 = vadd.f32 %v1246_v8, %v1198_v7  ;;  %v1151_v16 = vadd.f32 %v1150_v14, %v2939_v12  ;;  %v2313_v12 = vld [vmem:[%s3248_s0 + $0x13c] sm:$0xf] }
  0xf8   :  { %v1297_v17 = vpop.f32.mrf.mxu0  ;;  %v1873_v32 = vor.u32 %v2313_v12, %v1870_v21  ;;  %v1934_v12 = vld [vmem:[%s3248_s0 + $0x1e4] sm:$0xf0] }
  0xf9   :  { %v3063_v18 = vadd.f32 %v1295_v1, %v1247_v9  ;;  %v1909_v1 = vor.u32 %v2322_v49, %v1906_v52  ;;  %v1976_v52 = vld [vmem:[%s3248_s0 + $0x210] sm:$0xf] }
  0xfc   :  { %v1199_v26 = vpop.f32.mrf.mxu2 }
  0xfd   :  { %v1200_v27 = vadd.f32 %v1199_v26, %v1151_v16 }
  0xfe   :  { %v1248_v28 = vpop.f32.mrf.mxu3  ;;  %v1153_v31 = vpop.f32.mrf.mxu1 }
  0xff   :  { %v1249_v35 = vadd.f32 %v1248_v28, %v1200_v27  ;;  %v1154_v38 = vadd.f32 %v1153_v31, %v2899_v54  ;;  %v1904_v54 = vld [vmem:[%s3248_s0 + $0x180] sm:$0xf]  ;;  %v1942_v27 = vld [vmem:[%s3248_s0 + $0x1ec] sm:$0xf0] }
 0x100   :  { %v1300_v36 = vpop.f32.mrf.mxu0  ;;  %v1905_v63 = vor.u32 %v2326_v48, %v1904_v54  ;;  %v1948_v28 = vld [vmem:[%s3248_s0 + $0x1d0] sm:$0xf] }
 0x101   :  { %1348 = vmatmul.bf16.gmra.mxu1 %v1865_v29  ;;  %1397 = vmatmul.bf16.gmra.mxu2 %v1869_v30  ;;  %v3083_v37 = vadd.f32 %v1297_v17, %v1249_v35  ;;  %v2336_v29 = vld [vmem:[%s3248_s0 + $0x1f0] sm:$0xf0] }
 0x103   :  { %1446 = vmatmul.bf16.gmra.mxu3 %v1873_v32  ;;  %1495 = vmatmul.bf16.gmra.mxu0 %v1877_v33  ;;  %v1937_v33 = vor.u32 %v2330_v20, %v1934_v12 }
 0x104   :  { %v1202_v39 = vpop.f32.mrf.mxu2 }
 0x105   :  { %v1203_v41 = vadd.f32 %v1202_v39, %v1154_v38  ;;  %v1945_v38 = vor.u32 %v2331_v25, %v1942_v27 }
 0x106   :  { %v1251_v42 = vpop.f32.mrf.mxu3  ;;  %v1155_v43 = vpop.f32.mrf.mxu1 }
 0x107   :  { %v1252_v50 = vadd.f32 %v1251_v42, %v1203_v41  ;;  %v1156_v51 = vadd.f32 %v1155_v43, %v2929_v2  ;;  %v1913_v2 = vor.u32 %v2327_v57, %v1912_v53  ;;  %v2344_v53 = vld [vmem:[%s3248_s0 + $0x230] sm:$0xf0] }
 0x108   :  { %v1302_v45 = vpop.f32.mrf.mxu0 }
 0x109   :  { %v3092_v47 = vadd.f32 %v1300_v36, %v1252_v50 }
 0x10c   :  { %v1204_v58 = vpop.f32.mrf.mxu2 }
 0x10d   :  { %v1205_v59 = vadd.f32 %v1204_v58, %v1156_v51  ;;  %v1970_v51 = vld [vmem:[%s3248_s0 + $0x22c] sm:$0xf0]  ;;  %v2340_v58 = vld [vmem:[%s3248_s0 + $0x214] sm:$0xf] }
 0x10e   :  { %v1253_v60 = vpop.f32.mrf.mxu3  ;;  %v1158_v0 = vpop.f32.mrf.mxu1 }
 0x10f   :  { %v1254_v5 = vadd.f32 %v1253_v60, %v1205_v59  ;;  %v1159_v14 = vadd.f32 %v1158_v0, %v2935_v10  ;;  %v1940_v10 = vld [vmem:[%s3248_s0 + $0x1c8] sm:$0xf]  ;;  %v1978_v59 = vld [vmem:[%s3248_s0 + $0x234] sm:$0xf0] }
 0x110   :  { %v1305_v7 = vpop.f32.mrf.mxu0  ;;  %v1941_v35 = vor.u32 %v2335_v24, %v1940_v10 }
 0x111   :  { %1353 = vmatmul.bf16.gmra.mxu1 %v1901_v61  ;;  %1402 = vmatmul.bf16.gmra.mxu2 %v1905_v63  ;;  %v3113_v8 = vadd.f32 %v1302_v45, %v1254_v5  ;;  %v2444_v45 = vmov 0.0   ;;  %v1984_v61 = vld [vmem:[%s3248_s0 + $0x218] sm:$0xf]  ;;  %v2345_v63 = vld [vmem:[%s3248_s0 + $0x238] sm:$0xf0] }
 0x112   :  { %19 = vst.msk [vmem:[#allocation2] sm:$0xff] %vm18_vm0, %v2444_v45 }
 0x113   :  { %1451 = vmatmul.bf16.gmra.mxu3 %v1909_v1  ;;  %1500 = vmatmul.bf16.gmra.mxu0 %v1913_v2  ;;  %20 = vst.msk [vmem:[#allocation2 + $0x8] sm:$0xff] %vm18_vm0, %v2444_v45 }
 0x114   :  { %v1207_v9 = vpop.f32.mrf.mxu2  ;;  %21 = vst.msk [vmem:[#allocation2 + $0x10] sm:$0xff] %vm18_vm0, %v2444_v45 }
 0x115   :  { %v1208_v16 = vadd.f32 %v1207_v9, %v1159_v14  ;;  %22 = vst.msk [vmem:[#allocation2 + $0x18] sm:$0xff] %vm18_vm0, %v2444_v45  ;;  %v1981_v14 = vor.u32 %v2340_v58, %v1978_v59  ;;  %v1985_v9 = vor.u32 %v2345_v63, %v1984_v61 }
 0x116   :  { %v1256_v17 = vpop.f32.mrf.mxu3  ;;  %v1160_v13 = vpop.f32.mrf.mxu1  ;;  %23 = vst.msk [vmem:[#allocation2 + $0x20] sm:$0xff] %vm18_vm0, %v2444_v45 }
 0x117   :  { %v1257_v6 = vadd.f32 %v1256_v17, %v1208_v16  ;;  %v1161_v26 = vadd.f32 %v1160_v13, %v2965_v22  ;;  %v1949_v22 = vor.u32 %v2336_v29, %v1948_v28  ;;  %24 = vst.msk [vmem:[#allocation2 + $0x28] sm:$0xff] %vm18_vm0, %v2444_v45 }
 0x118   :  { %v1307_v19 = vpop.f32.mrf.mxu0  ;;  %25 = vst.msk [vmem:[#allocation2 + $0x30] sm:$0xff] %vm18_vm0, %v2444_v45 }
 0x119   :  { %v3122_v21 = vadd.f32 %v1305_v7, %v1257_v6  ;;  %26 = vst.msk [vmem:[#allocation2 + $0x38] sm:$0xff] %vm18_vm0, %v2444_v45  ;;  %v1977_v7 = vor.u32 %v2344_v53, %v1976_v52  ;;  %v2443_v52 = vld [vmem:[%s3250_s2] ss:$0 sm:$0xff] }
 0x11a   :  { %27 = vst.msk [vmem:[#allocation2 + $0x40] sm:$0xff] %vm18_vm0, %v2444_v45 }
 0x11b   :  { %28 = vst.msk [vmem:[#allocation2 + $0x48] sm:$0xff] %vm18_vm0, %v2444_v45 }
 0x11c   :  { %v1209_v30 = vpop.f32.mrf.mxu2  ;;  %29 = vst.msk [vmem:[#allocation2 + $0x50] sm:$0xff] %vm18_vm0, %v2444_v45 }
 0x11d   :  { %v1210_v31 = vadd.f32 %v1209_v30, %v1161_v26  ;;  %30 = vst.msk [vmem:[#allocation2 + $0x58] sm:$0xff] %vm18_vm0, %v2444_v45 }
 0x11e   :  { %v1258_v32 = vpop.f32.mrf.mxu3  ;;  %v1163_v36 = vpop.f32.mrf.mxu1  ;;  %31 = vst.msk [vmem:[#allocation2 + $0x60] sm:$0xff] %vm18_vm0, %v2444_v45 }
 0x11f   :  { %v1259_v39 = vadd.f32 %v1258_v32, %v1210_v31  ;;  %v1164_v43 = vadd.f32 %v1163_v36, %v2901_v55  ;;  %v2339_v55 = vld [vmem:[%s3248_s0 + $0x20c] sm:$0xf]  ;;  %32 = vst.msk [vmem:[#allocation2 + $0x68] sm:$0xff] %vm18_vm0, %v2444_v45 }
 0x120   :  { %v1310_v41 = vpop.f32.mrf.mxu0  ;;  %v1973_v5 = vor.u32 %v2339_v55, %v1970_v51  ;;  %33 = vst.msk [vmem:[#allocation2 + $0x70] sm:$0xff] %vm18_vm0, %v2444_v45 }
 0x121   :  { %1358 = vmatmul.bf16.gmra.mxu1 %v1937_v33  ;;  %1407 = vmatmul.bf16.gmra.mxu2 %v1941_v35  ;;  %v3143_v42 = vadd.f32 %v1307_v19, %v1259_v39  ;;  %34 = vst.msk [vmem:[#allocation2 + $0x78] sm:$0xff] %vm18_vm0, %v2444_v45 }
 0x123   :  { %1456 = vmatmul.bf16.gmra.mxu3 %v1945_v38  ;;  %1505 = vmatmul.bf16.gmra.mxu0 %v1949_v22 }
 0x124   :  { %v1212_v50 = vpop.f32.mrf.mxu2 }
 0x125   :  { %v1213_v46 = vadd.f32 %v1212_v50, %v1164_v43  ;;  %v35_v50 = vld [vmem:[#allocation2] sm:$0xff] }
 0x126   :  { %v1261_v56 = vpop.f32.mrf.mxu3  ;;  %v1165_v54 = vpop.f32.mrf.mxu1 }
 0x127   :  { %v1262_v48 = vadd.f32 %v1261_v56, %v1213_v46  ;;  %v1166_v60 = vadd.f32 %v1165_v54, %v2931_v3 }
 0x128   :  { %v1312_v49 = vpop.f32.mrf.mxu0 }
 0x129   :  { %v3164_v57 = vadd.f32 %v1310_v41, %v1262_v48 }
 0x12c   :  { %v1214_v0 = vpop.f32.mrf.mxu2 }
 0x12d   :  { %v1215_v1 = vadd.f32 %v1214_v0, %v1166_v60 }
 0x12e   :  { %v1263_v2 = vpop.f32.mrf.mxu3  ;;  %v1168_v3 = vpop.f32.mrf.mxu1 }
 0x12f   :  { %v1264_v16 = vadd.f32 %v1263_v2, %v1215_v1  ;;  %v1169_v6 = vadd.f32 %v1168_v3, %v2937_v11  ;;  %v37_v3 = vld [vmem:[#allocation2 + $0x10] sm:$0xff] }
 0x130   :  { %v1315_v17 = vpop.f32.mrf.mxu0 }
 0x131   :  { %1363 = vmatmul.bf16.gmra.mxu1 %v1973_v5  ;;  %1412 = vmatmul.bf16.gmra.mxu2 %v1977_v7  ;;  %v3187_v13 = vadd.f32 %v1312_v49, %v1264_v16 }
 0x133   :  { %1461 = vmatmul.bf16.gmra.mxu3 %v1981_v14  ;;  %1510 = vmatmul.bf16.gmra.mxu0 %v1985_v9 }
 0x134   :  { %v1217_v19 = vpop.f32.mrf.mxu2 }
 0x135   :  { %v1218_v20 = vadd.f32 %v1217_v19, %v1169_v6 }
 0x136   :  { %v1266_v12 = vpop.f32.mrf.mxu3  ;;  %v1170_v10 = vpop.f32.mrf.mxu1 }
 0x137   :  { %v1267_v24 = vadd.f32 %v1266_v12, %v1218_v20  ;;  %v1171_v27 = vadd.f32 %v1170_v10, %v2967_v23 }
 0x138   :  { %v1317_v25 = vpop.f32.mrf.mxu0 }
 0x139   :  { %v3192_v26 = vadd.f32 %v1315_v17, %v1267_v24 }
 0x13c   :  { %v1219_v28 = vpop.f32.mrf.mxu2 }
 0x13d   :  { %v1220_v29 = vadd.f32 %v1219_v28, %v1171_v27  ;;  %v38_v28 = vld [vmem:[#allocation2 + $0x18] sm:$0xff] }
 0x13e   :  { %v1268_v30 = vpop.f32.mrf.mxu3  ;;  %v1329_v31 = vpop.f32.mrf.mxu1 }
 0x13f   :  { %v1269_v32 = vadd.f32 %v1268_v30, %v1220_v29  ;;  %v1330_v11 = vadd.f32 %v1329_v31, %v2975_v40  ;;  %v36_v40 = vld [vmem:[#allocation2 + $0x8] sm:$0xff] }
 0x140   :  { %v1476_v33 = vpop.f32.mrf.mxu0 }
 0x141   :  { %v3195_v35 = vadd.f32 %v1317_v25, %v1269_v32 }
 0x144   :  { %v1378_v36 = vpop.f32.mrf.mxu2 }
 0x145   :  { %v1379_v38 = vadd.f32 %v1378_v36, %v1330_v11 }
 0x146   :  { %v1427_v22 = vpop.f32.mrf.mxu3  ;;  %v1331_v39 = vpop.f32.mrf.mxu1 }
 0x147   :  { %v1428_v41 = vadd.f32 %v1427_v22, %v1379_v38  ;;  %v1332_v23 = vadd.f32 %v1331_v39, %v2995_v62 }
 0x148   :  { %v1478_v43 = vpop.f32.mrf.mxu0 }
 0x149   :  { %v1477_v45 = vadd.f32 %v1476_v33, %v1428_v41 }
 0x14b   :  { %v1516_v46 = vadd.f32 %v1477_v45, %v35_v50  ;;  %v39_v45 = vld [vmem:[#allocation2 + $0x20] sm:$0xff] }
 0x14c   :  { %v1380_v56 = vpop.f32.mrf.mxu2 }
 0x14d   :  { %1533 = vst.msk [vmem:[#allocation2] sm:$0xff] %vm18_vm0, %v1516_v46  ;;  %v1381_v54 = vadd.f32 %v1380_v56, %v1332_v23 }
 0x14e   :  { %v1429_v48 = vpop.f32.mrf.mxu3  ;;  %v1334_v49 = vpop.f32.mrf.mxu1 }
 0x14f   :  { %v1430_v55 = vadd.f32 %v1429_v48, %v1381_v54  ;;  %v1335_v59 = vadd.f32 %v1334_v49, %v3003_v15 }
 0x150   :  { %v1481_v51 = vpop.f32.mrf.mxu0 }
 0x151   :  { %v1479_v53 = vadd.f32 %v1478_v43, %v1430_v55 }
 0x153   :  { %v1517_v58 = vadd.f32 %v1479_v53, %v36_v40 }
 0x154   :  { %v1552_v60 = vld [vmem:[#allocation2] sm:$0xff]  ;;  %v1383_v61 = vpop.f32.mrf.mxu2 }
 0x155   :  { %v1572_v62 = vadd.f32 %v2443_v52, %v1552_v60  ;;  %1534 = vst.msk [vmem:[#allocation2 + $0x8] sm:$0xff] %vm18_vm0, %v1517_v58  ;;  %v1384_v63 = vadd.f32 %v1383_v61, %v1335_v59  ;;  %v40_v61 = vld [vmem:[#allocation2 + $0x28] sm:$0xff] }
 0x156   :  { %v1432_v0 = vpop.f32.mrf.mxu3  ;;  %v1336_v1 = vpop.f32.mrf.mxu1 }
 0x157   :  { %v1588_v2 = vmax.f32 %v1572_v62, 0.0  ;;  %v1433_v5 = vadd.f32 %v1432_v0, %v1384_v63  ;;  %v1337_v15 = vadd.f32 %v1336_v1, %v3024_v34 }
 0x158   :  { %v1483_v7 = vpop.f32.mrf.mxu0 }
 0x159   :  { %v1604_v14 = vpack.c.bf16 %v1588_v2, %v1588_v2  ;;  %v1482_v9 = vadd.f32 %v1481_v51, %v1433_v5 }
 0x15b   :  { %1621 = vst.msk [vmem:[#allocation3] sm:$0xf] %vm1620_vm1, %v1604_v14  ;;  %v1518_v16 = vadd.f32 %v1482_v9, %v37_v3  ;;  %v41_v9 = vld [vmem:[#allocation2 + $0x30] sm:$0xff] }
 0x15c   :  { %v1553_v17 = vld [vmem:[#allocation2 + $0x8] sm:$0xff]  ;;  %v1385_v6 = vpop.f32.mrf.mxu2 }
 0x15d   :  { %v1573_v19 = vadd.f32 %v2443_v52, %v1553_v17  ;;  %1535 = vst.msk [vmem:[#allocation2 + $0x10] sm:$0xff] %vm18_vm0, %v1518_v16  ;;  %v1386_v20 = vadd.f32 %v1385_v6, %v1337_v15 }
 0x15e   :  { %v1434_v12 = vpop.f32.mrf.mxu3  ;;  %v1339_v10 = vpop.f32.mrf.mxu1 }
 0x15f   :  { %v1589_v24 = vmax.f32 %v1573_v19, 0.0  ;;  %v1435_v25 = vadd.f32 %v1434_v12, %v1386_v20  ;;  %v1340_v32 = vadd.f32 %v1339_v10, %v3033_v44 }
 0x160   :  { %v1486_v27 = vpop.f32.mrf.mxu0 }
 0x161   :  { %v1605_v29 = vpack.c.bf16 %v1589_v24, %v1589_v24  ;;  %v1484_v30 = vadd.f32 %v1483_v7, %v1435_v25  ;;  %v42_v25 = vld [vmem:[#allocation2 + $0x38] sm:$0xff] }
 0x162   :  { %v1655_v31 = vld [vmem:[#allocation3] sm:$0xf] }
 0x163   :  { %1656 = vst [vmem:[%s3251_s3] sm:$0xf] %v1655_v31  ;;  %v1519_v34 = vadd.f32 %v1484_v30, %v38_v28 }
 0x164   :  { %1622 = vst.msk [vmem:[#allocation3 + $0x4] sm:$0xf] %vm1620_vm1, %v1605_v29  ;;  %v1554_v33 = vld [vmem:[#allocation2 + $0x10] sm:$0xff]  ;;  %v1388_v11 = vpop.f32.mrf.mxu2 }
 0x165   :  { %v1574_v36 = vadd.f32 %v2443_v52, %v1554_v33  ;;  %1536 = vst.msk [vmem:[#allocation2 + $0x18] sm:$0xff] %vm18_vm0, %v1519_v34  ;;  %v1389_v38 = vadd.f32 %v1388_v11, %v1340_v32  ;;  %v43_v11 = vld [vmem:[#allocation2 + $0x40] sm:$0xff] }
 0x166   :  { %v1437_v22 = vpop.f32.mrf.mxu3  ;;  %v1341_v39 = vpop.f32.mrf.mxu1 }
 0x167   :  { %v1590_v41 = vmax.f32 %v1574_v36, 0.0  ;;  %v1438_v43 = vadd.f32 %v1437_v22, %v1389_v38  ;;  %v1342_v54 = vadd.f32 %v1341_v39, %v3054_v4 }
 0x168   :  { %v1488_v50 = vpop.f32.mrf.mxu0 }
 0x169   :  { %v1606_v46 = vpack.c.bf16 %v1590_v41, %v1590_v41  ;;  %v1487_v23 = vadd.f32 %v1486_v27, %v1438_v43 }
 0x16b   :  { %v1657_v56 = vld [vmem:[#allocation3 + $0x4] sm:$0xf]  ;;  %1623 = vst.msk [vmem:[#allocation3 + $0x8] sm:$0xf] %vm1620_vm1, %v1606_v46  ;;  %v1520_v44 = vadd.f32 %v1487_v23, %v39_v45  ;;  %v44_v46 = vld [vmem:[#allocation2 + $0x48] sm:$0xff] }
 0x16c   :  { %1658 = vst [vmem:[%s3251_s3 + $0x4] sm:$0xf] %v1657_v56  ;;  %v1555_v48 = vld [vmem:[#allocation2 + $0x18] sm:$0xff]  ;;  %v1390_v49 = vpop.f32.mrf.mxu2 }
 0x16d   :  { %v1575_v55 = vadd.f32 %v2443_v52, %v1555_v48  ;;  %1537 = vst.msk [vmem:[#allocation2 + $0x20] sm:$0xff] %vm18_vm0, %v1520_v44  ;;  %v1391_v51 = vadd.f32 %v1390_v49, %v1342_v54 }
 0x16e   :  { %v1439_v40 = vpop.f32.mrf.mxu3  ;;  %v1344_v53 = vpop.f32.mrf.mxu1 }
 0x16f   :  { %v1591_v58 = vmax.f32 %v1575_v55, 0.0  ;;  %v1440_v59 = vadd.f32 %v1439_v40, %v1391_v51  ;;  %v1345_v1 = vadd.f32 %v1344_v53, %v3063_v18  ;;  %v45_v51 = vld [vmem:[#allocation2 + $0x50] sm:$0xff] }
 0x170   :  { %v1491_v60 = vpop.f32.mrf.mxu0 }
 0x171   :  { %v1607_v62 = vpack.c.bf16 %v1591_v58, %v1591_v58  ;;  %v1489_v63 = vadd.f32 %v1488_v50, %v1440_v59 }
 0x172   :  { %v1659_v0 = vld [vmem:[#allocation3 + $0x8] sm:$0xf] }
 0x173   :  { %1660 = vst [vmem:[%s3251_s3 + $0x8] sm:$0xf] %v1659_v0  ;;  %v1521_v4 = vadd.f32 %v1489_v63, %v40_v61  ;;  %v46_v0 = vld [vmem:[#allocation2 + $0x58] sm:$0xff] }
 0x174   :  { %1624 = vst.msk [vmem:[#allocation3 + $0xc] sm:$0xf] %vm1620_vm1, %v1607_v62  ;;  %v1393_v52 = vpop.f32.mrf.mxu2 }
 0x175   :  { %1538 = vst.msk [vmem:[#allocation2 + $0x28] sm:$0xff] %vm18_vm0, %v1521_v4  ;;  %v1394_v2 = vadd.f32 %v1393_v52, %v1345_v1 }
 0x176   :  { %v1442_v5 = vpop.f32.mrf.mxu3  ;;  %v1346_v7 = vpop.f32.mrf.mxu1 }
 0x177   :  { %v1443_v3 = vadd.f32 %v1442_v5, %v1394_v2  ;;  %v1347_v6 = vadd.f32 %v1346_v7, %v3083_v37 }
 0x178   :  { %v1493_v14 = vpop.f32.mrf.mxu0 }
 0x179   :  { %v1492_v16 = vadd.f32 %v1491_v60, %v1443_v3 }
 0x17b   :  { %v1661_v15 = vld [vmem:[#allocation3 + $0xc] sm:$0xf]  ;;  %v1522_v17 = vadd.f32 %v1492_v16, %v41_v9  ;;  %v47_v9 = vld [vmem:[#allocation2 + $0x60] sm:$0xff] }
 0x17c   :  { %1662 = vst [vmem:[%s3251_s3 + $0xc] sm:$0xf] %v1661_v15  ;;  %v1395_v18 = vpop.f32.mrf.mxu2 }
 0x17d   :  { %1539 = vst.msk [vmem:[#allocation2 + $0x30] sm:$0xff] %vm18_vm0, %v1522_v17  ;;  %v1396_v19 = vadd.f32 %v1395_v18, %v1347_v6 }
 0x17e   :  { %v1444_v20 = vpop.f32.mrf.mxu3  ;;  %v1349_v12 = vpop.f32.mrf.mxu1 }
 0x17f   :  { %v1445_v10 = vadd.f32 %v1444_v20, %v1396_v19  ;;  %v1350_v29 = vadd.f32 %v1349_v12, %v3092_v47 }
 0x180   :  { %v1496_v24 = vpop.f32.mrf.mxu0 }
 0x181   :  { %v1494_v27 = vadd.f32 %v1493_v14, %v1445_v10  ;;  %v48_v10 = vld [vmem:[#allocation2 + $0x68] sm:$0xff] }
 0x183   :  { %v1523_v28 = vadd.f32 %v1494_v27, %v42_v25 }
 0x184   :  { %v1398_v30 = vpop.f32.mrf.mxu2 }
 0x185   :  { %1540 = vst.msk [vmem:[#allocation2 + $0x38] sm:$0xff] %vm18_vm0, %v1523_v28  ;;  %v1399_v37 = vadd.f32 %v1398_v30, %v1350_v29 }
 0x186   :  { %v1447_v31 = vpop.f32.mrf.mxu3  ;;  %v1351_v34 = vpop.f32.mrf.mxu1 }
 0x187   :  { %v1448_v32 = vadd.f32 %v1447_v31, %v1399_v37  ;;  %v1352_v22 = vadd.f32 %v1351_v34, %v3113_v8  ;;  %v49_v31 = vld [vmem:[#allocation2 + $0x70] sm:$0xff] }
 0x188   :  { %v1498_v33 = vpop.f32.mrf.mxu0 }
 0x189   :  { %v1497_v36 = vadd.f32 %v1496_v24, %v1448_v32 }
 0x18b   :  { %v1524_v38 = vadd.f32 %v1497_v36, %v43_v11 }
 0x18c   :  { %v1400_v39 = vpop.f32.mrf.mxu2 }
 0x18d   :  { %1541 = vst.msk [vmem:[#allocation2 + $0x40] sm:$0xff] %vm18_vm0, %v1524_v38  ;;  %v1401_v41 = vadd.f32 %v1400_v39, %v1352_v22 }
 0x18e   :  { %v1449_v43 = vpop.f32.mrf.mxu3  ;;  %v1354_v50 = vpop.f32.mrf.mxu1 }
 0x18f   :  { %v1450_v47 = vadd.f32 %v1449_v43, %v1401_v41  ;;  %v1355_v44 = vadd.f32 %v1354_v50, %v3122_v21  ;;  %v50_v41 = vld [vmem:[#allocation2 + $0x78] sm:$0xff] }
 0x190   :  { %v1501_v45 = vpop.f32.mrf.mxu0 }
 0x191   :  { %v1499_v23 = vadd.f32 %v1498_v33, %v1450_v47 }
 0x193   :  { %v1525_v56 = vadd.f32 %v1499_v23, %v44_v46 }
 0x194   :  { %v1403_v54 = vpop.f32.mrf.mxu2 }
 0x195   :  { %1542 = vst.msk [vmem:[#allocation2 + $0x48] sm:$0xff] %vm18_vm0, %v1525_v56  ;;  %v1404_v48 = vadd.f32 %v1403_v54, %v1355_v44 }
 0x196   :  { %v1452_v49 = vpop.f32.mrf.mxu3  ;;  %v1356_v55 = vpop.f32.mrf.mxu1 }
 0x197   :  { %v1453_v8 = vadd.f32 %v1452_v49, %v1404_v48  ;;  %v1357_v59 = vadd.f32 %v1356_v55, %v3143_v42 }
 0x198   :  { %v1503_v40 = vpop.f32.mrf.mxu0 }
 0x199   :  { %v1502_v53 = vadd.f32 %v1501_v45, %v1453_v8 }
 0x19b   :  { %v1526_v58 = vadd.f32 %v1502_v53, %v45_v51 }
 0x19c   :  { %v1405_v60 = vpop.f32.mrf.mxu2 }
 0x19d   :  { %1543 = vst.msk [vmem:[#allocation2 + $0x50] sm:$0xff] %vm18_vm0, %v1526_v58  ;;  %v1406_v61 = vadd.f32 %v1405_v60, %v1357_v59 }
 0x19e   :  { %v1454_v62 = vpop.f32.mrf.mxu3  ;;  %v1359_v63 = vpop.f32.mrf.mxu1 }
 0x19f   :  { %v1455_v21 = vadd.f32 %v1454_v62, %v1406_v61  ;;  %v1360_v2 = vadd.f32 %v1359_v63, %v3164_v57 }
 0x1a0   :  { %v1506_v1 = vpop.f32.mrf.mxu0 }
 0x1a1   :  { %v1504_v4 = vadd.f32 %v1503_v40, %v1455_v21 }
 0x1a3   :  { %v1527_v52 = vadd.f32 %v1504_v4, %v46_v0 }
 0x1a4   :  { %v1408_v5 = vpop.f32.mrf.mxu2 }
 0x1a5   :  { %1544 = vst.msk [vmem:[#allocation2 + $0x58] sm:$0xff] %vm18_vm0, %v1527_v52  ;;  %v1409_v7 = vadd.f32 %v1408_v5, %v1360_v2 }
 0x1a6   :  { %v1457_v3 = vpop.f32.mrf.mxu3  ;;  %v1361_v14 = vpop.f32.mrf.mxu1 }
 0x1a7   :  { %v1458_v42 = vadd.f32 %v1457_v3, %v1409_v7  ;;  %v1362_v17 = vadd.f32 %v1361_v14, %v3187_v13 }
 0x1a8   :  { %v1508_v6 = vpop.f32.mrf.mxu0 }
 0x1a9   :  { %v1507_v16 = vadd.f32 %v1506_v1, %v1458_v42 }
 0x1ab   :  { %v1528_v15 = vadd.f32 %v1507_v16, %v47_v9 }
 0x1ac   :  { %v1410_v18 = vpop.f32.mrf.mxu2 }
 0x1ad   :  { %1545 = vst.msk [vmem:[#allocation2 + $0x60] sm:$0xff] %vm18_vm0, %v1528_v15  ;;  %v1411_v19 = vadd.f32 %v1410_v18, %v1362_v17 }
 0x1ae   :  { %v1459_v20 = vpop.f32.mrf.mxu3  ;;  %v1364_v12 = vpop.f32.mrf.mxu1 }
 0x1af   :  { %v1460_v57 = vadd.f32 %v1459_v20, %v1411_v19  ;;  %v1365_v27 = vadd.f32 %v1364_v12, %v3192_v26 }
 0x1b0   :  { %v1511_v37 = vpop.f32.mrf.mxu0 }
 0x1b1   :  { %v1509_v24 = vadd.f32 %v1508_v6, %v1460_v57 }
 0x1b3   :  { %v1529_v25 = vadd.f32 %v1509_v24, %v48_v10 }
 0x1b4   :  { %v1413_v28 = vpop.f32.mrf.mxu2 }
 0x1b5   :  { %1546 = vst.msk [vmem:[#allocation2 + $0x68] sm:$0xff] %vm18_vm0, %v1529_v25  ;;  %v1414_v29 = vadd.f32 %v1413_v28, %v1365_v27 }
 0x1b6   :  { %v1462_v30 = vpop.f32.mrf.mxu3  ;;  %v1366_v34 = vpop.f32.mrf.mxu1 }
 0x1b7   :  { %v1463_v13 = vadd.f32 %v1462_v30, %v1414_v29  ;;  %v1367_v11 = vadd.f32 %v1366_v34, %v3195_v35 }
 0x1b8   :  { %v1513_v26 = vpop.f32.mrf.mxu0 }
 0x1b9   :  { %v1512_v32 = vadd.f32 %v1511_v37, %v1463_v13 }
 0x1bb   :  { %v1530_v33 = vadd.f32 %v1512_v32, %v49_v31 }
 0x1bc   :  { %v1415_v36 = vpop.f32.mrf.mxu2 }
 0x1bd   :  { %1547 = vst.msk [vmem:[#allocation2 + $0x70] sm:$0xff] %vm18_vm0, %v1530_v33  ;;  %v1416_v38 = vadd.f32 %v1415_v36, %v1367_v11 }
 0x1be   :  { %v1464_v22 = vpop.f32.mrf.mxu3 }
 0x1bf   :  { %v1465_v39 = vadd.f32 %v1464_v22, %v1416_v38 }
 0x1c1   :  { %v1514_v43 = vadd.f32 %v1513_v26, %v1465_v39 }
 0x1c3   :  { %v1531_v50 = vadd.f32 %v1514_v43, %v50_v41 }
 0x1c5   :  { %1548 = vst.msk [vmem:[#allocation2 + $0x78] sm:$0xff] %vm18_vm0, %v1531_v50 }

// kernel: deeplab_forward.18
= control target key start
LH: loop header
LB: loop body
LE: loop exit
PB: predicated region body
PF: predicated region fallthrough
CT: control target
= control target key end

     0   :  { %vm19_vm0 = vcmask 523264   ;;  %vm639_vm1 = vcmask 519168   ;;  %s1289_s0 = inlined_call_operand.vmem [shape: bf16[32,320], index: 0, kind: input, shape index: {}]   ;;  %s1290_s1 = inlined_call_operand.vmem [shape: bf16[320,64], index: 1, kind: input, shape index: {}]   ;;  %s1291_s2 = inlined_call_operand.vmem [shape: f32[1,64], index: 2, kind: input, shape index: {}]   ;;  %s1292_s3 = inlined_call_operand.vmem [shape: bf16[32,64], index: 3, kind: output, shape index: {}]  }
   0x1   :  { %v932_v0 = vld [vmem:[%s1290_s1 + $0x38] sm:$0xff]  ;;  %v931_v3 = vld [vmem:[%s1290_s1 + $0x30] sm:$0xff]  ;;  %v930_v6 = vld [vmem:[%s1290_s1 + $0x28] sm:$0xff] }
   0x2   :  { %v994_v1 = vld [vmem:[%s1290_s1 + $0x78] sm:$0xff]  ;;  %389 = vmatpush.bf16.msra.mxu0 %v932_v0  ;;  %945 = vmatpush.bf16.msra.mxu3 %v932_v0  ;;  %v939_v4 = vld [vmem:[%s1290_s1 + $0x70] sm:$0xff]  ;;  %v938_v7 = vld [vmem:[%s1290_s1 + $0x68] sm:$0xff] }
   0x3   :  { %v999_v2 = vld [vmem:[%s1290_s1 + $0x98] sm:$0xff]  ;;  %438 = vmatpush.bf16.msra.mxu1 %v994_v1  ;;  %v1012_v5 = vld [vmem:[%s1290_s1 + $0x90] sm:$0xff]  ;;  %v1024_v8 = vld [vmem:[%s1290_s1 + $0x88] sm:$0xff] }
   0x4   :  { %491 = vmatpush.bf16.msra.mxu2 %v999_v2  ;;  %v929_v9 = vld [vmem:[%s1290_s1 + $0x20] sm:$0xff]  ;;  %v727_v12 = vld [vmem:[%s1289_s0 + $0x8] sm:$0xf]  ;;  %v903_v13 = vld [vmem:[%s1289_s0 + $0x10] sm:$0xf0] }
   0x5   :  { %v937_v10 = vld [vmem:[%s1290_s1 + $0x60] sm:$0xff]  ;;  %v728_v14 = vor.u32 %v903_v13, %v727_v12  ;;  %v928_v15 = vld [vmem:[%s1290_s1 + $0x18] sm:$0xff]  ;;  %v927_v17 = vld [vmem:[%s1290_s1 + $0x10] sm:$0xff] }
   0x6   :  { %390 = vmatpush.bf16.msra.mxu0 %v931_v3  ;;  %946 = vmatpush.bf16.msra.mxu3 %v931_v3  ;;  %v1036_v11 = vld [vmem:[%s1290_s1 + $0x80] sm:$0xff]  ;;  %v936_v16 = vld [vmem:[%s1290_s1 + $0x58] sm:$0xff]  ;;  %v935_v18 = vld [vmem:[%s1290_s1 + $0x50] sm:$0xff] }
   0x7   :  { %439 = vmatpush.bf16.msra.mxu1 %v939_v4  ;;  %v926_v19 = vld [vmem:[%s1290_s1 + $0x8] sm:$0xff]  ;;  %v925_v21 = vld [vmem:[%s1290_s1] sm:$0xff]  ;;  %v791_v25 = vld [vmem:[%s1289_s0 + $0x90] sm:$0xf] }
   0x8   :  { %492 = vmatpush.bf16.msra.mxu2 %v1012_v5  ;;  %v934_v20 = vld [vmem:[%s1290_s1 + $0x48] sm:$0xff]  ;;  %v933_v22 = vld [vmem:[%s1290_s1 + $0x40] sm:$0xff]  ;;  %v920_v26 = vld [vmem:[%s1289_s0 + $0x98] sm:$0xf0] }
   0x9   :  { %v719_v23 = vld [vmem:[%s1289_s0] sm:$0xf]  ;;  %v902_v24 = vld [vmem:[%s1289_s0 + $0x8] sm:$0xf0]  ;;  %v901_v27 = vld [vmem:[%s1289_s0 + $0x4] sm:$0xf]  ;;  %v792_v32 = vor.u32 %v920_v26, %v791_v25 }
   0xa   :  { %391 = vmatpush.bf16.msra.mxu0 %v930_v6  ;;  %947 = vmatpush.bf16.msra.mxu3 %v930_v6  ;;  %v721_v28 = vld [vmem:[%s1289_s0 + $0xc] sm:$0xf0]  ;;  %v739_v29 = vld [vmem:[%s1289_s0 + $0x20] sm:$0xf]  ;;  %v906_v30 = vld [vmem:[%s1289_s0 + $0x28] sm:$0xf0]  ;;  %v720_v31 = vor.u32 %v902_v24, %v719_v23 }
   0xb   :  { %440 = vmatpush.bf16.msra.mxu1 %v938_v7  ;;  %v724_v33 = vor.u32 %v901_v27, %v721_v28  ;;  %v740_v34 = vor.u32 %v906_v30, %v739_v29  ;;  %v731_v35 = vld [vmem:[%s1289_s0 + $0x18] sm:$0xf]  ;;  %v905_v36 = vld [vmem:[%s1289_s0 + $0x20] sm:$0xf0]  ;;  %v803_v37 = vld [vmem:[%s1289_s0 + $0xa8] sm:$0xf] }
   0xc   :  { %493 = vmatpush.bf16.msra.mxu2 %v1024_v8  ;;  %v923_v38 = vld [vmem:[%s1289_s0 + $0xb0] sm:$0xf0]  ;;  %v904_v39 = vld [vmem:[%s1289_s0 + $0x1c] sm:$0xf]  ;;  %v733_v40 = vld [vmem:[%s1289_s0 + $0x24] sm:$0xf0]  ;;  %v732_v43 = vor.u32 %v905_v36, %v731_v35 }
   0xd   :  { %v751_v41 = vld [vmem:[%s1289_s0 + $0x38] sm:$0xf]  ;;  %v909_v42 = vld [vmem:[%s1289_s0 + $0x40] sm:$0xf0]  ;;  %v804_v44 = vor.u32 %v923_v38, %v803_v37  ;;  %v736_v45 = vor.u32 %v904_v39, %v733_v40  ;;  %v743_v47 = vld [vmem:[%s1289_s0 + $0x30] sm:$0xf] }
   0xe   :  { %392 = vmatpush.bf16.msra.mxu0 %v929_v9  ;;  %948 = vmatpush.bf16.msra.mxu3 %v929_v9  ;;  %v752_v46 = vor.u32 %v909_v42, %v751_v41  ;;  %v908_v48 = vld [vmem:[%s1289_s0 + $0x38] sm:$0xf0]  ;;  %v907_v49 = vld [vmem:[%s1289_s0 + $0x34] sm:$0xf]  ;;  %v745_v50 = vld [vmem:[%s1289_s0 + $0x3c] sm:$0xf0] }
   0xf   :  { %441 = vmatpush.bf16.msra.mxu1 %v937_v10  ;;  %v919_v51 = vld [vmem:[%s1289_s0 + $0x94] sm:$0xf]  ;;  %v793_v52 = vld [vmem:[%s1289_s0 + $0x9c] sm:$0xf0]  ;;  %v763_v53 = vld [vmem:[%s1289_s0 + $0x50] sm:$0xf]  ;;  %v744_v55 = vor.u32 %v908_v48, %v743_v47  ;;  %v748_v56 = vor.u32 %v907_v49, %v745_v50 }
  0x10   :  { %494 = vmatpush.bf16.msra.mxu2 %v1036_v11  ;;  %v912_v54 = vld [vmem:[%s1289_s0 + $0x58] sm:$0xf0]  ;;  %v796_v57 = vor.u32 %v919_v51, %v793_v52  ;;  %v755_v59 = vld [vmem:[%s1289_s0 + $0x48] sm:$0xf]  ;;  %v911_v60 = vld [vmem:[%s1289_s0 + $0x50] sm:$0xf0] }
  0x11   :  { %v764_v58 = vor.u32 %v912_v54, %v763_v53  ;;  %v910_v61 = vld [vmem:[%s1289_s0 + $0x4c] sm:$0xf]  ;;  %v757_v62 = vld [vmem:[%s1289_s0 + $0x54] sm:$0xf0]  ;;  %v756_v3 = vor.u32 %v911_v60, %v755_v59  ;;  %v913_v9 = vld [vmem:[%s1289_s0 + $0x64] sm:$0xf] }
  0x12   :  { %393 = vmatpush.bf16.msra.mxu0 %v928_v15  ;;  %949 = vmatpush.bf16.msra.mxu3 %v928_v15  ;;  %v922_v63 = vld [vmem:[%s1289_s0 + $0xac] sm:$0xf]  ;;  %v805_v0 = vld [vmem:[%s1289_s0 + $0xb4] sm:$0xf0]  ;;  %v924_v12 = vld [vmem:[%s1289_s0 + $0xb8] sm:$0xf0] }
  0x13   :  { %893 = vmatmul.msk.bf16.vlgmr.msra.gmra.mxu2 %vm19_vm0, %v728_v14  ;;  %442 = vmatpush.bf16.msra.mxu1 %v936_v16  ;;  %v787_v13 = vld [vmem:[%s1289_s0 + $0x80] sm:$0xf]  ;;  %v918_v14 = vld [vmem:[%s1289_s0 + $0x88] sm:$0xf0]  ;;  %v799_v23 = vld [vmem:[%s1289_s0 + $0x98] sm:$0xf] }
  0x14   :  { %v921_v24 = vld [vmem:[%s1289_s0 + $0xa0] sm:$0xf0]  ;;  %v967_v28 = vmov 0.0  }
  0x15   :  { %v800_v27 = vor.u32 %v921_v24, %v799_v23  ;;  %20 = vst.msk [vmem:[#allocation2] sm:$0xff] %vm19_vm0, %v967_v28 }
  0x16   :  { %394 = vmatpush.bf16.msra.mxu0 %v927_v17  ;;  %950 = vmatpush.bf16.msra.mxu3 %v927_v17  ;;  %21 = vst.msk [vmem:[#allocation2 + $0x8] sm:$0xff] %vm19_vm0, %v967_v28 }
  0x17   :  { %443 = vmatpush.bf16.msra.mxu1 %v935_v18  ;;  %22 = vst.msk [vmem:[#allocation2 + $0x10] sm:$0xff] %vm19_vm0, %v967_v28 }
  0x18   :  { %23 = vst.msk [vmem:[#allocation2 + $0x18] sm:$0xff] %vm19_vm0, %v967_v28 }
  0x19   :  { %24 = vst.msk [vmem:[#allocation2 + $0x20] sm:$0xff] %vm19_vm0, %v967_v28 }
  0x1a   :  { %395 = vmatpush.bf16.msra.mxu0 %v926_v19  ;;  %951 = vmatpush.bf16.msra.mxu3 %v926_v19  ;;  %v779_v19 = vld [vmem:[%s1289_s0 + $0x78] sm:$0xf]  ;;  %25 = vst.msk [vmem:[#allocation2 + $0x28] sm:$0xff] %vm19_vm0, %v967_v28 }
  0x1b   :  { %444 = vmatpush.bf16.msra.mxu1 %v934_v20  ;;  %26 = vst.msk [vmem:[#allocation2 + $0x30] sm:$0xff] %vm19_vm0, %v967_v28 }
  0x1c   :  { %27 = vst.msk [vmem:[#allocation2 + $0x38] sm:$0xff] %vm19_vm0, %v967_v28 }
  0x1d   :  { %28 = vst.msk [vmem:[#allocation2 + $0x40] sm:$0xff] %vm19_vm0, %v967_v28  ;;  %v37_v42 = vld [vmem:[#allocation2 + $0x8] sm:$0xff] }
  0x1e   :  { %396 = vmatpush.bf16.msra.mxu0 %v925_v21  ;;  %952 = vmatpush.bf16.msra.mxu3 %v925_v21  ;;  %v916_v21 = vld [vmem:[%s1289_s0 + $0x7c] sm:$0xf]  ;;  %29 = vst.msk [vmem:[#allocation2 + $0x48] sm:$0xff] %vm19_vm0, %v967_v28  ;;  %v38_v54 = vld [vmem:[#allocation2 + $0x10] sm:$0xff] }
  0x1f   :  { %445 = vmatpush.bf16.msra.mxu1 %v933_v22  ;;  %30 = vst.msk [vmem:[#allocation2 + $0x50] sm:$0xff] %vm19_vm0, %v967_v28 }
  0x20   :  { %31 = vst.msk [vmem:[#allocation2 + $0x58] sm:$0xff] %vm19_vm0, %v967_v28 }
  0x21   :  { %397 = vmatmul.bf16.vlgmr.msra.gmra.mxu0 %v720_v31  ;;  %427 = vmatmul.bf16.vlgmr.msra.gmra.mxu3 %v792_v32  ;;  %32 = vst.msk [vmem:[#allocation2 + $0x60] sm:$0xff] %vm19_vm0, %v967_v28 }
  0x22   :  { %953 = vmatpush.bf16.msrb.mxu3 %v994_v1  ;;  %446 = vmatmul.bf16.vlgmr.msra.gmra.mxu1 %v724_v33  ;;  %v775_v1 = vld [vmem:[%s1289_s0 + $0x68] sm:$0xf]  ;;  %33 = vst.msk [vmem:[#allocation2 + $0x68] sm:$0xff] %vm19_vm0, %v967_v28 }
  0x23   :  { %894 = vmatmul.msk.bf16.gmra.mxu2 %vm19_vm0, %v740_v34  ;;  %34 = vst.msk [vmem:[#allocation2 + $0x70] sm:$0xff] %vm19_vm0, %v967_v28  ;;  %v36_v34 = vld [vmem:[#allocation2] sm:$0xff] }
  0x24   :  { %35 = vst.msk [vmem:[#allocation2 + $0x78] sm:$0xff] %vm19_vm0, %v967_v28  ;;  %v41_v28 = vld [vmem:[#allocation2 + $0x28] sm:$0xff] }
  0x26   :  { %954 = vmatpush.bf16.msrb.mxu3 %v939_v4  ;;  %v760_v4 = vor.u32 %v910_v61, %v757_v62 }
  0x2a   :  { %955 = vmatpush.bf16.msrb.mxu3 %v938_v7  ;;  %v767_v7 = vld [vmem:[%s1289_s0 + $0x60] sm:$0xf] }
  0x2e   :  { %956 = vmatpush.bf16.msrb.mxu3 %v937_v10  ;;  %v769_v10 = vld [vmem:[%s1289_s0 + $0x6c] sm:$0xf0] }
  0x31   :  { %402 = vmatmul.bf16.gmra.mxu0 %v732_v43  ;;  %432 = vmatmul.bf16.gmra.mxu3 %v804_v44  ;;  %v966_v43 = vld [vmem:[%s1291_s2] ss:$0 sm:$0xff] }
  0x32   :  { %957 = vmatpush.bf16.msrb.mxu3 %v936_v16  ;;  %451 = vmatmul.bf16.gmra.mxu1 %v736_v45  ;;  %v772_v16 = vor.u32 %v913_v9, %v769_v10 }
  0x33   :  { %895 = vmatmul.msk.bf16.gmra.mxu2 %vm19_vm0, %v752_v46 }
  0x36   :  { %958 = vmatpush.bf16.msrb.mxu3 %v935_v18  ;;  %v788_v18 = vor.u32 %v918_v14, %v787_v13 }
  0x3a   :  { %959 = vmatpush.bf16.msrb.mxu3 %v934_v20  ;;  %v917_v20 = vld [vmem:[%s1289_s0 + $0x80] sm:$0xf0] }
  0x3b   :  { %v780_v25 = vor.u32 %v917_v20, %v779_v19 }
  0x3e   :  { %960 = vmatpush.bf16.msrb.mxu3 %v933_v22  ;;  %v781_v22 = vld [vmem:[%s1289_s0 + $0x84] sm:$0xf0] }
  0x3f   :  { %v784_v26 = vor.u32 %v916_v21, %v781_v22 }
  0x41   :  { %407 = vmatmul.bf16.gmra.mxu0 %v744_v55  ;;  %476 = vmatmul.bf16.vlgmr.msrb.gmra.mxu3 %v796_v57 }
  0x42   :  { %961 = vmatpush.bf16.msra.mxu3 %v999_v2  ;;  %456 = vmatmul.bf16.gmra.mxu1 %v748_v56  ;;  %v915_v2 = vld [vmem:[%s1289_s0 + $0x70] sm:$0xf0] }
  0x43   :  { %896 = vmatmul.msk.bf16.gmra.mxu2 %vm19_vm0, %v764_v58  ;;  %v776_v6 = vor.u32 %v915_v2, %v775_v1  ;;  %v39_v2 = vld [vmem:[#allocation2 + $0x18] sm:$0xff] }
  0x46   :  { %962 = vmatpush.bf16.msra.mxu3 %v1012_v5  ;;  %v808_v5 = vor.u32 %v922_v63, %v805_v0 }
  0x4a   :  { %963 = vmatpush.bf16.msra.mxu3 %v1024_v8  ;;  %v914_v8 = vld [vmem:[%s1289_s0 + $0x68] sm:$0xf0] }
  0x4b   :  { %v768_v15 = vor.u32 %v914_v8, %v767_v7 }
  0x4e   :  { %964 = vmatpush.bf16.msra.mxu3 %v1036_v11  ;;  %v811_v11 = vld [vmem:[%s1289_s0 + $0xb0] sm:$0xf] }
  0x4f   :  { %v812_v17 = vor.u32 %v924_v12, %v811_v11 }
  0x51   :  { %412 = vmatmul.bf16.gmra.mxu0 %v756_v3  ;;  %481 = vmatmul.bf16.gmra.mxu3 %v808_v5 }
  0x52   :  { %461 = vmatmul.bf16.gmra.mxu1 %v760_v4 }
  0x53   :  { %897 = vmatmul.msk.bf16.gmra.mxu2 %vm19_vm0, %v776_v6 }
  0x61   :  { %417 = vmatmul.bf16.gmra.mxu0 %v768_v15  ;;  %900 = vmatmul.msk.bf16.vlgmr.msra.gmra.mxu3 %vm19_vm0, %v812_v17  ;;  %v40_v15 = vld [vmem:[#allocation2 + $0x20] sm:$0xff] }
  0x62   :  { %466 = vmatmul.bf16.gmra.mxu1 %v772_v16 }
  0x63   :  { %898 = vmatmul.msk.bf16.gmra.mxu2 %vm19_vm0, %v788_v18 }
  0x71   :  { %422 = vmatmul.bf16.gmra.mxu0 %v780_v25 }
  0x72   :  { %471 = vmatmul.bf16.gmra.mxu1 %v784_v26 }
  0x73   :  { %899 = vmatmul.msk.bf16.gmra.mxu2 %vm19_vm0, %v800_v27 }
  0x96   :  { %v496_v29 = vpop.f32.mrf.mxu2 }
  0x9e   :  { %v498_v30 = vpop.f32.mrf.mxu2  ;;  %v398_v31 = vpop.f32.mrf.mxu0 }
  0x9f   :  { %v447_v32 = vpop.f32.mrf.mxu1 }
  0xa0   :  { %v448_v33 = vadd.f32 %v447_v32, %v398_v31 }
  0xa2   :  { %v497_v35 = vadd.f32 %v496_v29, %v448_v33 }
  0xa4   :  { %v536_v36 = vadd.f32 %v497_v35, %v36_v34  ;;  %v1236_v37 = vpop.f32.mrf.mxu3 }
  0xa6   :  { %552 = vst.msk [vmem:[#allocation2] sm:$0xff] %vm19_vm0, %v536_v36  ;;  %v501_v38 = vpop.f32.mrf.mxu2  ;;  %v400_v39 = vpop.f32.mrf.mxu0 }
  0xa7   :  { %v449_v40 = vpop.f32.mrf.mxu1 }
  0xa8   :  { %v450_v41 = vadd.f32 %v449_v40, %v400_v39  ;;  %v42_v39 = vld [vmem:[#allocation2 + $0x30] sm:$0xff] }
  0xaa   :  { %v499_v44 = vadd.f32 %v498_v30, %v450_v41 }
  0xac   :  { %v537_v45 = vadd.f32 %v499_v44, %v37_v42  ;;  %v1242_v47 = vpop.f32.mrf.mxu3 }
  0xad   :  { %v571_v46 = vld [vmem:[#allocation2] sm:$0xff] }
  0xae   :  { %v591_v48 = vadd.f32 %v966_v43, %v571_v46  ;;  %553 = vst.msk [vmem:[#allocation2 + $0x8] sm:$0xff] %vm19_vm0, %v537_v45  ;;  %v503_v49 = vpop.f32.mrf.mxu2  ;;  %v403_v50 = vpop.f32.mrf.mxu0 }
  0xaf   :  { %v452_v51 = vpop.f32.mrf.mxu1 }
  0xb0   :  { %v607_v52 = vmax.f32 %v591_v48, 0.0  ;;  %v453_v53 = vadd.f32 %v452_v51, %v403_v50 }
  0xb2   :  { %v623_v55 = vpack.c.bf16 %v607_v52, %v607_v52  ;;  %v502_v56 = vadd.f32 %v501_v38, %v453_v53 }
  0xb4   :  { %640 = vst.msk [vmem:[#allocation3] sm:$0xf] %vm639_vm1, %v623_v55  ;;  %v538_v57 = vadd.f32 %v502_v56, %v38_v54  ;;  %v1246_v59 = vpop.f32.mrf.mxu3 }
  0xb5   :  { %v572_v58 = vld [vmem:[#allocation2 + $0x8] sm:$0xff] }
  0xb6   :  { %v592_v60 = vadd.f32 %v966_v43, %v572_v58  ;;  %554 = vst.msk [vmem:[#allocation2 + $0x10] sm:$0xff] %vm19_vm0, %v538_v57  ;;  %v506_v61 = vpop.f32.mrf.mxu2  ;;  %v405_v62 = vpop.f32.mrf.mxu0  ;;  %v44_v57 = vld [vmem:[#allocation2 + $0x40] sm:$0xff] }
  0xb7   :  { %v454_v63 = vpop.f32.mrf.mxu1 }
  0xb8   :  { %v608_v0 = vmax.f32 %v592_v60, 0.0  ;;  %v455_v1 = vadd.f32 %v454_v63, %v405_v62  ;;  %v50_v62 = vld [vmem:[#allocation2 + $0x70] sm:$0xff] }
  0xba   :  { %v624_v3 = vpack.c.bf16 %v608_v0, %v608_v0  ;;  %v504_v4 = vadd.f32 %v503_v49, %v455_v1  ;;  %v43_v49 = vld [vmem:[#allocation2 + $0x38] sm:$0xff] }
  0xbb   :  { %v674_v5 = vld [vmem:[#allocation3] sm:$0xf] }
  0xbc   :  { %675 = vst [vmem:[%s1292_s3] sm:$0xf] %v674_v5  ;;  %v539_v6 = vadd.f32 %v504_v4, %v39_v2  ;;  %v1253_v8 = vpop.f32.mrf.mxu3 }
  0xbd   :  { %641 = vst.msk [vmem:[#allocation3 + $0x4] sm:$0xf] %vm639_vm1, %v624_v3  ;;  %v573_v7 = vld [vmem:[#allocation2 + $0x10] sm:$0xff] }
  0xbe   :  { %v593_v9 = vadd.f32 %v966_v43, %v573_v7  ;;  %555 = vst.msk [vmem:[#allocation2 + $0x18] sm:$0xff] %vm19_vm0, %v539_v6  ;;  %v508_v10 = vpop.f32.mrf.mxu2  ;;  %v408_v11 = vpop.f32.mrf.mxu0  ;;  %v45_v6 = vld [vmem:[#allocation2 + $0x48] sm:$0xff] }
  0xbf   :  { %v457_v12 = vpop.f32.mrf.mxu1 }
  0xc0   :  { %v609_v13 = vmax.f32 %v593_v9, 0.0  ;;  %v458_v14 = vadd.f32 %v457_v12, %v408_v11  ;;  %v51_v11 = vld [vmem:[#allocation2 + $0x78] sm:$0xff] }
  0xc2   :  { %v625_v16 = vpack.c.bf16 %v609_v13, %v609_v13  ;;  %v507_v17 = vadd.f32 %v506_v61, %v458_v14 }
  0xc4   :  { %v676_v18 = vld [vmem:[#allocation3 + $0x4] sm:$0xf]  ;;  %642 = vst.msk [vmem:[#allocation3 + $0x8] sm:$0xf] %vm639_vm1, %v625_v16  ;;  %v540_v19 = vadd.f32 %v507_v17, %v40_v15  ;;  %v1260_v21 = vpop.f32.mrf.mxu3 }
  0xc5   :  { %677 = vst [vmem:[%s1292_s3 + $0x4] sm:$0xf] %v676_v18  ;;  %v574_v20 = vld [vmem:[#allocation2 + $0x18] sm:$0xff]  ;;  %v46_v18 = vld [vmem:[#allocation2 + $0x50] sm:$0xff] }
  0xc6   :  { %v594_v22 = vadd.f32 %v966_v43, %v574_v20  ;;  %556 = vst.msk [vmem:[#allocation2 + $0x20] sm:$0xff] %vm19_vm0, %v540_v19  ;;  %v511_v23 = vpop.f32.mrf.mxu2  ;;  %v410_v24 = vpop.f32.mrf.mxu0 }
  0xc7   :  { %v459_v25 = vpop.f32.mrf.mxu1 }
  0xc8   :  { %v610_v26 = vmax.f32 %v594_v22, 0.0  ;;  %v460_v27 = vadd.f32 %v459_v25, %v410_v24  ;;  %v478_v22 = vadd.f32 %v1260_v21, %v1236_v37  ;;  %v49_v37 = vld [vmem:[#allocation2 + $0x68] sm:$0xff] }
  0xca   :  { %v626_v29 = vpack.c.bf16 %v610_v26, %v610_v26  ;;  %v509_v30 = vadd.f32 %v508_v10, %v460_v27 }
  0xcb   :  { %v678_v31 = vld [vmem:[#allocation3 + $0x8] sm:$0xf] }
  0xcc   :  { %679 = vst [vmem:[%s1292_s3 + $0x8] sm:$0xf] %v678_v31  ;;  %v541_v32 = vadd.f32 %v509_v30, %v41_v28  ;;  %v1267_v33 = vpop.f32.mrf.mxu3 }
  0xcd   :  { %643 = vst.msk [vmem:[#allocation3 + $0xc] sm:$0xf] %vm639_vm1, %v626_v29  ;;  %v47_v29 = vld [vmem:[#allocation2 + $0x58] sm:$0xff] }
  0xce   :  { %557 = vst.msk [vmem:[#allocation2 + $0x28] sm:$0xff] %vm19_vm0, %v541_v32  ;;  %v513_v34 = vpop.f32.mrf.mxu2  ;;  %v413_v35 = vpop.f32.mrf.mxu0  ;;  %v480_v32 = vadd.f32 %v1267_v33, %v1242_v47 }
  0xcf   :  { %v462_v36 = vpop.f32.mrf.mxu1 }
  0xd0   :  { %v463_v38 = vadd.f32 %v462_v36, %v413_v35 }
  0xd2   :  { %v512_v40 = vadd.f32 %v511_v23, %v463_v38 }
  0xd4   :  { %v680_v41 = vld [vmem:[#allocation3 + $0xc] sm:$0xf]  ;;  %v542_v42 = vadd.f32 %v512_v40, %v42_v39  ;;  %v482_v43 = vpop.f32.mrf.mxu3 }
  0xd5   :  { %681 = vst [vmem:[%s1292_s3 + $0xc] sm:$0xf] %v680_v41  ;;  %v483_v60 = vadd.f32 %v482_v43, %v1246_v59 }
  0xd6   :  { %558 = vst.msk [vmem:[#allocation2 + $0x30] sm:$0xff] %vm19_vm0, %v542_v42  ;;  %v516_v44 = vpop.f32.mrf.mxu2  ;;  %v415_v45 = vpop.f32.mrf.mxu0 }
  0xd7   :  { %v464_v46 = vpop.f32.mrf.mxu1 }
  0xd8   :  { %v465_v48 = vadd.f32 %v464_v46, %v415_v45 }
  0xda   :  { %v514_v50 = vadd.f32 %v513_v34, %v465_v48 }
  0xdc   :  { %v543_v51 = vadd.f32 %v514_v50, %v43_v49  ;;  %v484_v52 = vpop.f32.mrf.mxu3 }
  0xdd   :  { %v485_v9 = vadd.f32 %v484_v52, %v1253_v8  ;;  %v48_v8 = vld [vmem:[#allocation2 + $0x60] sm:$0xff] }
  0xde   :  { %559 = vst.msk [vmem:[#allocation2 + $0x38] sm:$0xff] %vm19_vm0, %v543_v51  ;;  %v518_v53 = vpop.f32.mrf.mxu2  ;;  %v418_v54 = vpop.f32.mrf.mxu0 }
  0xdf   :  { %v467_v55 = vpop.f32.mrf.mxu1 }
  0xe0   :  { %v468_v56 = vadd.f32 %v467_v55, %v418_v54 }
  0xe2   :  { %v517_v58 = vadd.f32 %v516_v44, %v468_v56 }
  0xe4   :  { %v544_v61 = vadd.f32 %v517_v58, %v44_v57  ;;  %v531_v63 = vpop.f32.mrf.mxu3 }
  0xe5   :  { %v532_v1 = vadd.f32 %v531_v63, %v483_v60 }
  0xe6   :  { %560 = vst.msk [vmem:[#allocation2 + $0x40] sm:$0xff] %vm19_vm0, %v544_v61  ;;  %v521_v0 = vpop.f32.mrf.mxu2  ;;  %v420_v2 = vpop.f32.mrf.mxu0 }
  0xe7   :  { %v469_v3 = vpop.f32.mrf.mxu1  ;;  %v550_v4 = vadd.f32 %v532_v1, %v50_v62 }
  0xe8   :  { %v470_v5 = vadd.f32 %v469_v3, %v420_v2 }
  0xe9   :  { %566 = vst.msk [vmem:[#allocation2 + $0x70] sm:$0xff] %vm19_vm0, %v550_v4 }
  0xea   :  { %v519_v7 = vadd.f32 %v518_v53, %v470_v5 }
  0xec   :  { %v545_v10 = vadd.f32 %v519_v7, %v45_v6  ;;  %v533_v59 = vpop.f32.mrf.mxu3 }
  0xed   :  { %v534_v13 = vadd.f32 %v533_v59, %v485_v9 }
  0xee   :  { %561 = vst.msk [vmem:[#allocation2 + $0x48] sm:$0xff] %vm19_vm0, %v545_v10  ;;  %v523_v12 = vpop.f32.mrf.mxu2  ;;  %v423_v14 = vpop.f32.mrf.mxu0 }
  0xef   :  { %v472_v15 = vpop.f32.mrf.mxu1  ;;  %v551_v16 = vadd.f32 %v534_v13, %v51_v11 }
  0xf0   :  { %v473_v17 = vadd.f32 %v472_v15, %v423_v14 }
  0xf1   :  { %567 = vst.msk [vmem:[#allocation2 + $0x78] sm:$0xff] %vm19_vm0, %v551_v16 }
  0xf2   :  { %v522_v19 = vadd.f32 %v521_v0, %v473_v17 }
  0xf4   :  { %v546_v20 = vadd.f32 %v522_v19, %v46_v18 }
  0xf6   :  { %562 = vst.msk [vmem:[#allocation2 + $0x50] sm:$0xff] %vm19_vm0, %v546_v20  ;;  %v526_v23 = vpop.f32.mrf.mxu2  ;;  %v425_v24 = vpop.f32.mrf.mxu0 }
  0xf7   :  { %v527_v25 = vadd.f32 %v526_v23, %v478_v22  ;;  %v474_v26 = vpop.f32.mrf.mxu1 }
  0xf8   :  { %v475_v27 = vadd.f32 %v474_v26, %v425_v24 }
  0xf9   :  { %v548_v28 = vadd.f32 %v527_v25, %v48_v8 }
  0xfa   :  { %v524_v30 = vadd.f32 %v523_v12, %v475_v27 }
  0xfb   :  { %564 = vst.msk [vmem:[#allocation2 + $0x60] sm:$0xff] %vm19_vm0, %v548_v28 }
  0xfc   :  { %v547_v31 = vadd.f32 %v524_v30, %v47_v29 }
  0xfe   :  { %563 = vst.msk [vmem:[#allocation2 + $0x58] sm:$0xff] %vm19_vm0, %v547_v31  ;;  %v528_v21 = vpop.f32.mrf.mxu2 }
  0xff   :  { %v529_v34 = vadd.f32 %v528_v21, %v480_v32 }
 0x101   :  { %v549_v35 = vadd.f32 %v529_v34, %v49_v37 }
 0x103   :  { %565 = vst.msk [vmem:[#allocation2 + $0x68] sm:$0xff] %vm19_vm0, %v549_v35 }

// kernel: deeplab_forward.19
= control target key start
LH: loop header
LB: loop body
LE: loop exit
PB: predicated region body
PF: predicated region fallthrough
CT: control target
= control target key end

     0   :  { %vm561_vm0 = vcmask 523264   ;;  %s1957_s0 = inlined_call_operand.vmem [shape: bf16[32,576], index: 0, kind: input, shape index: {}]   ;;  %s1958_s1 = inlined_call_operand.vmem [shape: bf16[576,64], index: 1, kind: input, shape index: {}]   ;;  %s1959_s2 = inlined_call_operand.vmem [shape: f32[1,64], index: 2, kind: input, shape index: {}]   ;;  %s1960_s3 = inlined_call_operand.vmem [shape: bf16[64,128], index: 3, kind: input, shape index: {}]   ;;  %s1961_s4 = inlined_call_operand.vmem [shape: f32[1,128], index: 4, kind: input, shape index: {}]   ;;  %s1962_s5 = inlined_call_operand.vmem [shape: f32[32,128], index: 5, kind: output, shape index: {}]  }
   0x1   :  { %v1416_v0 = vld [vmem:[%s1958_s1 + $0x38] sm:$0xff]  ;;  %v1415_v2 = vld [vmem:[%s1958_s1 + $0x30] sm:$0xff]  ;;  %v1414_v4 = vld [vmem:[%s1958_s1 + $0x28] sm:$0xff] }
   0x2   :  { %v1424_v1 = vld [vmem:[%s1958_s1 + $0x78] sm:$0xff]  ;;  %1449 = vmatpush.bf16.msra.mxu2 %v1416_v0  ;;  %v1423_v3 = vld [vmem:[%s1958_s1 + $0x70] sm:$0xff]  ;;  %586 = vmatpush.bf16.msra.mxu0 %v1416_v0  ;;  %v1422_v5 = vld [vmem:[%s1958_s1 + $0x68] sm:$0xff] }
   0x3   :  { %1457 = vmatpush.bf16.msra.mxu3 %v1424_v1  ;;  %635 = vmatpush.bf16.msra.mxu1 %v1424_v1  ;;  %v1413_v6 = vld [vmem:[%s1958_s1 + $0x20] sm:$0xff]  ;;  %v1412_v8 = vld [vmem:[%s1958_s1 + $0x18] sm:$0xff]  ;;  %v1411_v10 = vld [vmem:[%s1958_s1 + $0x10] sm:$0xff] }
   0x4   :  { %v1421_v7 = vld [vmem:[%s1958_s1 + $0x60] sm:$0xff]  ;;  %v1420_v9 = vld [vmem:[%s1958_s1 + $0x58] sm:$0xff]  ;;  %v1419_v11 = vld [vmem:[%s1958_s1 + $0x50] sm:$0xff] }
   0x5   :  { %v1410_v12 = vld [vmem:[%s1958_s1 + $0x8] sm:$0xff]  ;;  %v1409_v14 = vld [vmem:[%s1958_s1] sm:$0xff]  ;;  %v1391_v17 = vld [vmem:[%s1957_s0 + $0xb0] sm:$0xf0] }
   0x6   :  { %1450 = vmatpush.bf16.msra.mxu2 %v1415_v2  ;;  %587 = vmatpush.bf16.msra.mxu0 %v1415_v2  ;;  %v1418_v13 = vld [vmem:[%s1958_s1 + $0x48] sm:$0xff]  ;;  %v1417_v15 = vld [vmem:[%s1958_s1 + $0x40] sm:$0xff]  ;;  %v1117_v19 = vld [vmem:[%s1957_s0 + $0xb4] sm:$0xf0] }
   0x7   :  { %1458 = vmatpush.bf16.msra.mxu3 %v1423_v3  ;;  %636 = vmatpush.bf16.msra.mxu1 %v1423_v3  ;;  %v1115_v16 = vld [vmem:[%s1957_s0 + $0xa0] sm:$0xf]  ;;  %v1389_v18 = vld [vmem:[%s1957_s0 + $0xa4] sm:$0xf]  ;;  %v1432_v20 = vld [vmem:[%s1958_s1 + $0xb8] sm:$0xff] }
   0x8   :  { %v1035_v21 = vld [vmem:[%s1957_s0] sm:$0xf]  ;;  %v1371_v22 = vld [vmem:[%s1957_s0 + $0x10] sm:$0xf0]  ;;  %v1440_v23 = vld [vmem:[%s1958_s1 + $0xf8] sm:$0xff]  ;;  %v1116_v26 = vor.u32 %v1391_v17, %v1115_v16  ;;  %v1120_v27 = vor.u32 %v1389_v18, %v1117_v19 }
   0x9   :  { %v1369_v24 = vld [vmem:[%s1957_s0 + $0x4] sm:$0xf]  ;;  %v1037_v25 = vld [vmem:[%s1957_s0 + $0x14] sm:$0xf0]  ;;  %v1036_v28 = vor.u32 %v1371_v22, %v1035_v21  ;;  %v1431_v30 = vld [vmem:[%s1958_s1 + $0xb0] sm:$0xff] }
   0xa   :  { %1451 = vmatpush.bf16.msra.mxu2 %v1414_v4  ;;  %588 = vmatpush.bf16.msra.mxu0 %v1414_v4  ;;  %v1040_v29 = vor.u32 %v1369_v24, %v1037_v25  ;;  %v1439_v31 = vld [vmem:[%s1958_s1 + $0xf0] sm:$0xff]  ;;  %v1444_v32 = vld [vmem:[%s1958_s1 + $0x118] sm:$0xff]  ;;  %v1430_v33 = vld [vmem:[%s1958_s1 + $0xa8] sm:$0xff] }
   0xb   :  { %1459 = vmatpush.bf16.msra.mxu3 %v1422_v5  ;;  %637 = vmatpush.bf16.msra.mxu1 %v1422_v5  ;;  %v1438_v34 = vld [vmem:[%s1958_s1 + $0xe8] sm:$0xff]  ;;  %v1443_v35 = vld [vmem:[%s1958_s1 + $0x110] sm:$0xff]  ;;  %v1429_v36 = vld [vmem:[%s1958_s1 + $0xa0] sm:$0xff] }
   0xc   :  { %v1437_v37 = vld [vmem:[%s1958_s1 + $0xe0] sm:$0xff]  ;;  %v1442_v38 = vld [vmem:[%s1958_s1 + $0x108] sm:$0xff]  ;;  %v1396_v40 = vld [vmem:[%s1957_s0 + $0xd8] sm:$0xf0] }
   0xd   :  { %v1135_v39 = vld [vmem:[%s1957_s0 + $0xc8] sm:$0xf]  ;;  %v1394_v41 = vld [vmem:[%s1957_s0 + $0xcc] sm:$0xf]  ;;  %v1137_v42 = vld [vmem:[%s1957_s0 + $0xdc] sm:$0xf0] }
   0xe   :  { %1452 = vmatpush.bf16.msra.mxu2 %v1413_v6  ;;  %589 = vmatpush.bf16.msra.mxu0 %v1413_v6  ;;  %v1055_v43 = vld [vmem:[%s1957_s0 + $0x28] sm:$0xf]  ;;  %v1376_v44 = vld [vmem:[%s1957_s0 + $0x38] sm:$0xf0]  ;;  %v1374_v46 = vld [vmem:[%s1957_s0 + $0x2c] sm:$0xf]  ;;  %v1136_v49 = vor.u32 %v1396_v40, %v1135_v39  ;;  %v1140_v50 = vor.u32 %v1394_v41, %v1137_v42 }
   0xf   :  { %1460 = vmatpush.bf16.msra.mxu3 %v1421_v7  ;;  %638 = vmatpush.bf16.msra.mxu1 %v1421_v7  ;;  %v1428_v45 = vld [vmem:[%s1958_s1 + $0x98] sm:$0xff]  ;;  %v1057_v47 = vld [vmem:[%s1957_s0 + $0x3c] sm:$0xf0]  ;;  %v1056_v51 = vor.u32 %v1376_v44, %v1055_v43  ;;  %v1427_v53 = vld [vmem:[%s1958_s1 + $0x90] sm:$0xff] }
  0x10   :  { %v1436_v48 = vld [vmem:[%s1958_s1 + $0xd8] sm:$0xff]  ;;  %v1060_v52 = vor.u32 %v1374_v46, %v1057_v47  ;;  %v1435_v54 = vld [vmem:[%s1958_s1 + $0xd0] sm:$0xff]  ;;  %v1426_v55 = vld [vmem:[%s1958_s1 + $0x88] sm:$0xff] }
  0x11   :  { %v1441_v56 = vld [vmem:[%s1958_s1 + $0x100] sm:$0xff]  ;;  %v1434_v57 = vld [vmem:[%s1958_s1 + $0xc8] sm:$0xff]  ;;  %v1155_v60 = vld [vmem:[%s1957_s0 + $0xf0] sm:$0xf] }
  0x12   :  { %1453 = vmatpush.bf16.msra.mxu2 %v1412_v8  ;;  %590 = vmatpush.bf16.msra.mxu0 %v1412_v8  ;;  %v1425_v58 = vld [vmem:[%s1958_s1 + $0x80] sm:$0xff]  ;;  %v1399_v62 = vld [vmem:[%s1957_s0 + $0xf4] sm:$0xf]  ;;  %v1157_v63 = vld [vmem:[%s1957_s0 + $0x104] sm:$0xf0] }
  0x13   :  { %1461 = vmatpush.bf16.msra.mxu3 %v1420_v9  ;;  %639 = vmatpush.bf16.msra.mxu1 %v1420_v9  ;;  %v1433_v59 = vld [vmem:[%s1958_s1 + $0xc0] sm:$0xff]  ;;  %v1075_v0 = vld [vmem:[%s1957_s0 + $0x50] sm:$0xf]  ;;  %v1379_v2 = vld [vmem:[%s1957_s0 + $0x54] sm:$0xf]  ;;  %v1160_v5 = vor.u32 %v1399_v62, %v1157_v63 }
  0x14   :  { %v1401_v61 = vld [vmem:[%s1957_s0 + $0x100] sm:$0xf0]  ;;  %v1077_v3 = vld [vmem:[%s1957_s0 + $0x64] sm:$0xf0]  ;;  %v1175_v8 = vld [vmem:[%s1957_s0 + $0x118] sm:$0xf] }
  0x15   :  { %v1381_v1 = vld [vmem:[%s1957_s0 + $0x60] sm:$0xf0]  ;;  %v1156_v4 = vor.u32 %v1401_v61, %v1155_v60  ;;  %v1080_v7 = vor.u32 %v1379_v2, %v1077_v3  ;;  %v1406_v9 = vld [vmem:[%s1957_s0 + $0x128] sm:$0xf0]  ;;  %v1372_v21 = vld [vmem:[%s1957_s0 + $0x18] sm:$0xf0] }
  0x16   :  { %1454 = vmatpush.bf16.msra.mxu2 %v1411_v10  ;;  %591 = vmatpush.bf16.msra.mxu0 %v1411_v10  ;;  %v1076_v6 = vor.u32 %v1381_v1, %v1075_v0  ;;  %v1404_v10 = vld [vmem:[%s1957_s0 + $0x11c] sm:$0xf]  ;;  %v1176_v16 = vor.u32 %v1406_v9, %v1175_v8  ;;  %v1370_v22 = vld [vmem:[%s1957_s0 + $0xc] sm:$0xf]  ;;  %v1051_v24 = vld [vmem:[%s1957_s0 + $0x10] sm:$0xf] }
  0x17   :  { %1462 = vmatpush.bf16.msra.mxu3 %v1419_v11  ;;  %640 = vmatpush.bf16.msra.mxu1 %v1419_v11  ;;  %v1177_v11 = vld [vmem:[%s1957_s0 + $0x12c] sm:$0xf0]  ;;  %v1373_v25 = vld [vmem:[%s1957_s0 + $0x20] sm:$0xf0]  ;;  %v1382_v39 = vld [vmem:[%s1957_s0 + $0x68] sm:$0xf0] }
  0x18   :  { %v1180_v17 = vor.u32 %v1404_v10, %v1177_v11  ;;  %v1380_v40 = vld [vmem:[%s1957_s0 + $0x5c] sm:$0xf]  ;;  %v1085_v41 = vld [vmem:[%s1957_s0 + $0x6c] sm:$0xf0]  ;;  %v1091_v42 = vld [vmem:[%s1957_s0 + $0x60] sm:$0xf] }
  0x19   :  { %v1383_v43 = vld [vmem:[%s1957_s0 + $0x70] sm:$0xf0]  ;;  %v1103_v47 = vld [vmem:[%s1957_s0 + $0x80] sm:$0xf]  ;;  %v1131_v61 = vld [vmem:[%s1957_s0 + $0xb0] sm:$0xf] }
  0x1a   :  { %1455 = vmatpush.bf16.msra.mxu2 %v1410_v12  ;;  %592 = vmatpush.bf16.msra.mxu0 %v1410_v12  ;;  %v1095_v12 = vld [vmem:[%s1957_s0 + $0x78] sm:$0xf]  ;;  %v1092_v46 = vor.u32 %v1383_v43, %v1091_v42  ;;  %v1125_v60 = vld [vmem:[%s1957_s0 + $0xbc] sm:$0xf0]  ;;  %v1393_v62 = vld [vmem:[%s1957_s0 + $0xc0] sm:$0xf0] }
  0x1b   :  { %1463 = vmatpush.bf16.msra.mxu3 %v1418_v13  ;;  %641 = vmatpush.bf16.msra.mxu1 %v1418_v13  ;;  %v1386_v13 = vld [vmem:[%s1957_s0 + $0x88] sm:$0xf0]  ;;  %v1132_v1 = vor.u32 %v1393_v62, %v1131_v61  ;;  %v1803_v3 = vld [vmem:[%s1959_s2] ss:$0 sm:$0xff]  ;;  %v1447_v9 = vld [vmem:[%s1960_s3 + $0x10] sm:$0xff] }
  0x1c   :  { %v1096_v18 = vor.u32 %v1386_v13, %v1095_v12  ;;  %v1143_v10 = vld [vmem:[%s1957_s0 + $0xd0] sm:$0xf]  ;;  %v1397_v11 = vld [vmem:[%s1957_s0 + $0xe0] sm:$0xf0]  ;;  %v1395_v12 = vld [vmem:[%s1957_s0 + $0xd4] sm:$0xf] }
  0x1d   :  { %v1145_v13 = vld [vmem:[%s1957_s0 + $0xe4] sm:$0xf0] }
  0x1e   :  { %1456 = vmatpush.bf16.msra.mxu2 %v1409_v14  ;;  %593 = vmatpush.bf16.msra.mxu0 %v1409_v14  ;;  %v1384_v14 = vld [vmem:[%s1957_s0 + $0x7c] sm:$0xf] }
  0x1f   :  { %1464 = vmatpush.bf16.msra.mxu3 %v1417_v15  ;;  %642 = vmatpush.bf16.msra.mxu1 %v1417_v15  ;;  %v1097_v15 = vld [vmem:[%s1957_s0 + $0x8c] sm:$0xf0] }
  0x20   :  { %v1100_v19 = vor.u32 %v1384_v14, %v1097_v15  ;;  %v1151_v14 = vld [vmem:[%s1957_s0 + $0xd8] sm:$0xf]  ;;  %v1398_v15 = vld [vmem:[%s1957_s0 + $0xe8] sm:$0xf0] }
  0x21   :  { %614 = vmatmul.bf16.vlgmr.msra.gmra.mxu2 %v1116_v26  ;;  %594 = vmatmul.bf16.vlgmr.msra.gmra.mxu0 %v1036_v28  ;;  %v1052_v28 = vor.u32 %v1373_v25, %v1051_v24 }
  0x22   :  { %684 = vmatpush.bf16.msrb.mxu2 %v1432_v20  ;;  %663 = vmatmul.bf16.vlgmr.msra.gmra.mxu3 %v1120_v27  ;;  %v1043_v20 = vld [vmem:[%s1957_s0 + $0x8] sm:$0xf] }
  0x23   :  { %733 = vmatpush.bf16.msrb.mxu3 %v1440_v23  ;;  %643 = vmatmul.bf16.vlgmr.msra.gmra.mxu1 %v1040_v29  ;;  %v1045_v23 = vld [vmem:[%s1957_s0 + $0x1c] sm:$0xf0]  ;;  %v1044_v26 = vor.u32 %v1372_v21, %v1043_v20  ;;  %v1063_v29 = vld [vmem:[%s1957_s0 + $0x30] sm:$0xf]  ;;  %v1148_v20 = vor.u32 %v1395_v12, %v1145_v13  ;;  %v1152_v21 = vor.u32 %v1398_v15, %v1151_v14 }
  0x24   :  { %786 = vmatpush.bf16.msrb.mxu0 %v1444_v32  ;;  %v1048_v27 = vor.u32 %v1370_v22, %v1045_v23  ;;  %v1065_v32 = vld [vmem:[%s1957_s0 + $0x44] sm:$0xf0] }
  0x26   :  { %685 = vmatpush.bf16.msrb.mxu2 %v1431_v30  ;;  %v1377_v30 = vld [vmem:[%s1957_s0 + $0x40] sm:$0xf0] }
  0x27   :  { %734 = vmatpush.bf16.msrb.mxu3 %v1439_v31  ;;  %v1375_v31 = vld [vmem:[%s1957_s0 + $0x34] sm:$0xf] }
  0x28   :  { %787 = vmatpush.bf16.msrb.mxu0 %v1443_v35  ;;  %v1064_v35 = vor.u32 %v1377_v30, %v1063_v29  ;;  %v1446_v29 = vld [vmem:[%s1960_s3 + $0x8] sm:$0xff]  ;;  %v1163_v30 = vld [vmem:[%s1957_s0 + $0xf8] sm:$0xf] }
  0x2a   :  { %686 = vmatpush.bf16.msrb.mxu2 %v1430_v33  ;;  %v1071_v33 = vld [vmem:[%s1957_s0 + $0x38] sm:$0xf] }
  0x2b   :  { %735 = vmatpush.bf16.msrb.mxu3 %v1438_v34  ;;  %v1378_v34 = vld [vmem:[%s1957_s0 + $0x48] sm:$0xf0] }
  0x2c   :  { %788 = vmatpush.bf16.msrb.mxu0 %v1442_v38  ;;  %v1083_v38 = vld [vmem:[%s1957_s0 + $0x58] sm:$0xf] }
  0x2d   :  { %v1084_v44 = vor.u32 %v1382_v39, %v1083_v38 }
  0x2e   :  { %687 = vmatpush.bf16.msrb.mxu2 %v1429_v36  ;;  %v1068_v36 = vor.u32 %v1375_v31, %v1065_v32  ;;  %v1402_v31 = vld [vmem:[%s1957_s0 + $0x108] sm:$0xf0]  ;;  %v1400_v32 = vld [vmem:[%s1957_s0 + $0xfc] sm:$0xf] }
  0x2f   :  { %736 = vmatpush.bf16.msrb.mxu3 %v1437_v37  ;;  %v1072_v37 = vor.u32 %v1378_v34, %v1071_v33  ;;  %v1165_v33 = vld [vmem:[%s1957_s0 + $0x10c] sm:$0xf0]  ;;  %v1171_v34 = vld [vmem:[%s1957_s0 + $0x100] sm:$0xf]  ;;  %v1164_v39 = vor.u32 %v1402_v31, %v1163_v30 }
  0x30   :  { %789 = vmatpush.bf16.msrb.mxu0 %v1441_v56  ;;  %v1448_v56 = vld [vmem:[%s1960_s3 + $0x18] sm:$0xff] }
  0x31   :  { %619 = vmatmul.bf16.gmra.mxu2 %v1136_v49  ;;  %599 = vmatmul.bf16.gmra.mxu0 %v1056_v51  ;;  %v1385_v49 = vld [vmem:[%s1957_s0 + $0x84] sm:$0xf]  ;;  %v1111_v51 = vld [vmem:[%s1957_s0 + $0x88] sm:$0xf] }
  0x32   :  { %688 = vmatpush.bf16.msrb.mxu2 %v1428_v45  ;;  %668 = vmatmul.bf16.gmra.mxu3 %v1140_v50  ;;  %v1088_v45 = vor.u32 %v1380_v40, %v1085_v41  ;;  %v1105_v50 = vld [vmem:[%s1957_s0 + $0x94] sm:$0xf0]  ;;  %v1168_v40 = vor.u32 %v1400_v32, %v1165_v33 }
  0x33   :  { %737 = vmatpush.bf16.msrb.mxu3 %v1436_v48  ;;  %648 = vmatmul.bf16.gmra.mxu1 %v1060_v52  ;;  %v1387_v48 = vld [vmem:[%s1957_s0 + $0x90] sm:$0xf0]  ;;  %v1388_v52 = vld [vmem:[%s1957_s0 + $0x98] sm:$0xf0] }
  0x34   :  { %919 = vmatpush.bf16.msrb.mxu1 %v1448_v56 }
  0x36   :  { %689 = vmatpush.bf16.msrb.mxu2 %v1427_v53  ;;  %v1104_v53 = vor.u32 %v1387_v48, %v1103_v47 }
  0x37   :  { %738 = vmatpush.bf16.msrb.mxu3 %v1435_v54  ;;  %v1108_v54 = vor.u32 %v1385_v49, %v1105_v50  ;;  %v1183_v49 = vld [vmem:[%s1957_s0 + $0x120] sm:$0xf]  ;;  %v1407_v50 = vld [vmem:[%s1957_s0 + $0x130] sm:$0xf0] }
  0x38   :  { %920 = vmatpush.bf16.msrb.mxu1 %v1447_v9 }
  0x3a   :  { %690 = vmatpush.bf16.msrb.mxu2 %v1426_v55  ;;  %v1112_v55 = vor.u32 %v1388_v52, %v1111_v51  ;;  %v1405_v51 = vld [vmem:[%s1957_s0 + $0x124] sm:$0xf]  ;;  %v1185_v52 = vld [vmem:[%s1957_s0 + $0x134] sm:$0xf0] }
  0x3b   :  { %739 = vmatpush.bf16.msrb.mxu3 %v1434_v57  ;;  %v1123_v57 = vld [vmem:[%s1957_s0 + $0xa8] sm:$0xf] }
  0x3c   :  { %921 = vmatpush.bf16.msrb.mxu1 %v1446_v29 }
  0x3e   :  { %691 = vmatpush.bf16.msrb.mxu2 %v1425_v58  ;;  %v1392_v58 = vld [vmem:[%s1957_s0 + $0xb8] sm:$0xf0] }
  0x3f   :  { %740 = vmatpush.bf16.msrb.mxu3 %v1433_v59  ;;  %v1390_v59 = vld [vmem:[%s1957_s0 + $0xac] sm:$0xf]  ;;  %v1124_v63 = vor.u32 %v1392_v58, %v1123_v57 }
  0x40   :  { %v1128_v0 = vor.u32 %v1390_v59, %v1125_v60  ;;  %v1184_v59 = vor.u32 %v1407_v50, %v1183_v49  ;;  %v1188_v60 = vor.u32 %v1405_v51, %v1185_v52 }
  0x41   :  { %624 = vmatmul.bf16.gmra.mxu2 %v1156_v4  ;;  %604 = vmatmul.bf16.gmra.mxu0 %v1076_v6 }
  0x42   :  { %673 = vmatmul.bf16.gmra.mxu3 %v1160_v5 }
  0x43   :  { %653 = vmatmul.bf16.gmra.mxu1 %v1080_v7 }
  0x51   :  { %629 = vmatmul.bf16.gmra.mxu2 %v1176_v16  ;;  %609 = vmatmul.bf16.gmra.mxu0 %v1096_v18 }
  0x52   :  { %678 = vmatmul.bf16.gmra.mxu3 %v1180_v17 }
  0x53   :  { %658 = vmatmul.bf16.gmra.mxu1 %v1100_v19  ;;  %v1144_v19 = vor.u32 %v1397_v11, %v1143_v10 }
  0x61   :  { %692 = vmatmul.bf16.vlgmr.msrb.gmra.mxu2 %v1044_v26  ;;  %1337 = vmatmul.msk.bf16.vlgmr.msrb.gmra.mxu0 %vm561_vm0, %v1052_v28 }
  0x62   :  { %741 = vmatmul.bf16.vlgmr.msrb.gmra.mxu3 %v1048_v27 }
  0x71   :  { %697 = vmatmul.bf16.gmra.mxu2 %v1064_v35  ;;  %1338 = vmatmul.msk.bf16.gmra.mxu0 %vm561_vm0, %v1072_v37  ;;  %v1403_v35 = vld [vmem:[%s1957_s0 + $0x110] sm:$0xf0] }
  0x72   :  { %746 = vmatmul.bf16.gmra.mxu3 %v1068_v36  ;;  %v1172_v41 = vor.u32 %v1403_v35, %v1171_v34 }
  0x81   :  { %702 = vmatmul.bf16.gmra.mxu2 %v1084_v44  ;;  %1339 = vmatmul.msk.bf16.gmra.mxu0 %vm561_vm0, %v1092_v46 }
  0x82   :  { %751 = vmatmul.bf16.gmra.mxu3 %v1088_v45 }
  0x91   :  { %707 = vmatmul.bf16.gmra.mxu2 %v1104_v53  ;;  %1340 = vmatmul.msk.bf16.gmra.mxu0 %vm561_vm0, %v1112_v55  ;;  %v1191_v53 = vld [vmem:[%s1957_s0 + $0x128] sm:$0xf]  ;;  %v1445_v55 = vld [vmem:[%s1960_s3] sm:$0xff] }
  0x92   :  { %756 = vmatmul.bf16.gmra.mxu3 %v1108_v54  ;;  %v1408_v54 = vld [vmem:[%s1957_s0 + $0x138] sm:$0xf0]  ;;  %922 = vmatpush.bf16.msrb.mxu1 %v1445_v55 }
  0x93   :  { %v1192_v61 = vor.u32 %v1408_v54, %v1191_v53 }
  0x9e   :  { %v1798_v2 = vpop.f32.mrf.mxu0 }
  0xa1   :  { %712 = vmatmul.bf16.gmra.mxu2 %v1124_v63  ;;  %1341 = vmatmul.msk.bf16.gmra.mxu0 %vm561_vm0, %v1132_v1 }
  0xa2   :  { %761 = vmatmul.bf16.gmra.mxu3 %v1128_v0  ;;  %v644_v0 = vpop.f32.mrf.mxu1 }
  0xa4   :  { %v615_v4 = vpop.f32.mrf.mxu2 }
  0xa5   :  { %v664_v5 = vpop.f32.mrf.mxu3  ;;  %v616_v6 = vadd.f32 %v1803_v3, %v615_v4 }
  0xa6   :  { %v1809_v8 = vpop.f32.mrf.mxu0 }
  0xa7   :  { %v1807_v7 = vadd.f32 %v664_v5, %v616_v6 }
  0xaa   :  { %v646_v10 = vpop.f32.mrf.mxu1 }
  0xac   :  { %v617_v16 = vpop.f32.mrf.mxu2 }
  0xad   :  { %v666_v17 = vpop.f32.mrf.mxu3  ;;  %v618_v18 = vadd.f32 %v1803_v3, %v617_v16  ;;  %v596_v16 = vadd.f32 %v1803_v3, %v1798_v2 }
  0xae   :  { %v1835_v23 = vpop.f32.mrf.mxu0 }
  0xaf   :  { %v1833_v22 = vadd.f32 %v666_v17, %v618_v18  ;;  %v601_v2 = vadd.f32 %v1803_v3, %v1835_v23 }
  0xb1   :  { %717 = vmatmul.bf16.gmra.mxu2 %v1144_v19  ;;  %1342 = vmatmul.msk.bf16.gmra.mxu0 %vm561_vm0, %v1152_v21  ;;  %v645_v19 = vadd.f32 %v644_v0, %v596_v16  ;;  %v598_v21 = vadd.f32 %v1803_v3, %v1809_v8 }
  0xb2   :  { %766 = vmatmul.bf16.gmra.mxu3 %v1148_v20  ;;  %v649_v20 = vpop.f32.mrf.mxu1 }
  0xb3   :  { %v650_v8 = vadd.f32 %v649_v20, %v601_v2 }
  0xb4   :  { %v620_v24 = vpop.f32.mrf.mxu2 }
  0xb5   :  { %v669_v25 = vpop.f32.mrf.mxu3  ;;  %v621_v26 = vadd.f32 %v1803_v3, %v620_v24 }
  0xb6   :  { %v1841_v28 = vpop.f32.mrf.mxu0 }
  0xb7   :  { %v1839_v27 = vadd.f32 %v669_v25, %v621_v26  ;;  %v647_v26 = vadd.f32 %v646_v10, %v598_v21 }
  0xba   :  { %v651_v33 = vpop.f32.mrf.mxu1 }
  0xbc   :  { %v622_v36 = vpop.f32.mrf.mxu2 }
  0xbd   :  { %v671_v37 = vpop.f32.mrf.mxu3  ;;  %v623_v38 = vadd.f32 %v1803_v3, %v622_v36 }
  0xbe   :  { %v1867_v43 = vpop.f32.mrf.mxu0 }
  0xbf   :  { %v1865_v42 = vadd.f32 %v671_v37, %v623_v38 }
  0xc1   :  { %722 = vmatmul.bf16.gmra.mxu2 %v1164_v39  ;;  %1343 = vmatmul.msk.bf16.gmra.mxu0 %vm561_vm0, %v1172_v41 }
  0xc2   :  { %771 = vmatmul.bf16.gmra.mxu3 %v1168_v40  ;;  %v654_v50 = vpop.f32.mrf.mxu1 }
  0xc4   :  { %v625_v44 = vpop.f32.mrf.mxu2 }
  0xc5   :  { %v674_v45 = vpop.f32.mrf.mxu3  ;;  %v626_v46 = vadd.f32 %v1803_v3, %v625_v44 }
  0xc6   :  { %v1873_v48 = vpop.f32.mrf.mxu0 }
  0xc7   :  { %v1871_v47 = vadd.f32 %v674_v45, %v626_v46  ;;  %v603_v45 = vadd.f32 %v1803_v3, %v1841_v28  ;;  %v608_v10 = vadd.f32 %v1803_v3, %v1873_v48 }
  0xc9   :  { %v652_v51 = vadd.f32 %v651_v33, %v603_v45 }
  0xcc   :  { %v627_v56 = vpop.f32.mrf.mxu2 }
  0xcd   :  { %v676_v57 = vpop.f32.mrf.mxu3  ;;  %v628_v58 = vadd.f32 %v1803_v3, %v627_v56 }
  0xce   :  { %v1899_v63 = vpop.f32.mrf.mxu0 }
  0xcf   :  { %v1897_v62 = vadd.f32 %v676_v57, %v628_v58  ;;  %v606_v58 = vadd.f32 %v1803_v3, %v1867_v43 }
  0xd1   :  { %727 = vmatmul.bf16.gmra.mxu2 %v1184_v59  ;;  %1344 = vmatmul.msk.bf16.gmra.mxu0 %vm561_vm0, %v1192_v61 }
  0xd2   :  { %776 = vmatmul.bf16.gmra.mxu3 %v1188_v60  ;;  %v656_v60 = vpop.f32.mrf.mxu1 }
  0xd4   :  { %v630_v1 = vpop.f32.mrf.mxu2 }
  0xd5   :  { %v679_v4 = vpop.f32.mrf.mxu3  ;;  %v631_v5 = vadd.f32 %v1803_v3, %v630_v1 }
  0xd6   :  { %v1905_v9 = vpop.f32.mrf.mxu0 }
  0xd7   :  { %v1903_v6 = vadd.f32 %v679_v4, %v631_v5  ;;  %v655_v4 = vadd.f32 %v654_v50, %v606_v58  ;;  %v613_v33 = vadd.f32 %v1803_v3, %v1905_v9 }
  0xdc   :  { %v632_v11 = vpop.f32.mrf.mxu2 }
  0xdd   :  { %v681_v12 = vpop.f32.mrf.mxu3  ;;  %v633_v13 = vadd.f32 %v1803_v3, %v632_v11 }
  0xde   :  { %v791_v15 = vpop.f32.mrf.mxu0 }
  0xdf   :  { %v1908_v14 = vadd.f32 %v681_v12, %v633_v13  ;;  %v657_v13 = vadd.f32 %v656_v60, %v608_v10 }
  0xe4   :  { %v693_v17 = vpop.f32.mrf.mxu2 }
  0xe5   :  { %v742_v18 = vpop.f32.mrf.mxu3  ;;  %v694_v24 = vadd.f32 %v693_v17, %v645_v19 }
  0xe6   :  { %v793_v25 = vpop.f32.mrf.mxu0 }
  0xe7   :  { %v743_v29 = vadd.f32 %v742_v18, %v694_v24  ;;  %v659_v18 = vpop.f32.mrf.mxu1  ;;  %v611_v24 = vadd.f32 %v1803_v3, %v1899_v63 }
  0xe9   :  { %v792_v34 = vadd.f32 %v791_v15, %v743_v29 }
  0xeb   :  { %v831_v38 = vmax.f32 %v792_v34, 0.0 }
  0xec   :  { %v695_v30 = vpop.f32.mrf.mxu2 }
  0xed   :  { %v744_v31 = vpop.f32.mrf.mxu3  ;;  %v696_v32 = vadd.f32 %v695_v30, %v647_v26 }
  0xee   :  { %v796_v36 = vpop.f32.mrf.mxu0 }
  0xef   :  { %v745_v35 = vadd.f32 %v744_v31, %v696_v32  ;;  %v660_v31 = vadd.f32 %v659_v18, %v611_v24 }
  0xf1   :  { %v794_v37 = vadd.f32 %v793_v25, %v745_v35 }
  0xf3   :  { %v832_v39 = vmax.f32 %v794_v37, 0.0 }
  0xf4   :  { %v698_v40 = vpop.f32.mrf.mxu2 }
  0xf5   :  { %v747_v41 = vpop.f32.mrf.mxu3  ;;  %v847_v44 = vpack.c.bf16 %v832_v39, %v831_v38  ;;  %v699_v46 = vadd.f32 %v698_v40, %v650_v8 }
  0xf6   :  { %v798_v49 = vpop.f32.mrf.mxu0 }
  0xf7   :  { %1361 = vmatmul.msk.bf16.vlgmr.msrb.gmra.mxu1 %vm561_vm0, %v847_v44  ;;  %v748_v52 = vadd.f32 %v747_v41, %v699_v46 }
  0xf9   :  { %v797_v55 = vadd.f32 %v796_v36, %v748_v52  ;;  %v661_v36 = vpop.f32.mrf.mxu1 }
  0xfa   :  { %v662_v2 = vadd.f32 %v661_v36, %v613_v33 }
  0xfb   :  { %v833_v61 = vmax.f32 %v797_v55, 0.0 }
  0xfc   :  { %v700_v53 = vpop.f32.mrf.mxu2 }
  0xfd   :  { %v749_v54 = vpop.f32.mrf.mxu3  ;;  %v701_v23 = vadd.f32 %v700_v53, %v652_v51 }
  0xfe   :  { %v801_v57 = vpop.f32.mrf.mxu0 }
  0xff   :  { %v750_v56 = vadd.f32 %v749_v54, %v701_v23 }
 0x101   :  { %v799_v59 = vadd.f32 %v798_v49, %v750_v56 }
 0x103   :  { %v834_v28 = vmax.f32 %v799_v59, 0.0 }
 0x104   :  { %v703_v0 = vpop.f32.mrf.mxu2 }
 0x105   :  { %v752_v1 = vpop.f32.mrf.mxu3  ;;  %v848_v5 = vpack.c.bf16 %v834_v28, %v833_v61  ;;  %v704_v11 = vadd.f32 %v703_v0, %v655_v4 }
 0x106   :  { %v803_v12 = vpop.f32.mrf.mxu0 }
 0x107   :  { %1362 = vmatmul.msk.bf16.gmra.mxu1 %vm561_vm0, %v848_v5  ;;  %v753_v15 = vadd.f32 %v752_v1, %v704_v11 }
 0x109   :  { %v802_v19 = vadd.f32 %v801_v57, %v753_v15 }
 0x10b   :  { %v835_v26 = vmax.f32 %v802_v19, 0.0 }
 0x10c   :  { %v705_v16 = vpop.f32.mrf.mxu2 }
 0x10d   :  { %v754_v17 = vpop.f32.mrf.mxu3  ;;  %v706_v43 = vadd.f32 %v705_v16, %v657_v13 }
 0x10e   :  { %v806_v21 = vpop.f32.mrf.mxu0 }
 0x10f   :  { %v755_v20 = vadd.f32 %v754_v17, %v706_v43 }
 0x111   :  { %v804_v25 = vadd.f32 %v803_v12, %v755_v20 }
 0x113   :  { %v836_v29 = vmax.f32 %v804_v25, 0.0 }
 0x114   :  { %v708_v48 = vpop.f32.mrf.mxu2 }
 0x115   :  { %v757_v30 = vpop.f32.mrf.mxu3  ;;  %v849_v32 = vpack.c.bf16 %v836_v29, %v835_v26  ;;  %v709_v34 = vadd.f32 %v708_v48, %v660_v31 }
 0x116   :  { %v808_v35 = vpop.f32.mrf.mxu0 }
 0x117   :  { %1363 = vmatmul.msk.bf16.gmra.mxu1 %vm561_vm0, %v849_v32  ;;  %v758_v37 = vadd.f32 %v757_v30, %v709_v34 }
 0x119   :  { %v807_v40 = vadd.f32 %v806_v21, %v758_v37 }
 0x11b   :  { %v837_v45 = vmax.f32 %v807_v40, 0.0 }
 0x11c   :  { %v710_v38 = vpop.f32.mrf.mxu2 }
 0x11d   :  { %v759_v39 = vpop.f32.mrf.mxu3  ;;  %v711_v63 = vadd.f32 %v710_v38, %v662_v2 }
 0x11e   :  { %v811_v8 = vpop.f32.mrf.mxu0 }
 0x11f   :  { %v760_v41 = vadd.f32 %v759_v39, %v711_v63 }
 0x121   :  { %v809_v44 = vadd.f32 %v808_v35, %v760_v41 }
 0x123   :  { %v838_v46 = vmax.f32 %v809_v44, 0.0 }
 0x124   :  { %v713_v49 = vpop.f32.mrf.mxu2 }
 0x125   :  { %v762_v50 = vpop.f32.mrf.mxu3  ;;  %v850_v51 = vpack.c.bf16 %v838_v46, %v837_v45  ;;  %v714_v3 = vadd.f32 %v713_v49, %v1807_v7 }
 0x126   :  { %v813_v9 = vpop.f32.mrf.mxu0 }
 0x127   :  { %1364 = vmatmul.msk.bf16.gmra.mxu1 %vm561_vm0, %v850_v51  ;;  %v763_v52 = vadd.f32 %v762_v50, %v714_v3 }
 0x129   :  { %v812_v55 = vadd.f32 %v811_v8, %v763_v52 }
 0x12b   :  { %v839_v59 = vmax.f32 %v812_v55, 0.0 }
 0x12c   :  { %v715_v53 = vpop.f32.mrf.mxu2 }
 0x12d   :  { %v764_v54 = vpop.f32.mrf.mxu3  ;;  %v716_v23 = vadd.f32 %v715_v53, %v1833_v22 }
 0x12e   :  { %v816_v57 = vpop.f32.mrf.mxu0 }
 0x12f   :  { %v765_v56 = vadd.f32 %v764_v54, %v716_v23 }
 0x131   :  { %v814_v58 = vadd.f32 %v813_v9, %v765_v56 }
 0x133   :  { %v840_v60 = vmax.f32 %v814_v58, 0.0 }
 0x134   :  { %v718_v61 = vpop.f32.mrf.mxu2 }
 0x135   :  { %v767_v28 = vpop.f32.mrf.mxu3  ;;  %v851_v0 = vpack.c.bf16 %v840_v60, %v839_v59  ;;  %v719_v1 = vadd.f32 %v718_v61, %v1839_v27 }
 0x136   :  { %v818_v7 = vpop.f32.mrf.mxu0 }
 0x137   :  { %1365 = vmatmul.msk.bf16.gmra.mxu1 %vm561_vm0, %v851_v0  ;;  %v768_v4 = vadd.f32 %v767_v28, %v719_v1 }
 0x139   :  { %v817_v22 = vadd.f32 %v816_v57, %v768_v4 }
 0x13b   :  { %v841_v16 = vmax.f32 %v817_v22, 0.0 }
 0x13c   :  { %v720_v5 = vpop.f32.mrf.mxu2 }
 0x13d   :  { %v769_v10 = vpop.f32.mrf.mxu3  ;;  %v721_v11 = vadd.f32 %v720_v5, %v1865_v42 }
 0x13e   :  { %v821_v15 = vpop.f32.mrf.mxu0 }
 0x13f   :  { %v770_v12 = vadd.f32 %v769_v10, %v721_v11 }
 0x141   :  { %v819_v13 = vadd.f32 %v818_v7, %v770_v12 }
 0x143   :  { %v842_v17 = vmax.f32 %v819_v13, 0.0 }
 0x144   :  { %v723_v43 = vpop.f32.mrf.mxu2 }
 0x145   :  { %v772_v18 = vpop.f32.mrf.mxu3  ;;  %v852_v19 = vpack.c.bf16 %v842_v17, %v841_v16  ;;  %v724_v20 = vadd.f32 %v723_v43, %v1871_v47 }
 0x146   :  { %v823_v21 = vpop.f32.mrf.mxu0 }
 0x147   :  { %1366 = vmatmul.msk.bf16.gmra.mxu1 %vm561_vm0, %v852_v19  ;;  %v773_v27 = vadd.f32 %v772_v18, %v724_v20 }
 0x149   :  { %v822_v42 = vadd.f32 %v821_v15, %v773_v27 }
 0x14b   :  { %v843_v30 = vmax.f32 %v822_v42, 0.0 }
 0x14c   :  { %v725_v24 = vpop.f32.mrf.mxu2 }
 0x14d   :  { %v774_v25 = vpop.f32.mrf.mxu3  ;;  %v726_v26 = vadd.f32 %v725_v24, %v1897_v62 }
 0x14e   :  { %v826_v35 = vpop.f32.mrf.mxu0 }
 0x14f   :  { %v775_v29 = vadd.f32 %v774_v25, %v726_v26 }
 0x151   :  { %v824_v48 = vadd.f32 %v823_v21, %v775_v29 }
 0x153   :  { %v844_v31 = vmax.f32 %v824_v48, 0.0 }
 0x154   :  { %v728_v32 = vpop.f32.mrf.mxu2 }
 0x155   :  { %v777_v33 = vpop.f32.mrf.mxu3  ;;  %v853_v34 = vpack.c.bf16 %v844_v31, %v843_v30  ;;  %v729_v36 = vadd.f32 %v728_v32, %v1903_v6  ;;  %v1466_v6 = vld [vmem:[%s1961_s4] ss:$0 sm:$0xff] }
 0x156   :  { %v828_v63 = vpop.f32.mrf.mxu0 }
 0x157   :  { %1367 = vmatmul.msk.bf16.gmra.mxu1 %vm561_vm0, %v853_v34  ;;  %v778_v47 = vadd.f32 %v777_v33, %v729_v36 }
 0x159   :  { %v827_v39 = vadd.f32 %v826_v35, %v778_v47 }
 0x15b   :  { %v845_v41 = vmax.f32 %v827_v39, 0.0 }
 0x15c   :  { %v730_v2 = vpop.f32.mrf.mxu2 }
 0x15d   :  { %v731_v37 = vadd.f32 %v730_v2, %v1908_v14  ;;  %v779_v38 = vpop.f32.mrf.mxu3 }
 0x15f   :  { %v780_v62 = vadd.f32 %v779_v38, %v731_v37 }
 0x161   :  { %v829_v40 = vadd.f32 %v828_v63, %v780_v62 }
 0x163   :  { %v846_v8 = vmax.f32 %v829_v40, 0.0 }
 0x165   :  { %v854_v44 = vpack.c.bf16 %v846_v8, %v845_v41 }
 0x167   :  { %1368 = vmatmul.msk.bf16.gmra.mxu1 %vm561_vm0, %v854_v44 }
 0x174   :  { %v924_v45 = vpop.f32.mrf.mxu1 }
 0x175   :  { %v925_v46 = vadd.f32 %v1466_v6, %v924_v45 }
 0x177   :  { %1017 = vst [vmem:[%s1962_s5] sm:$0xff] %v925_v46 }
 0x17c   :  { %v926_v14 = vpop.f32.mrf.mxu1 }
 0x17d   :  { %v927_v49 = vadd.f32 %v1466_v6, %v926_v14 }
 0x17f   :  { %1019 = vst [vmem:[%s1962_s5 + $0x8] sm:$0xff] %v927_v49 }
 0x184   :  { %v929_v50 = vpop.f32.mrf.mxu1 }
 0x185   :  { %v930_v51 = vadd.f32 %v1466_v6, %v929_v50 }
 0x187   :  { %1021 = vst [vmem:[%s1962_s5 + $0x10] sm:$0xff] %v930_v51 }
 0x18c   :  { %v931_v3 = vpop.f32.mrf.mxu1 }
 0x18d   :  { %v932_v9 = vadd.f32 %v1466_v6, %v931_v3 }
 0x18f   :  { %1023 = vst [vmem:[%s1962_s5 + $0x18] sm:$0xff] %v932_v9 }
 0x194   :  { %v934_v52 = vpop.f32.mrf.mxu1 }
 0x19c   :  { %v936_v53 = vpop.f32.mrf.mxu1 }
 0x1a4   :  { %v939_v54 = vpop.f32.mrf.mxu1 }
 0x1ac   :  { %v941_v23 = vpop.f32.mrf.mxu1 }
 0x1b4   :  { %v944_v55 = vpop.f32.mrf.mxu1 }
 0x1bc   :  { %v946_v56 = vpop.f32.mrf.mxu1 }
 0x1c4   :  { %v949_v57 = vpop.f32.mrf.mxu1 }
 0x1cc   :  { %v951_v58 = vpop.f32.mrf.mxu1 }
 0x1d4   :  { %v954_v59 = vpop.f32.mrf.mxu1 }
 0x1dc   :  { %v956_v60 = vpop.f32.mrf.mxu1 }
 0x1e4   :  { %v959_v61 = vpop.f32.mrf.mxu1 }
 0x1ec   :  { %v961_v28 = vpop.f32.mrf.mxu1 }

</bundles_post_ra>
